<compile_context>
chip_gen: v7x
topology: tpu7x:2x2x1
jax: 0.10.0
libtpu: 0.0.40
codegen_flags: <defaults>
</compile_context>

<pallas_src>
import jax
import jax.numpy as jnp
from jax.experimental import pallas as pl
from jax.experimental.pallas import tpu as pltpu

N_CH = 64          # channel width of the residual trunk
K_INIT = 7         # initialConv kernel size
K_RES = 3          # shared residual conv kernel size


def scanconv_kernel(xy_ref, w0_ref, b0_ref, wc_ref, bc_ref, s3_ref, s7_ref, out_ref):
    # xy_ref : (1, 2, L)        one batch element, channels-major
    # w0_ref : (7, 64, 2)       initial conv taps
    # b0_ref : (64, 1)
    # wc_ref : (3, 64, 64)      shared residual conv taps
    # bc_ref : (64, 1)
    # s3_ref : (Lout, M)        stride-3 selection matrix (MaxPool1d(k=1, s=3))
    # s7_ref : (M, P)           stride-7 selection matrix (AvgPool1d(k=1, s=7))
    # out_ref: (1, 64, P)
    Lout, M = s3_ref.shape

    xy = xy_ref[0]                                   # (2, L)

    # ---- initialConv: Conv1d(2 -> 64, k=7, valid). K=2 contraction done as
    #      broadcasted VPU FMAs (far too small to be worth the MXU). ----
    h = jnp.zeros((N_CH, Lout), jnp.float32)
    for k in range(K_INIT):                          # static unroll
        wk = w0_ref[k]                               # (64, 2)
        win = xy[:, k:k + Lout]                      # (2, Lout)
        h = h + wk[:, 0:1] * win[0:1, :] + wk[:, 1:2] * win[1:2, :]
    h = h + b0_ref[...]                              # bias, lane-broadcast

    # ---- MaxPool1d(kernel=1, stride=3) == column subsample via selection matmul ----
    c = jnp.dot(h, s3_ref[...], preferred_element_type=jnp.float32)     # (64, M)

    wc0, wc1, wc2 = wc_ref[0], wc_ref[1], wc_ref[2]  # (64, 64) each
    bc = bc_ref[...]
    zcol = jnp.zeros((N_CH, 1), jnp.float32)

    def conv3(z):
        # shared Conv1d(64, 64, k=3, padding=1):
        #   out[:, t] = wc0 @ z[:, t-1] + wc1 @ z[:, t] + wc2 @ z[:, t+1] + bc
        left = jnp.dot(wc0, z, preferred_element_type=jnp.float32)
        mid = jnp.dot(wc1, z, preferred_element_type=jnp.float32)
        right = jnp.dot(wc2, z, preferred_element_type=jnp.float32)
        left = jnp.concatenate([zcol, left[:, :M - 1]], axis=1)    # shift right, zero-pad
        right = jnp.concatenate([right[:, 1:], zcol], axis=1)      # shift left, zero-pad
        return left + mid + right + bc

    # ---- four residual blocks, all with the SAME shared conv weights ----
    for blk in range(4):
        t = jnp.maximum(conv3(c), 0.0)               # relu(conv(c))
        t2 = conv3(t)                                # conv(relu(conv(c)))
        if blk < 3:
            c = jnp.maximum(t2 + c, 0.0)
        else:
            c = t2 * c                               # last block multiplies; no relu before pooling

    # ---- AvgPool1d(kernel=1, stride=7) == column subsample via selection matmul ----
    out_ref[0] = jnp.dot(c, s7_ref[...], preferred_element_type=jnp.float32).astype(out_ref.dtype)


def scan_conv_net(x, y, params):
    """x, y: (B, L) float32  ->  (B, 64 * P) float32  ==  ScanConvNet.forward(x, y)."""
    w0, b0, wc, bc = params          # PyTorch layouts: (64,2,7), (64,), (64,64,3), (64,)
    B, L = x.shape
    Lout = L - (K_INIT - 1)          # valid conv
    M = (Lout - 1) // 3 + 1          # MaxPool1d(kernel=1, stride=3)
    P = (M - 1) // 7 + 1             # AvgPool1d(kernel=1, stride=7)

    xy = jnp.stack([x, y], axis=1)                       # (B, 2, L)
    w0_t = jnp.transpose(w0, (2, 0, 1))                  # (7, 64, 2)  tap-major, (out, in)
    wc_t = jnp.transpose(wc, (2, 0, 1))                  # (3, 64, 64)
    b0_c = b0.reshape(N_CH, 1)
    bc_c = bc.reshape(N_CH, 1)

    # kernel_size=1 pooling layers are exact strided subsamplings -> constant 0/1 selectors.
    s3 = (jnp.arange(Lout)[:, None] == 3 * jnp.arange(M)[None, :]).astype(jnp.float32)  # (Lout, M)
    s7 = (jnp.arange(M)[:, None] == 7 * jnp.arange(P)[None, :]).astype(jnp.float32)     # (M, P)

    flops = B * (2 * N_CH * 2 * K_INIT * Lout            # initial conv
                 + 2 * N_CH * Lout * M                   # stride-3 selection
                 + 8 * K_RES * 2 * N_CH * N_CH * M       # 8 shared 3-tap convs
                 + 2 * N_CH * M * P)                     # stride-7 selection
    bytes_accessed = 4 * (xy.size + w0_t.size + b0_c.size + wc_t.size + bc_c.size
                          + s3.size + s7.size + B * N_CH * P)

    grid_spec = pltpu.PrefetchScalarGridSpec(
        num_scalar_prefetch=0,
        grid=(B,),
        in_specs=[
            pl.BlockSpec((1, 2, L), lambda b: (b, 0, 0)),         # xy, per-batch tile
            pl.BlockSpec((K_INIT, N_CH, 2), lambda b: (0, 0, 0)),  # initial conv W (resident)
            pl.BlockSpec((N_CH, 1), lambda b: (0, 0)),             # initial conv b
            pl.BlockSpec((K_RES, N_CH, N_CH), lambda b: (0, 0, 0)),  # shared conv W (resident)
            pl.BlockSpec((N_CH, 1), lambda b: (0, 0)),             # shared conv b
            pl.BlockSpec((Lout, M), lambda b: (0, 0)),             # stride-3 selector
            pl.BlockSpec((M, P), lambda b: (0, 0)),                # stride-7 selector
        ],
        out_specs=pl.BlockSpec((1, N_CH, P), lambda b: (b, 0, 0)),
    )

    out = pl.pallas_call(
        scanconv_kernel,
        out_shape=jax.ShapeDtypeStruct((B, N_CH, P), jnp.float32),
        grid_spec=grid_spec,
        compiler_params=pltpu.CompilerParams(
            dimension_semantics=("parallel",),   # batch axis: independent, megacore-shardable
        ),
        cost_estimate=pl.CostEstimate(flops=flops, transcendentals=0,
                                      bytes_accessed=bytes_accessed),
    )(xy, w0_t, b0_c, wc_t, bc_c, s3, s7)

    # PyTorch's conv.view(B, -1) flattens (B, 64, P) channel-major; our output already is.
    return out.reshape(B, N_CH * P)


def init_params(key):
    """Deterministic init mimicking nn.Conv1d defaults (uniform +/- 1/sqrt(fan_in))."""
    k1, k2, k3, k4 = jax.random.split(key, 4)
    b_init = 1.0 / (2 * K_INIT) ** 0.5
    w0 = jax.random.uniform(k1, (N_CH, 2, K_INIT), jnp.float32, -b_init, b_init)
    b0 = jax.random.uniform(k2, (N_CH,), jnp.float32, -b_init, b_init)
    b_res = 1.0 / (N_CH * K_RES) ** 0.5
    wc = jax.random.uniform(k3, (N_CH, N_CH, K_RES), jnp.float32, -b_res, b_res)
    bc = jax.random.uniform(k4, (N_CH,), jnp.float32, -b_res, b_res)
    return w0, b0, wc, bc


def reference(x, y, params):
    """Pure-JAX reference mirroring the PyTorch forward."""
    w0, b0, wc, bc = params
    xy = jnp.stack([x, y], axis=1)                        # (B, 2, L)
    B, _, L = xy.shape
    Lout = L - (K_INIT - 1)
    h = sum(jnp.einsum('oc,bct->bot', w0[:, :, k], xy[:, :, k:k + Lout])
            for k in range(K_INIT)) + b0[None, :, None]
    c = h[:, :, ::3]                                      # MaxPool1d(1, stride=3)
    M = c.shape[-1]

    def conv3(z):
        zp = jnp.pad(z, ((0, 0), (0, 0), (1, 1)))
        return sum(jnp.einsum('oc,bct->bot', wc[:, :, k], zp[:, :, k:k + M])
                   for k in range(K_RES)) + bc[None, :, None]

    for _ in range(3):
        t = jax.nn.relu(conv3(c))
        c = jax.nn.relu(conv3(t) + c)
    t = jax.nn.relu(conv3(c))
    c = conv3(t) * c
    return c[:, :, ::7].reshape(B, -1)                    # AvgPool1d(1, stride=7) + view


if __name__ == "__main__":
    key = jax.random.PRNGKey(0)
    kx, ky, kp = jax.random.split(key, 3)

    B, L = 2, 128        # -> Lout=122, M=41, P=6, output (2, 384)
    x = jax.random.normal(kx, (B, L), dtype=jnp.float32)
    y = jax.random.normal(ky, (B, L), dtype=jnp.float32)
    params = init_params(kp)

    out = scan_conv_net(x, y, params)
    out = jax.block_until_ready(out)

    ref = reference(x, y, params)
    assert out.shape == ref.shape, (out.shape, ref.shape)
    assert jnp.allclose(out, ref, atol=5e-3, rtol=5e-3), float(jnp.max(jnp.abs(out - ref)))

    print("KERNEL_OK")
</pallas_src>

<mosaic_0001>
module attributes {stable_mosaic.version = 11 : i64} {
  func.func @scanconv_kernel(%arg0: i32, %arg1: memref<1x2x128xf32, #tpu.memory_space<vmem>>, %arg2: memref<7x64x2xf32, #tpu.memory_space<vmem>>, %arg3: memref<64x1xf32, #tpu.memory_space<vmem>>, %arg4: memref<3x64x64xf32, #tpu.memory_space<vmem>>, %arg5: memref<64x1xf32, #tpu.memory_space<vmem>>, %arg6: memref<122x41xf32, #tpu.memory_space<vmem>>, %arg7: memref<41x6xf32, #tpu.memory_space<vmem>>, %arg8: memref<1x64x6xf32, #tpu.memory_space<vmem>>) attributes {dimension_semantics = [#tpu.dimension_semantics<parallel>], iteration_bounds = array<i64: 2>, scalar_prefetch = 0 : i64, scratch_operands = 0 : i64, tpu.core_type = #tpu.core_type<tc>, window_params = [{transform_indices = @transform_0, window_bounds = array<i64: 1, 2, 128>}, {pipeline_mode = #tpu.pipeline_mode<synchronous>, transform_indices = @transform_1, window_bounds = array<i64: 7, 64, 2>}, {pipeline_mode = #tpu.pipeline_mode<synchronous>, transform_indices = @transform_2, window_bounds = array<i64: 64, 1>}, {pipeline_mode = #tpu.pipeline_mode<synchronous>, transform_indices = @transform_3, window_bounds = array<i64: 3, 64, 64>}, {pipeline_mode = #tpu.pipeline_mode<synchronous>, transform_indices = @transform_4, window_bounds = array<i64: 64, 1>}, {pipeline_mode = #tpu.pipeline_mode<synchronous>, transform_indices = @transform_5, window_bounds = array<i64: 122, 41>}, {pipeline_mode = #tpu.pipeline_mode<synchronous>, transform_indices = @transform_6, window_bounds = array<i64: 41, 6>}, {transform_indices = @transform_7, window_bounds = array<i64: 1, 64, 6>}]} {
    %c0 = arith.constant 0 : index
    %c0_0 = arith.constant 0 : index
    %c0_1 = arith.constant 0 : index
    %0 = vector.load %arg1[%c0, %c0_0, %c0_1] : memref<1x2x128xf32, #tpu.memory_space<vmem>>, vector<1x2x128xf32>
    %1 = vector.shape_cast %0 : vector<1x2x128xf32> to vector<2x128xf32>
    %cst = arith.constant 0.000000e+00 : f32
    %2 = vector.broadcast %cst : f32 to vector<64x122xf32>
    %c0_2 = arith.constant 0 : index
    %c0_3 = arith.constant 0 : index
    %c0_4 = arith.constant 0 : index
    %3 = vector.load %arg2[%c0_2, %c0_3, %c0_4] : memref<7x64x2xf32, #tpu.memory_space<vmem>>, vector<1x64x2xf32>
    %4 = vector.shape_cast %3 : vector<1x64x2xf32> to vector<64x2xf32>
    %5 = vector.extract_strided_slice %1 {offsets = [0, 0], sizes = [2, 122], strides = [1, 1]} : vector<2x128xf32> to vector<2x122xf32>
    %6 = vector.extract_strided_slice %4 {offsets = [0, 0], sizes = [64, 1], strides = [1, 1]} : vector<64x2xf32> to vector<64x1xf32>
    %7 = vector.extract_strided_slice %5 {offsets = [0, 0], sizes = [1, 122], strides = [1, 1]} : vector<2x122xf32> to vector<1x122xf32>
    %8 = vector.broadcast %6 : vector<64x1xf32> to vector<64x122xf32>
    %9 = vector.broadcast %7 : vector<1x122xf32> to vector<64x122xf32>
    %10 = arith.mulf %8, %9 : vector<64x122xf32>
    %11 = arith.addf %2, %10 : vector<64x122xf32>
    %12 = vector.extract_strided_slice %4 {offsets = [0, 1], sizes = [64, 1], strides = [1, 1]} : vector<64x2xf32> to vector<64x1xf32>
    %13 = vector.extract_strided_slice %5 {offsets = [1, 0], sizes = [1, 122], strides = [1, 1]} : vector<2x122xf32> to vector<1x122xf32>
    %14 = vector.broadcast %12 : vector<64x1xf32> to vector<64x122xf32>
    %15 = vector.broadcast %13 : vector<1x122xf32> to vector<64x122xf32>
    %16 = arith.mulf %14, %15 : vector<64x122xf32>
    %17 = arith.addf %11, %16 : vector<64x122xf32>
    %c1 = arith.constant 1 : index
    %c0_5 = arith.constant 0 : index
    %c0_6 = arith.constant 0 : index
    %18 = vector.load %arg2[%c1, %c0_5, %c0_6] : memref<7x64x2xf32, #tpu.memory_space<vmem>>, vector<1x64x2xf32>
    %19 = vector.shape_cast %18 : vector<1x64x2xf32> to vector<64x2xf32>
    %20 = vector.extract_strided_slice %1 {offsets = [0, 1], sizes = [2, 122], strides = [1, 1]} : vector<2x128xf32> to vector<2x122xf32>
    %21 = vector.extract_strided_slice %19 {offsets = [0, 0], sizes = [64, 1], strides = [1, 1]} : vector<64x2xf32> to vector<64x1xf32>
    %22 = vector.extract_strided_slice %20 {offsets = [0, 0], sizes = [1, 122], strides = [1, 1]} : vector<2x122xf32> to vector<1x122xf32>
    %23 = vector.broadcast %21 : vector<64x1xf32> to vector<64x122xf32>
    %24 = vector.broadcast %22 : vector<1x122xf32> to vector<64x122xf32>
    %25 = arith.mulf %23, %24 : vector<64x122xf32>
    %26 = arith.addf %17, %25 : vector<64x122xf32>
    %27 = vector.extract_strided_slice %19 {offsets = [0, 1], sizes = [64, 1], strides = [1, 1]} : vector<64x2xf32> to vector<64x1xf32>
    %28 = vector.extract_strided_slice %20 {offsets = [1, 0], sizes = [1, 122], strides = [1, 1]} : vector<2x122xf32> to vector<1x122xf32>
    %29 = vector.broadcast %27 : vector<64x1xf32> to vector<64x122xf32>
    %30 = vector.broadcast %28 : vector<1x122xf32> to vector<64x122xf32>
    %31 = arith.mulf %29, %30 : vector<64x122xf32>
    %32 = arith.addf %26, %31 : vector<64x122xf32>
    %c2 = arith.constant 2 : index
    %c0_7 = arith.constant 0 : index
    %c0_8 = arith.constant 0 : index
    %33 = vector.load %arg2[%c2, %c0_7, %c0_8] : memref<7x64x2xf32, #tpu.memory_space<vmem>>, vector<1x64x2xf32>
    %34 = vector.shape_cast %33 : vector<1x64x2xf32> to vector<64x2xf32>
    %35 = vector.extract_strided_slice %1 {offsets = [0, 2], sizes = [2, 122], strides = [1, 1]} : vector<2x128xf32> to vector<2x122xf32>
    %36 = vector.extract_strided_slice %34 {offsets = [0, 0], sizes = [64, 1], strides = [1, 1]} : vector<64x2xf32> to vector<64x1xf32>
    %37 = vector.extract_strided_slice %35 {offsets = [0, 0], sizes = [1, 122], strides = [1, 1]} : vector<2x122xf32> to vector<1x122xf32>
    %38 = vector.broadcast %36 : vector<64x1xf32> to vector<64x122xf32>
    %39 = vector.broadcast %37 : vector<1x122xf32> to vector<64x122xf32>
    %40 = arith.mulf %38, %39 : vector<64x122xf32>
    %41 = arith.addf %32, %40 : vector<64x122xf32>
    %42 = vector.extract_strided_slice %34 {offsets = [0, 1], sizes = [64, 1], strides = [1, 1]} : vector<64x2xf32> to vector<64x1xf32>
    %43 = vector.extract_strided_slice %35 {offsets = [1, 0], sizes = [1, 122], strides = [1, 1]} : vector<2x122xf32> to vector<1x122xf32>
    %44 = vector.broadcast %42 : vector<64x1xf32> to vector<64x122xf32>
    %45 = vector.broadcast %43 : vector<1x122xf32> to vector<64x122xf32>
    %46 = arith.mulf %44, %45 : vector<64x122xf32>
    %47 = arith.addf %41, %46 : vector<64x122xf32>
    %c3 = arith.constant 3 : index
    %c0_9 = arith.constant 0 : index
    %c0_10 = arith.constant 0 : index
    %48 = vector.load %arg2[%c3, %c0_9, %c0_10] : memref<7x64x2xf32, #tpu.memory_space<vmem>>, vector<1x64x2xf32>
    %49 = vector.shape_cast %48 : vector<1x64x2xf32> to vector<64x2xf32>
    %50 = vector.extract_strided_slice %1 {offsets = [0, 3], sizes = [2, 122], strides = [1, 1]} : vector<2x128xf32> to vector<2x122xf32>
    %51 = vector.extract_strided_slice %49 {offsets = [0, 0], sizes = [64, 1], strides = [1, 1]} : vector<64x2xf32> to vector<64x1xf32>
    %52 = vector.extract_strided_slice %50 {offsets = [0, 0], sizes = [1, 122], strides = [1, 1]} : vector<2x122xf32> to vector<1x122xf32>
    %53 = vector.broadcast %51 : vector<64x1xf32> to vector<64x122xf32>
    %54 = vector.broadcast %52 : vector<1x122xf32> to vector<64x122xf32>
    %55 = arith.mulf %53, %54 : vector<64x122xf32>
    %56 = arith.addf %47, %55 : vector<64x122xf32>
    %57 = vector.extract_strided_slice %49 {offsets = [0, 1], sizes = [64, 1], strides = [1, 1]} : vector<64x2xf32> to vector<64x1xf32>
    %58 = vector.extract_strided_slice %50 {offsets = [1, 0], sizes = [1, 122], strides = [1, 1]} : vector<2x122xf32> to vector<1x122xf32>
    %59 = vector.broadcast %57 : vector<64x1xf32> to vector<64x122xf32>
    %60 = vector.broadcast %58 : vector<1x122xf32> to vector<64x122xf32>
    %61 = arith.mulf %59, %60 : vector<64x122xf32>
    %62 = arith.addf %56, %61 : vector<64x122xf32>
    %c4 = arith.constant 4 : index
    %c0_11 = arith.constant 0 : index
    %c0_12 = arith.constant 0 : index
    %63 = vector.load %arg2[%c4, %c0_11, %c0_12] : memref<7x64x2xf32, #tpu.memory_space<vmem>>, vector<1x64x2xf32>
    %64 = vector.shape_cast %63 : vector<1x64x2xf32> to vector<64x2xf32>
    %65 = vector.extract_strided_slice %1 {offsets = [0, 4], sizes = [2, 122], strides = [1, 1]} : vector<2x128xf32> to vector<2x122xf32>
    %66 = vector.extract_strided_slice %64 {offsets = [0, 0], sizes = [64, 1], strides = [1, 1]} : vector<64x2xf32> to vector<64x1xf32>
    %67 = vector.extract_strided_slice %65 {offsets = [0, 0], sizes = [1, 122], strides = [1, 1]} : vector<2x122xf32> to vector<1x122xf32>
    %68 = vector.broadcast %66 : vector<64x1xf32> to vector<64x122xf32>
    %69 = vector.broadcast %67 : vector<1x122xf32> to vector<64x122xf32>
    %70 = arith.mulf %68, %69 : vector<64x122xf32>
    %71 = arith.addf %62, %70 : vector<64x122xf32>
    %72 = vector.extract_strided_slice %64 {offsets = [0, 1], sizes = [64, 1], strides = [1, 1]} : vector<64x2xf32> to vector<64x1xf32>
    %73 = vector.extract_strided_slice %65 {offsets = [1, 0], sizes = [1, 122], strides = [1, 1]} : vector<2x122xf32> to vector<1x122xf32>
    %74 = vector.broadcast %72 : vector<64x1xf32> to vector<64x122xf32>
    %75 = vector.broadcast %73 : vector<1x122xf32> to vector<64x122xf32>
    %76 = arith.mulf %74, %75 : vector<64x122xf32>
    %77 = arith.addf %71, %76 : vector<64x122xf32>
    %c5 = arith.constant 5 : index
    %c0_13 = arith.constant 0 : index
    %c0_14 = arith.constant 0 : index
    %78 = vector.load %arg2[%c5, %c0_13, %c0_14] : memref<7x64x2xf32, #tpu.memory_space<vmem>>, vector<1x64x2xf32>
    %79 = vector.shape_cast %78 : vector<1x64x2xf32> to vector<64x2xf32>
    %80 = vector.extract_strided_slice %1 {offsets = [0, 5], sizes = [2, 122], strides = [1, 1]} : vector<2x128xf32> to vector<2x122xf32>
    %81 = vector.extract_strided_slice %79 {offsets = [0, 0], sizes = [64, 1], strides = [1, 1]} : vector<64x2xf32> to vector<64x1xf32>
    %82 = vector.extract_strided_slice %80 {offsets = [0, 0], sizes = [1, 122], strides = [1, 1]} : vector<2x122xf32> to vector<1x122xf32>
    %83 = vector.broadcast %81 : vector<64x1xf32> to vector<64x122xf32>
    %84 = vector.broadcast %82 : vector<1x122xf32> to vector<64x122xf32>
    %85 = arith.mulf %83, %84 : vector<64x122xf32>
    %86 = arith.addf %77, %85 : vector<64x122xf32>
    %87 = vector.extract_strided_slice %79 {offsets = [0, 1], sizes = [64, 1], strides = [1, 1]} : vector<64x2xf32> to vector<64x1xf32>
    %88 = vector.extract_strided_slice %80 {offsets = [1, 0], sizes = [1, 122], strides = [1, 1]} : vector<2x122xf32> to vector<1x122xf32>
    %89 = vector.broadcast %87 : vector<64x1xf32> to vector<64x122xf32>
    %90 = vector.broadcast %88 : vector<1x122xf32> to vector<64x122xf32>
    %91 = arith.mulf %89, %90 : vector<64x122xf32>
    %92 = arith.addf %86, %91 : vector<64x122xf32>
    %c6 = arith.constant 6 : index
    %c0_15 = arith.constant 0 : index
    %c0_16 = arith.constant 0 : index
    %93 = vector.load %arg2[%c6, %c0_15, %c0_16] : memref<7x64x2xf32, #tpu.memory_space<vmem>>, vector<1x64x2xf32>
    %94 = vector.shape_cast %93 : vector<1x64x2xf32> to vector<64x2xf32>
    %95 = vector.extract_strided_slice %1 {offsets = [0, 6], sizes = [2, 122], strides = [1, 1]} : vector<2x128xf32> to vector<2x122xf32>
    %96 = vector.extract_strided_slice %94 {offsets = [0, 0], sizes = [64, 1], strides = [1, 1]} : vector<64x2xf32> to vector<64x1xf32>
    %97 = vector.extract_strided_slice %95 {offsets = [0, 0], sizes = [1, 122], strides = [1, 1]} : vector<2x122xf32> to vector<1x122xf32>
    %98 = vector.broadcast %96 : vector<64x1xf32> to vector<64x122xf32>
    %99 = vector.broadcast %97 : vector<1x122xf32> to vector<64x122xf32>
    %100 = arith.mulf %98, %99 : vector<64x122xf32>
    %101 = arith.addf %92, %100 : vector<64x122xf32>
    %102 = vector.extract_strided_slice %94 {offsets = [0, 1], sizes = [64, 1], strides = [1, 1]} : vector<64x2xf32> to vector<64x1xf32>
    %103 = vector.extract_strided_slice %95 {offsets = [1, 0], sizes = [1, 122], strides = [1, 1]} : vector<2x122xf32> to vector<1x122xf32>
    %104 = vector.broadcast %102 : vector<64x1xf32> to vector<64x122xf32>
    %105 = vector.broadcast %103 : vector<1x122xf32> to vector<64x122xf32>
    %106 = arith.mulf %104, %105 : vector<64x122xf32>
    %107 = arith.addf %101, %106 : vector<64x122xf32>
    %c0_17 = arith.constant 0 : index
    %c0_18 = arith.constant 0 : index
    %108 = vector.load %arg3[%c0_17, %c0_18] : memref<64x1xf32, #tpu.memory_space<vmem>>, vector<64x1xf32>
    %109 = vector.broadcast %108 : vector<64x1xf32> to vector<64x122xf32>
    %110 = arith.addf %107, %109 : vector<64x122xf32>
    %c0_19 = arith.constant 0 : index
    %c0_20 = arith.constant 0 : index
    %111 = vector.load %arg6[%c0_19, %c0_20] : memref<122x41xf32, #tpu.memory_space<vmem>>, vector<122x41xf32>
    %cst_21 = arith.constant dense<0.000000e+00> : vector<64x41xf32>
    %112 = tpu.matmul %110, %111, %cst_21 {dimension_numbers = #tpu.dot_dimension_numbers<[1], [0], [0], [1], [0, 0, 1, 1], [], []>} : vector<64x122xf32>, vector<122x41xf32>, vector<64x41xf32> -> vector<64x41xf32>
    %c0_22 = arith.constant 0 : index
    %c0_23 = arith.constant 0 : index
    %c0_24 = arith.constant 0 : index
    %113 = vector.load %arg4[%c0_22, %c0_23, %c0_24] : memref<3x64x64xf32, #tpu.memory_space<vmem>>, vector<1x64x64xf32>
    %114 = vector.shape_cast %113 : vector<1x64x64xf32> to vector<64x64xf32>
    %c1_25 = arith.constant 1 : index
    %c0_26 = arith.constant 0 : index
    %c0_27 = arith.constant 0 : index
    %115 = vector.load %arg4[%c1_25, %c0_26, %c0_27] : memref<3x64x64xf32, #tpu.memory_space<vmem>>, vector<1x64x64xf32>
    %116 = vector.shape_cast %115 : vector<1x64x64xf32> to vector<64x64xf32>
    %c2_28 = arith.constant 2 : index
    %c0_29 = arith.constant 0 : index
    %c0_30 = arith.constant 0 : index
    %117 = vector.load %arg4[%c2_28, %c0_29, %c0_30] : memref<3x64x64xf32, #tpu.memory_space<vmem>>, vector<1x64x64xf32>
    %118 = vector.shape_cast %117 : vector<1x64x64xf32> to vector<64x64xf32>
    %c0_31 = arith.constant 0 : index
    %c0_32 = arith.constant 0 : index
    %119 = vector.load %arg5[%c0_31, %c0_32] : memref<64x1xf32, #tpu.memory_space<vmem>>, vector<64x1xf32>
    %cst_33 = arith.constant 0.000000e+00 : f32
    %120 = vector.broadcast %cst_33 : f32 to vector<64x1xf32>
    %cst_34 = arith.constant dense<0.000000e+00> : vector<64x41xf32>
    %121 = tpu.matmul %114, %112, %cst_34 {dimension_numbers = #tpu.dot_dimension_numbers<[1], [0], [0], [1], [0, 0, 1, 1], [], []>} : vector<64x64xf32>, vector<64x41xf32>, vector<64x41xf32> -> vector<64x41xf32>
    %cst_35 = arith.constant dense<0.000000e+00> : vector<64x41xf32>
    %122 = tpu.matmul %116, %112, %cst_35 {dimension_numbers = #tpu.dot_dimension_numbers<[1], [0], [0], [1], [0, 0, 1, 1], [], []>} : vector<64x64xf32>, vector<64x41xf32>, vector<64x41xf32> -> vector<64x41xf32>
    %cst_36 = arith.constant dense<0.000000e+00> : vector<64x41xf32>
    %123 = tpu.matmul %118, %112, %cst_36 {dimension_numbers = #tpu.dot_dimension_numbers<[1], [0], [0], [1], [0, 0, 1, 1], [], []>} : vector<64x64xf32>, vector<64x41xf32>, vector<64x41xf32> -> vector<64x41xf32>
    %124 = vector.extract_strided_slice %121 {offsets = [0, 0], sizes = [64, 40], strides = [1, 1]} : vector<64x41xf32> to vector<64x40xf32>
    %125 = tpu.concatenate %120, %124 in 1 : vector<64x1xf32>, vector<64x40xf32> -> vector<64x41xf32>
    %126 = vector.extract_strided_slice %123 {offsets = [0, 1], sizes = [64, 40], strides = [1, 1]} : vector<64x41xf32> to vector<64x40xf32>
    %127 = tpu.concatenate %126, %120 in 1 : vector<64x40xf32>, vector<64x1xf32> -> vector<64x41xf32>
    %128 = arith.addf %125, %122 : vector<64x41xf32>
    %129 = arith.addf %128, %127 : vector<64x41xf32>
    %130 = vector.broadcast %119 : vector<64x1xf32> to vector<64x41xf32>
    %131 = arith.addf %129, %130 : vector<64x41xf32>
    %cst_37 = arith.constant 0.000000e+00 : f32
    %132 = vector.broadcast %cst_37 : f32 to vector<64x41xf32>
    %133 = arith.maximumf %131, %132 : vector<64x41xf32>
    %cst_38 = arith.constant dense<0.000000e+00> : vector<64x41xf32>
    %134 = tpu.matmul %114, %133, %cst_38 {dimension_numbers = #tpu.dot_dimension_numbers<[1], [0], [0], [1], [0, 0, 1, 1], [], []>} : vector<64x64xf32>, vector<64x41xf32>, vector<64x41xf32> -> vector<64x41xf32>
    %cst_39 = arith.constant dense<0.000000e+00> : vector<64x41xf32>
    %135 = tpu.matmul %116, %133, %cst_39 {dimension_numbers = #tpu.dot_dimension_numbers<[1], [0], [0], [1], [0, 0, 1, 1], [], []>} : vector<64x64xf32>, vector<64x41xf32>, vector<64x41xf32> -> vector<64x41xf32>
    %cst_40 = arith.constant dense<0.000000e+00> : vector<64x41xf32>
    %136 = tpu.matmul %118, %133, %cst_40 {dimension_numbers = #tpu.dot_dimension_numbers<[1], [0], [0], [1], [0, 0, 1, 1], [], []>} : vector<64x64xf32>, vector<64x41xf32>, vector<64x41xf32> -> vector<64x41xf32>
    %137 = vector.extract_strided_slice %134 {offsets = [0, 0], sizes = [64, 40], strides = [1, 1]} : vector<64x41xf32> to vector<64x40xf32>
    %138 = tpu.concatenate %120, %137 in 1 : vector<64x1xf32>, vector<64x40xf32> -> vector<64x41xf32>
    %139 = vector.extract_strided_slice %136 {offsets = [0, 1], sizes = [64, 40], strides = [1, 1]} : vector<64x41xf32> to vector<64x40xf32>
    %140 = tpu.concatenate %139, %120 in 1 : vector<64x40xf32>, vector<64x1xf32> -> vector<64x41xf32>
    %141 = arith.addf %138, %135 : vector<64x41xf32>
    %142 = arith.addf %141, %140 : vector<64x41xf32>
    %143 = vector.broadcast %119 : vector<64x1xf32> to vector<64x41xf32>
    %144 = arith.addf %142, %143 : vector<64x41xf32>
    %145 = arith.addf %144, %112 : vector<64x41xf32>
    %cst_41 = arith.constant 0.000000e+00 : f32
    %146 = vector.broadcast %cst_41 : f32 to vector<64x41xf32>
    %147 = arith.maximumf %145, %146 : vector<64x41xf32>
    %cst_42 = arith.constant dense<0.000000e+00> : vector<64x41xf32>
    %148 = tpu.matmul %114, %147, %cst_42 {dimension_numbers = #tpu.dot_dimension_numbers<[1], [0], [0], [1], [0, 0, 1, 1], [], []>} : vector<64x64xf32>, vector<64x41xf32>, vector<64x41xf32> -> vector<64x41xf32>
    %cst_43 = arith.constant dense<0.000000e+00> : vector<64x41xf32>
    %149 = tpu.matmul %116, %147, %cst_43 {dimension_numbers = #tpu.dot_dimension_numbers<[1], [0], [0], [1], [0, 0, 1, 1], [], []>} : vector<64x64xf32>, vector<64x41xf32>, vector<64x41xf32> -> vector<64x41xf32>
    %cst_44 = arith.constant dense<0.000000e+00> : vector<64x41xf32>
    %150 = tpu.matmul %118, %147, %cst_44 {dimension_numbers = #tpu.dot_dimension_numbers<[1], [0], [0], [1], [0, 0, 1, 1], [], []>} : vector<64x64xf32>, vector<64x41xf32>, vector<64x41xf32> -> vector<64x41xf32>
    %151 = vector.extract_strided_slice %148 {offsets = [0, 0], sizes = [64, 40], strides = [1, 1]} : vector<64x41xf32> to vector<64x40xf32>
    %152 = tpu.concatenate %120, %151 in 1 : vector<64x1xf32>, vector<64x40xf32> -> vector<64x41xf32>
    %153 = vector.extract_strided_slice %150 {offsets = [0, 1], sizes = [64, 40], strides = [1, 1]} : vector<64x41xf32> to vector<64x40xf32>
    %154 = tpu.concatenate %153, %120 in 1 : vector<64x40xf32>, vector<64x1xf32> -> vector<64x41xf32>
    %155 = arith.addf %152, %149 : vector<64x41xf32>
    %156 = arith.addf %155, %154 : vector<64x41xf32>
    %157 = vector.broadcast %119 : vector<64x1xf32> to vector<64x41xf32>
    %158 = arith.addf %156, %157 : vector<64x41xf32>
    %cst_45 = arith.constant 0.000000e+00 : f32
    %159 = vector.broadcast %cst_45 : f32 to vector<64x41xf32>
    %160 = arith.maximumf %158, %159 : vector<64x41xf32>
    %cst_46 = arith.constant dense<0.000000e+00> : vector<64x41xf32>
    %161 = tpu.matmul %114, %160, %cst_46 {dimension_numbers = #tpu.dot_dimension_numbers<[1], [0], [0], [1], [0, 0, 1, 1], [], []>} : vector<64x64xf32>, vector<64x41xf32>, vector<64x41xf32> -> vector<64x41xf32>
    %cst_47 = arith.constant dense<0.000000e+00> : vector<64x41xf32>
    %162 = tpu.matmul %116, %160, %cst_47 {dimension_numbers = #tpu.dot_dimension_numbers<[1], [0], [0], [1], [0, 0, 1, 1], [], []>} : vector<64x64xf32>, vector<64x41xf32>, vector<64x41xf32> -> vector<64x41xf32>
    %cst_48 = arith.constant dense<0.000000e+00> : vector<64x41xf32>
    %163 = tpu.matmul %118, %160, %cst_48 {dimension_numbers = #tpu.dot_dimension_numbers<[1], [0], [0], [1], [0, 0, 1, 1], [], []>} : vector<64x64xf32>, vector<64x41xf32>, vector<64x41xf32> -> vector<64x41xf32>
    %164 = vector.extract_strided_slice %161 {offsets = [0, 0], sizes = [64, 40], strides = [1, 1]} : vector<64x41xf32> to vector<64x40xf32>
    %165 = tpu.concatenate %120, %164 in 1 : vector<64x1xf32>, vector<64x40xf32> -> vector<64x41xf32>
    %166 = vector.extract_strided_slice %163 {offsets = [0, 1], sizes = [64, 40], strides = [1, 1]} : vector<64x41xf32> to vector<64x40xf32>
    %167 = tpu.concatenate %166, %120 in 1 : vector<64x40xf32>, vector<64x1xf32> -> vector<64x41xf32>
    %168 = arith.addf %165, %162 : vector<64x41xf32>
    %169 = arith.addf %168, %167 : vector<64x41xf32>
    %170 = vector.broadcast %119 : vector<64x1xf32> to vector<64x41xf32>
    %171 = arith.addf %169, %170 : vector<64x41xf32>
    %172 = arith.addf %171, %147 : vector<64x41xf32>
    %cst_49 = arith.constant 0.000000e+00 : f32
    %173 = vector.broadcast %cst_49 : f32 to vector<64x41xf32>
    %174 = arith.maximumf %172, %173 : vector<64x41xf32>
    %cst_50 = arith.constant dense<0.000000e+00> : vector<64x41xf32>
    %175 = tpu.matmul %114, %174, %cst_50 {dimension_numbers = #tpu.dot_dimension_numbers<[1], [0], [0], [1], [0, 0, 1, 1], [], []>} : vector<64x64xf32>, vector<64x41xf32>, vector<64x41xf32> -> vector<64x41xf32>
    %cst_51 = arith.constant dense<0.000000e+00> : vector<64x41xf32>
    %176 = tpu.matmul %116, %174, %cst_51 {dimension_numbers = #tpu.dot_dimension_numbers<[1], [0], [0], [1], [0, 0, 1, 1], [], []>} : vector<64x64xf32>, vector<64x41xf32>, vector<64x41xf32> -> vector<64x41xf32>
    %cst_52 = arith.constant dense<0.000000e+00> : vector<64x41xf32>
    %177 = tpu.matmul %118, %174, %cst_52 {dimension_numbers = #tpu.dot_dimension_numbers<[1], [0], [0], [1], [0, 0, 1, 1], [], []>} : vector<64x64xf32>, vector<64x41xf32>, vector<64x41xf32> -> vector<64x41xf32>
    %178 = vector.extract_strided_slice %175 {offsets = [0, 0], sizes = [64, 40], strides = [1, 1]} : vector<64x41xf32> to vector<64x40xf32>
    %179 = tpu.concatenate %120, %178 in 1 : vector<64x1xf32>, vector<64x40xf32> -> vector<64x41xf32>
    %180 = vector.extract_strided_slice %177 {offsets = [0, 1], sizes = [64, 40], strides = [1, 1]} : vector<64x41xf32> to vector<64x40xf32>
    %181 = tpu.concatenate %180, %120 in 1 : vector<64x40xf32>, vector<64x1xf32> -> vector<64x41xf32>
    %182 = arith.addf %179, %176 : vector<64x41xf32>
    %183 = arith.addf %182, %181 : vector<64x41xf32>
    %184 = vector.broadcast %119 : vector<64x1xf32> to vector<64x41xf32>
    %185 = arith.addf %183, %184 : vector<64x41xf32>
    %cst_53 = arith.constant 0.000000e+00 : f32
    %186 = vector.broadcast %cst_53 : f32 to vector<64x41xf32>
    %187 = arith.maximumf %185, %186 : vector<64x41xf32>
    %cst_54 = arith.constant dense<0.000000e+00> : vector<64x41xf32>
    %188 = tpu.matmul %114, %187, %cst_54 {dimension_numbers = #tpu.dot_dimension_numbers<[1], [0], [0], [1], [0, 0, 1, 1], [], []>} : vector<64x64xf32>, vector<64x41xf32>, vector<64x41xf32> -> vector<64x41xf32>
    %cst_55 = arith.constant dense<0.000000e+00> : vector<64x41xf32>
    %189 = tpu.matmul %116, %187, %cst_55 {dimension_numbers = #tpu.dot_dimension_numbers<[1], [0], [0], [1], [0, 0, 1, 1], [], []>} : vector<64x64xf32>, vector<64x41xf32>, vector<64x41xf32> -> vector<64x41xf32>
    %cst_56 = arith.constant dense<0.000000e+00> : vector<64x41xf32>
    %190 = tpu.matmul %118, %187, %cst_56 {dimension_numbers = #tpu.dot_dimension_numbers<[1], [0], [0], [1], [0, 0, 1, 1], [], []>} : vector<64x64xf32>, vector<64x41xf32>, vector<64x41xf32> -> vector<64x41xf32>
    %191 = vector.extract_strided_slice %188 {offsets = [0, 0], sizes = [64, 40], strides = [1, 1]} : vector<64x41xf32> to vector<64x40xf32>
    %192 = tpu.concatenate %120, %191 in 1 : vector<64x1xf32>, vector<64x40xf32> -> vector<64x41xf32>
    %193 = vector.extract_strided_slice %190 {offsets = [0, 1], sizes = [64, 40], strides = [1, 1]} : vector<64x41xf32> to vector<64x40xf32>
    %194 = tpu.concatenate %193, %120 in 1 : vector<64x40xf32>, vector<64x1xf32> -> vector<64x41xf32>
    %195 = arith.addf %192, %189 : vector<64x41xf32>
    %196 = arith.addf %195, %194 : vector<64x41xf32>
    %197 = vector.broadcast %119 : vector<64x1xf32> to vector<64x41xf32>
    %198 = arith.addf %196, %197 : vector<64x41xf32>
    %199 = arith.addf %198, %174 : vector<64x41xf32>
    %cst_57 = arith.constant 0.000000e+00 : f32
    %200 = vector.broadcast %cst_57 : f32 to vector<64x41xf32>
    %201 = arith.maximumf %199, %200 : vector<64x41xf32>
    %cst_58 = arith.constant dense<0.000000e+00> : vector<64x41xf32>
    %202 = tpu.matmul %114, %201, %cst_58 {dimension_numbers = #tpu.dot_dimension_numbers<[1], [0], [0], [1], [0, 0, 1, 1], [], []>} : vector<64x64xf32>, vector<64x41xf32>, vector<64x41xf32> -> vector<64x41xf32>
    %cst_59 = arith.constant dense<0.000000e+00> : vector<64x41xf32>
    %203 = tpu.matmul %116, %201, %cst_59 {dimension_numbers = #tpu.dot_dimension_numbers<[1], [0], [0], [1], [0, 0, 1, 1], [], []>} : vector<64x64xf32>, vector<64x41xf32>, vector<64x41xf32> -> vector<64x41xf32>
    %cst_60 = arith.constant dense<0.000000e+00> : vector<64x41xf32>
    %204 = tpu.matmul %118, %201, %cst_60 {dimension_numbers = #tpu.dot_dimension_numbers<[1], [0], [0], [1], [0, 0, 1, 1], [], []>} : vector<64x64xf32>, vector<64x41xf32>, vector<64x41xf32> -> vector<64x41xf32>
    %205 = vector.extract_strided_slice %202 {offsets = [0, 0], sizes = [64, 40], strides = [1, 1]} : vector<64x41xf32> to vector<64x40xf32>
    %206 = tpu.concatenate %120, %205 in 1 : vector<64x1xf32>, vector<64x40xf32> -> vector<64x41xf32>
    %207 = vector.extract_strided_slice %204 {offsets = [0, 1], sizes = [64, 40], strides = [1, 1]} : vector<64x41xf32> to vector<64x40xf32>
    %208 = tpu.concatenate %207, %120 in 1 : vector<64x40xf32>, vector<64x1xf32> -> vector<64x41xf32>
    %209 = arith.addf %206, %203 : vector<64x41xf32>
    %210 = arith.addf %209, %208 : vector<64x41xf32>
    %211 = vector.broadcast %119 : vector<64x1xf32> to vector<64x41xf32>
    %212 = arith.addf %210, %211 : vector<64x41xf32>
    %cst_61 = arith.constant 0.000000e+00 : f32
    %213 = vector.broadcast %cst_61 : f32 to vector<64x41xf32>
    %214 = arith.maximumf %212, %213 : vector<64x41xf32>
    %cst_62 = arith.constant dense<0.000000e+00> : vector<64x41xf32>
    %215 = tpu.matmul %114, %214, %cst_62 {dimension_numbers = #tpu.dot_dimension_numbers<[1], [0], [0], [1], [0, 0, 1, 1], [], []>} : vector<64x64xf32>, vector<64x41xf32>, vector<64x41xf32> -> vector<64x41xf32>
    %cst_63 = arith.constant dense<0.000000e+00> : vector<64x41xf32>
    %216 = tpu.matmul %116, %214, %cst_63 {dimension_numbers = #tpu.dot_dimension_numbers<[1], [0], [0], [1], [0, 0, 1, 1], [], []>} : vector<64x64xf32>, vector<64x41xf32>, vector<64x41xf32> -> vector<64x41xf32>
    %cst_64 = arith.constant dense<0.000000e+00> : vector<64x41xf32>
    %217 = tpu.matmul %118, %214, %cst_64 {dimension_numbers = #tpu.dot_dimension_numbers<[1], [0], [0], [1], [0, 0, 1, 1], [], []>} : vector<64x64xf32>, vector<64x41xf32>, vector<64x41xf32> -> vector<64x41xf32>
    %218 = vector.extract_strided_slice %215 {offsets = [0, 0], sizes = [64, 40], strides = [1, 1]} : vector<64x41xf32> to vector<64x40xf32>
    %219 = tpu.concatenate %120, %218 in 1 : vector<64x1xf32>, vector<64x40xf32> -> vector<64x41xf32>
    %220 = vector.extract_strided_slice %217 {offsets = [0, 1], sizes = [64, 40], strides = [1, 1]} : vector<64x41xf32> to vector<64x40xf32>
    %221 = tpu.concatenate %220, %120 in 1 : vector<64x40xf32>, vector<64x1xf32> -> vector<64x41xf32>
    %222 = arith.addf %219, %216 : vector<64x41xf32>
    %223 = arith.addf %222, %221 : vector<64x41xf32>
    %224 = vector.broadcast %119 : vector<64x1xf32> to vector<64x41xf32>
    %225 = arith.addf %223, %224 : vector<64x41xf32>
    %226 = arith.mulf %225, %201 : vector<64x41xf32>
    %c0_65 = arith.constant 0 : index
    %c0_66 = arith.constant 0 : index
    %227 = vector.load %arg7[%c0_65, %c0_66] : memref<41x6xf32, #tpu.memory_space<vmem>>, vector<41x6xf32>
    %cst_67 = arith.constant dense<0.000000e+00> : vector<64x6xf32>
    %228 = tpu.matmul %226, %227, %cst_67 {dimension_numbers = #tpu.dot_dimension_numbers<[1], [0], [0], [1], [0, 0, 1, 1], [], []>} : vector<64x41xf32>, vector<41x6xf32>, vector<64x6xf32> -> vector<64x6xf32>
    %c0_68 = arith.constant 0 : index
    %c0_69 = arith.constant 0 : index
    %c0_70 = arith.constant 0 : index
    %229 = vector.load %arg8[%c0_68, %c0_69, %c0_70] : memref<1x64x6xf32, #tpu.memory_space<vmem>>, vector<1x64x6xf32>
    %230 = vector.shape_cast %229 : vector<1x64x6xf32> to vector<64x6xf32>
    %231 = vector.shape_cast %228 : vector<64x6xf32> to vector<1x64x6xf32>
    tpu.vector_store %arg8[%c0_68, %c0_69, %c0_70], %231 {strides = array<i32>} : memref<1x64x6xf32, #tpu.memory_space<vmem>>, vector<1x64x6xf32>,
    return
  }
  func.func @transform_0(%arg0: i32) -> (i32, i32, i32) {
    %c0_i32 = arith.constant 0 : i32
    %c0_i32_0 = arith.constant 0 : i32
    %c0_i32_1 = arith.constant 0 : i32
    return %arg0, %c0_i32, %c0_i32_0 : i32, i32, i32
  }
  func.func @transform_1(%arg0: i32) -> (i32, i32, i32) {
    %c0_i32 = arith.constant 0 : i32
    %c0_i32_0 = arith.constant 0 : i32
    %c0_i32_1 = arith.constant 0 : i32
    %c0_i32_2 = arith.constant 0 : i32
    return %c0_i32, %c0_i32_0, %c0_i32_1 : i32, i32, i32
  }
  func.func @transform_2(%arg0: i32) -> (i32, i32) {
    %c0_i32 = arith.constant 0 : i32
    %c0_i32_0 = arith.constant 0 : i32
    %c0_i32_1 = arith.constant 0 : i32
    return %c0_i32, %c0_i32_0 : i32, i32
  }
  func.func @transform_3(%arg0: i32) -> (i32, i32, i32) {
    %c0_i32 = arith.constant 0 : i32
    %c0_i32_0 = arith.constant 0 : i32
    %c0_i32_1 = arith.constant 0 : i32
    %c0_i32_2 = arith.constant 0 : i32
    return %c0_i32, %c0_i32_0, %c0_i32_1 : i32, i32, i32
  }
  func.func @transform_4(%arg0: i32) -> (i32, i32) {
    %c0_i32 = arith.constant 0 : i32
    %c0_i32_0 = arith.constant 0 : i32
    %c0_i32_1 = arith.constant 0 : i32
    return %c0_i32, %c0_i32_0 : i32, i32
  }
  func.func @transform_5(%arg0: i32) -> (i32, i32) {
    %c0_i32 = arith.constant 0 : i32
    %c0_i32_0 = arith.constant 0 : i32
    %c0_i32_1 = arith.constant 0 : i32
    return %c0_i32, %c0_i32_0 : i32, i32
  }
  func.func @transform_6(%arg0: i32) -> (i32, i32) {
    %c0_i32 = arith.constant 0 : i32
    %c0_i32_0 = arith.constant 0 : i32
    %c0_i32_1 = arith.constant 0 : i32
    return %c0_i32, %c0_i32_0 : i32, i32
  }
  func.func @transform_7(%arg0: i32) -> (i32, i32, i32) {
    %c0_i32 = arith.constant 0 : i32
    %c0_i32_0 = arith.constant 0 : i32
    %c0_i32_1 = arith.constant 0 : i32
    return %arg0, %c0_i32, %c0_i32_0 : i32, i32, i32
  }
}

</mosaic_0001>

<bundles_post_ra>
// kernel: tpu_custom_call.1
= control target key start
LH: loop header
LB: loop body
LE: loop exit
PB: predicated region body
PF: predicated region fallthrough
CT: control target
= control target key end

     0   :  { %s7471_s24 = smov 0   ;;  %s9900_s0 = inlined_call_operand.vmem [shape: f32[2,2,128], index: 0, kind: input, shape index: {}]   ;;  %s9901_s1 = inlined_call_operand.vmem [shape: f32[7,64,2], index: 1, kind: input, shape index: {}]   ;;  %s9902_s2 = inlined_call_operand.vmem [shape: f32[64,1], index: 2, kind: input, shape index: {}]   ;;  %s9903_s3 = inlined_call_operand.vmem [shape: f32[3,64,64], index: 3, kind: input, shape index: {}]   ;;  %s9904_s4 = inlined_call_operand.vmem [shape: f32[64,1], index: 4, kind: input, shape index: {}]   ;;  %s9905_s5 = inlined_call_operand.vmem [shape: f32[122,41], index: 5, kind: input, shape index: {}]   ;;  %s9906_s6 = inlined_call_operand.vmem [shape: f32[41,6], index: 6, kind: input, shape index: {}]   ;;  %s9907_s7 = inlined_call_operand.vmem [shape: f32[2,64,6], index: 7, kind: output, shape index: {}]  }
   0x1 LB: > { %s5458_s25 = sadd.s32 4294967295, %s7419_s24   ;;  %p5462_p0 = scmp.ge.s32.totalorder %s7419_s24, 1  ;;  %s7419_s24 = sphi %s7471_s24, %s17_s24  }
   0x2   : > { %p236_p1 = scmp.lt.s32.totalorder %s7419_s24, 3 }
   0x4   : > { %p237_p2 = pnand %p5462_p0, %p236_p1 }
   0x6   : > { %240 = sbr.rel (%p237_p2) target bundleno = 4016 (0xfb0), region = 48 }
   0xd   : > { %v5466_v0 = vld [vmem:[%s9901_s1 + $0x40] sm:$0xff]  ;;  %p267_p3 = scmp.lt.s32.totalorder %s5458_s25, 1  ;;  %v7421_v1 = vmov 1   ;;  %v7422_v2 = vmov 0   ;;  %v325_v3 = vlaneseq  ;;  %v5467_v4 = vld [vmem:[%s9901_s1 + $0x48] sm:$0xff]  ;;  %v7498_v7 = vld [vmem:[%s9901_s1 + $0x50] sm:$0xff] }
   0xe   : > { %7362 = vset.pattern.permute.xlu1 %v7421_v1  ;;  %7361 = vset.pattern.permute.xlu0 %v7422_v2  ;;  %v5474_v6 = vld [vmem:[%s9901_s1 + $0x80] sm:$0xff]  ;;  %v5475_v9 = vld [vmem:[%s9901_s1 + $0x88] sm:$0xff]  ;;  %v7525_v14 = vld [vmem:[%s9901_s1 + $0x58] sm:$0xff]  ;;  %s7423_s20 = smov 127   ;;  %s7424_s16 = smov 126   ;;  %vm1556_vm0 = vcmask 1041408  }
   0xf   : > { %495 = vperm.xlu1 %7362, %v5466_v0   ;;  %408 = vperm.xlu0 %7361, %v5466_v0   ;;  %s10045_s25 = smov (!%p267_p3, %s5458_s25), 1  ;;  %v7489_v5 = vshrl.u32 %v325_v3, 7  ;;  %v5470_v12 = vld [vmem:[%s9901_s1 + $0x60] sm:$0xff]  ;;  %v5471_v13 = vld [vmem:[%s9901_s1 + $0x68] sm:$0xff]  ;;  %v5472_v16 = vld [vmem:[%s9901_s1 + $0x70] sm:$0xff]  ;;  %s7425_s17 = smov 125  }
  0x10   : > { %s5463_s30 = sshll.u32 %s10045_s25, 1  ;;  %v5483_v15 = vld [vmem:[%s9901_s1 + $0xc8] sm:$0xff]  ;;  %v5482_v17 = vld [vmem:[%s9901_s1 + $0xc0] sm:$0xff]  ;;  %v7550_v21 = vld [vmem:[%s9901_s1 + $0x90] sm:$0xff]  ;;  %s7426_s18 = smov 124   ;;  %vm7429_vm1 = vmmov 1  }
  0x11   : > { %s270_s14 = scalar_lea.vmem %s9900_s0, %s5463_s30  ;;  %v379_v8 = vsub.s32 1, %v7489_v5  ;;  %v5490_v18 = vld [vmem:[%s9901_s1 + $0x100] sm:$0xff]  ;;  %v5479_v19 = vld [vmem:[%s9901_s1 + $0xa8] sm:$0xff]  ;;  %v5480_v22 = vld [vmem:[%s9901_s1 + $0xb0] sm:$0xff]  ;;  %v327_v43 = vsub.s32 0, %v7489_v5  ;;  %s7427_s19 = smov 123  }
  0x12   : > { %v7510_v10 = vld [vmem:[%s270_s14] sm:$0x3]  ;;  %v5491_v20 = vld [vmem:[%s9901_s1 + $0x108] sm:$0xff]  ;;  %v7563_v24 = vld [vmem:[%s9901_s1 + $0x98] sm:$0xff]  ;;  %s7428_s29 = smov 122   ;;  %vm1531_vm3 = vcmask 998400  }
  0x13   : > { %499 = vperm.xlu1 %7362, %v5467_v4   ;;  %413 = vperm.xlu0 %7361, %v5467_v4   ;;  %v7513_v11 = vrot.slane %v7510_v10, %v379_v8  ;;  %v5498_v23 = vld [vmem:[%s9901_s1 + $0x140] sm:$0xff]  ;;  %v5487_v25 = vld [vmem:[%s9901_s1 + $0xe8] sm:$0xff]  ;;  %v5484_v27 = vld [vmem:[%s9901_s1 + $0xd0] sm:$0xff]  ;;  %v7665_v45 = vrot.slane %v7510_v10, %v327_v43  ;;  %vm1699_vm4 = vcmask 523264   ;;  %s7430_s22 = smov 1   ;;  %vm2119_vm5 = vcmask 7168  }
  0x14   : > { %v5499_v26 = vld [vmem:[%s9901_s1 + $0x148] sm:$0xff]  ;;  %v5488_v28 = vld [vmem:[%s9901_s1 + $0xf0] sm:$0xff]  ;;  %v7582_v29 = vld [vmem:[%s9901_s1 + $0x180] sm:$0xff]  ;;  %vm2160_vm6 = vcmask 326656   ;;  %vm5285_vm7 = vcmask 1040384   ;;  %vm5260_vm9 = vcmask 334848  }
  0x15   : > { %v7588_v30 = vld [vmem:[%s9901_s1 + $0x128] sm:$0xff]  ;;  %v7600_v32 = vld [vmem:[%s9901_s1 + $0x130] sm:$0xff]  ;;  %v7605_v33 = vld [vmem:[%s9901_s1 + $0xa0] sm:$0xff]  ;;  %vm5394_vm10 = vcmask 48128  }
  0x16   : > { %v7594_v31 = vld [vmem:[%s9901_s1 + $0x188] sm:$0xff]  ;;  %v7613_v34 = vld [vmem:[%s9901_s1 + $0x138] sm:$0xff]  ;;  %v7631_v37 = vld [vmem:[%s9901_s1 + $0x170] sm:$0xff] }
  0x17   : > { %7363 = vset.pattern.permute.xlu1 %v7422_v2  ;;  %7364 = vset.pattern.permute.xlu0 %v7421_v1  ;;  %v7619_v35 = vld [vmem:[%s9901_s1 + $0x198] sm:$0xff]  ;;  %v7643_v39 = vld [vmem:[%s9901_s1 + $0x1a8] sm:$0xff]  ;;  %v7650_v40 = vld [vmem:[%s9901_s1 + $0x30] sm:$0xff] }
  0x18   : > { %585 = vperm.xlu1 %7363, %v5474_v6   ;;  %503 = vperm.xlu0 %7364, %v7498_v7   ;;  %v7624_v36 = vld [vmem:[%s9901_s1 + $0x78] sm:$0xff]  ;;  %v5492_v41 = vld [vmem:[%s9901_s1 + $0x110] sm:$0xff]  ;;  %v5486_v42 = vld [vmem:[%s9901_s1 + $0xe0] sm:$0xff] }
  0x19   : > { %v7636_v38 = vld [vmem:[%s9901_s1 + $0xd8] sm:$0xff]  ;;  %v5500_v53 = vld [vmem:[%s9901_s1 + $0x150] sm:$0xff]  ;;  %v5494_v62 = vld [vmem:[%s9901_s1 + $0x120] sm:$0xff] }
  0x1a   : > { %v5481_v44 = vld [vmem:[%s9901_s1 + $0xb8] sm:$0xff]  ;;  %vm6934_vm2 = vmpackc.low %vm1556_vm0, %vm7429_vm1 }
  0x1b   : > { %v5493_v46 = vld [vmem:[%s9901_s1 + $0x118] sm:$0xff]  ;;  %vm7332_vm8 = vmpackc.low %vm5285_vm7, %vm7429_vm1 }
  0x1c   : > { %590 = vperm.xlu1 %7363, %v5475_v9   ;;  %676 = vperm.xlu0 %7364, %v5475_v9   ;;  %v7681_v52 = vld [vmem:[%s9901_s1 + $0x38] sm:$0xff] }
  0x1d   : > { %v5489_v5 = vld [vmem:[%s9901_s1 + $0xf8] sm:$0xff] }
  0x1e   : > { %v5501_v8 = vld [vmem:[%s9901_s1 + $0x158] sm:$0xff] }
  0x20   : > { %7365 = vset.pattern.permute.xlu1 %v7421_v1  ;;  %511 = vperm.xlu0 %7364, %v5470_v12  }
  0x21   : > { %672 = vperm.xlu1 %7365, %v5474_v6  }
  0x24   : > { %515 = vperm.xlu0 %7364, %v5471_v13  }
  0x25   : > { %507 = vperm.xlu1 %7365, %v7525_v14  }
  0x28   : > { %853 = vperm.xlu0 %7364, %v5483_v15  }
  0x29   : > { %7366 = vset.pattern.permute.xlu1 %v7422_v2 }
  0x2a   : > { %428 = vperm.xlu1 %7366, %v5470_v12  }
  0x2c   : > { %519 = vperm.xlu0 %7364, %v5472_v16  }
  0x2e   : > { %762 = vperm.xlu1 %7366, %v5482_v17  }
  0x30   : > { %1026 = vperm.xlu0 %7364, %v5490_v18  }
  0x32   : > { %433 = vperm.xlu1 %7366, %v5471_v13  }
  0x34   : > { %692 = vperm.xlu0 %7364, %v5479_v19  }
  0x36   : > { %767 = vperm.xlu1 %7366, %v5483_v15  }
  0x38   : > { %1030 = vperm.xlu0 %7364, %v5491_v20  }
  0x3a   : > { %7367 = vset.pattern.permute.xlu1 %v7421_v1 }
  0x3b   : > { %680 = vperm.xlu1 %7367, %v7550_v21  }
  0x3c   : > { %696 = vperm.xlu0 %7364, %v5480_v22  }
  0x3f   : > { %849 = vperm.xlu1 %7367, %v5482_v17  }
  0x40   : > { %1203 = vperm.xlu0 %7364, %v5498_v23  }
  0x43   : > { %684 = vperm.xlu1 %7367, %v7563_v24  }
  0x44   : > { %869 = vperm.xlu0 %7364, %v5487_v25  }
  0x47   : > { %7368 = vset.pattern.permute.xlu1 %v7422_v2 }
  0x48   : > { %438 = vperm.xlu1 %7368, %v5472_v16   ;;  %1207 = vperm.xlu0 %7364, %v5499_v26  }
  0x4c   : > { %772 = vperm.xlu1 %7368, %v5484_v27   ;;  %873 = vperm.xlu0 %7364, %v5488_v28  }
  0x50   : > { %939 = vperm.xlu1 %7368, %v5490_v18   ;;  %1380 = vperm.xlu0 %7364, %v7582_v29  }
  0x54   : > { %610 = vperm.xlu1 %7368, %v5479_v19   ;;  %1046 = vperm.xlu0 %7364, %v7588_v30  }
  0x58   : > { %944 = vperm.xlu1 %7368, %v5491_v20   ;;  %1384 = vperm.xlu0 %7364, %v7594_v31   ;;  %v5502_v20 = vld [vmem:[%s9901_s1 + $0x160] sm:$0xff] }
  0x5c   : > { %7369 = vset.pattern.permute.xlu1 %v7421_v1  ;;  %1050 = vperm.xlu0 %7364, %v7600_v32  }
  0x5d   : > { %688 = vperm.xlu1 %7369, %v7605_v33  }
  0x60   : > { %1054 = vperm.xlu0 %7364, %v7613_v34  }
  0x61   : > { %857 = vperm.xlu1 %7369, %v5484_v27   ;;  %v5510_v27 = vld [vmem:[%s9901_s1 + $0x1a0] sm:$0xff] }
  0x64   : > { %1392 = vperm.xlu0 %7364, %v7619_v35  }
  0x65   : > { %523 = vperm.xlu1 %7369, %v7624_v36  }
  0x68   : > { %1227 = vperm.xlu0 %7364, %v7631_v37  }
  0x69   : > { %861 = vperm.xlu1 %7369, %v7636_v38  }
  0x6c   : > { %1400 = vperm.xlu0 %7364, %v7643_v39  }
  0x6d   : > { %7370 = vset.pattern.permute.xlu1 %v7422_v2 }
  0x6e   : > { %615 = vperm.xlu1 %7370, %v5480_v22  }
  0x70   : > { %370 = vperm.xlu0 %7364, %v7650_v40  }
  0x72   : > { %949 = vperm.xlu1 %7370, %v5492_v41  }
  0x76   : > { %1116 = vperm.xlu1 %7370, %v5498_v23  }
  0x7a   : > { %787 = vperm.xlu1 %7370, %v5487_v25  }
  0x7e   : > { %1121 = vperm.xlu1 %7370, %v5499_v26  }
  0x82   : > { %7371 = vset.pattern.permute.xlu1 %v7421_v1 }
  0x83   : > { %865 = vperm.xlu1 %7371, %v5486_v42  }
  0x87   : > { %1034 = vperm.xlu1 %7371, %v5492_v41  }
  0x8b   : > { %700 = vperm.xlu1 %7371, %v5481_v44  }
  0x8e   : > { %v7670_v47 = vpop.permute.xlu1 %495  ;;  %v409_v48 = vpop.permute.xlu0 %408 }
  0x8f   : > { %v446_v49 = vmul.f32 %v409_v48, %v7665_v45  ;;  %1038 = vperm.xlu1 %7371, %v5493_v46  }
  0x91   : > { %462 = vrot.lane.b32.xlu0 %v446_v49, %s7423_s20 }
  0x92   : > { %v7674_v50 = vpop.permute.xlu1 %499  ;;  %v7676_v51 = vpop.permute.xlu0 %413 }
  0x93   : > { %7372 = vset.pattern.permute.xlu1 %v7422_v2 }
  0x94   : > { %792 = vperm.xlu1 %7372, %v5488_v28  }
  0x95   : > { %374 = vperm.xlu0 %7364, %v7681_v52  }
  0x97   : > { %v7688_v54 = vpop.permute.xlu1 %585  ;;  %v7690_v55 = vpop.permute.xlu0 %503 }
  0x98   : > { %1126 = vperm.xlu1 %7372, %v5500_v53  }
  0x99   : > { %7381 = vset.pattern.permute.xlu0 %v7422_v2 }
  0x9a   : > { %418 = vperm.xlu0 %7381, %v7498_v7  }
  0x9b   : > { %v7694_v56 = vpop.permute.xlu1 %590  ;;  %v7696_v57 = vpop.permute.xlu0 %676 }
  0x9c   : > { %1293 = vperm.xlu1 %7372, %v7582_v29  }
  0x9e   : > { %423 = vperm.xlu0 %7381, %v7525_v14   ;;  %v5508_v14 = vld [vmem:[%s9901_s1 + $0x190] sm:$0xff] }
  0x9f   : > { %v7700_v58 = vpop.permute.xlu0 %511 }
  0xa0   : > { %964 = vperm.xlu1 %7372, %v7588_v30   ;;  %v7703_v59 = vpop.permute.xlu1 %672  ;;  %v5513_v30 = vld [vmem:[%s9901_s1 + $0x1b8] sm:$0xff] }
  0xa2   : > { %595 = vperm.xlu0 %7381, %v7550_v21  }
  0xa3   : > { %v7706_v60 = vpop.permute.xlu0 %515 }
  0xa4   : > { %1298 = vperm.xlu1 %7372, %v7594_v31   ;;  %v7709_v61 = vpop.permute.xlu1 %507  ;;  %v5505_v31 = vld [vmem:[%s9901_s1 + $0x178] sm:$0xff] }
  0xa6   : > { %600 = vperm.xlu0 %7381, %v7563_v24   ;;  %v5503_v24 = vld [vmem:[%s9901_s1 + $0x168] sm:$0xff] }
  0xa7   : > { %v7715_v63 = vpop.permute.xlu0 %853 }
  0xa8   : > { %7373 = vset.pattern.permute.xlu1 %v7421_v1 }
  0xa9   : > { %1042 = vperm.xlu1 %7373, %v5494_v62   ;;  %v7718_v0 = vpop.permute.xlu1 %428 }
  0xaa   : > { %605 = vperm.xlu0 %7381, %v7605_v33  }
  0xab   : > { %v7721_v3 = vpop.permute.xlu0 %519 }
  0xad   : > { %1211 = vperm.xlu1 %7373, %v5500_v53   ;;  %v7723_v4 = vpop.permute.xlu1 %762  ;;  %v282_v53 = vld [vmem:[%s9901_s1 + $0x28] sm:$0xff] }
  0xae   : > { %443 = vperm.xlu0 %7381, %v7624_v36  }
  0xaf   : > { %v7729_v6 = vpop.permute.xlu0 %1026 }
  0xb1   : > { %877 = vperm.xlu1 %7373, %v5489_v5   ;;  %v7731_v7 = vpop.permute.xlu1 %433 }
  0xb2   : > { %777 = vperm.xlu0 %7381, %v7636_v38   ;;  %v279_v38 = vld [vmem:[%s9901_s1 + $0x10] sm:$0xff] }
  0xb3   : > { %v7737_v9 = vpop.permute.xlu0 %692 }
  0xb5   : > { %1215 = vperm.xlu1 %7373, %v5501_v8   ;;  %v7739_v10 = vpop.permute.xlu1 %767 }
  0xb6   : > { %782 = vperm.xlu0 %7381, %v5486_v42   ;;  %v280_v42 = vld [vmem:[%s9901_s1 + $0x18] sm:$0xff] }
  0xb7   : > { %v7741_v12 = vpop.permute.xlu0 %1030 }
  0xb9   : > { %7374 = vset.pattern.permute.xlu1 %v7422_v2 }
  0xba   : > { %969 = vperm.xlu1 %7374, %v7600_v32   ;;  %v7745_v13 = vpop.permute.xlu1 %680  ;;  %620 = vperm.xlu0 %7381, %v5481_v44   ;;  %v277_v32 = vld [vmem:[%s9901_s1] sm:$0xff]  ;;  %v5512_v44 = vld [vmem:[%s9901_s1 + $0x1b0] sm:$0xff] }
  0xbb   : > { %v7750_v15 = vpop.permute.xlu0 %696 }
  0xbe   : > { %1303 = vperm.xlu1 %7374, %v5508_v14   ;;  %v7752_v16 = vpop.permute.xlu1 %849  ;;  %954 = vperm.xlu0 %7381, %v5493_v46   ;;  %v281_v46 = vld [vmem:[%s9901_s1 + $0x20] sm:$0xff] }
  0xbf   : > { %v7757_v18 = vpop.permute.xlu0 %1203 }
  0xc2   : > { %974 = vperm.xlu1 %7374, %v7613_v34   ;;  %v7755_v17 = vpop.permute.xlu1 %684  ;;  %959 = vperm.xlu0 %7381, %v5494_v62  }
  0xc3   : > { %v7765_v21 = vpop.permute.xlu0 %869 }
  0xc6   : > { %1308 = vperm.xlu1 %7374, %v7619_v35   ;;  %797 = vperm.xlu0 %7381, %v5489_v5   ;;  %v278_v35 = vld [vmem:[%s9901_s1 + $0x8] sm:$0xff]  ;;  %v527_v5 = vmul.f32 %v7674_v50, %v7513_v11 }
  0xc7   : > { %v7760_v19 = vpop.permute.xlu1 %438  ;;  %v7775_v25 = vpop.permute.xlu0 %1207 }
  0xca   : > { %7375 = vset.pattern.permute.xlu1 %v7421_v1  ;;  %1131 = vperm.xlu0 %7381, %v5501_v8  }
  0xcb   : > { %1219 = vperm.xlu1 %7375, %v5502_v20   ;;  %v7768_v22 = vpop.permute.xlu1 %772  ;;  %v7782_v28 = vpop.permute.xlu0 %873 }
  0xce   : > { %1136 = vperm.xlu0 %7381, %v5502_v20   ;;  %v623_v20 = vmul.f32 %v7688_v54, %v7665_v45 }
  0xcf   : > { %1388 = vperm.xlu1 %7375, %v5508_v14   ;;  %v7770_v23 = vpop.permute.xlu1 %939  ;;  %v7797_v33 = vpop.permute.xlu0 %1380 }
  0xd2   : > { %1141 = vperm.xlu0 %7381, %v5503_v24  }
  0xd3   : > { %1223 = vperm.xlu1 %7375, %v5503_v24   ;;  %v7777_v26 = vpop.permute.xlu1 %610 }
  0xd6   : > { %1313 = vperm.xlu0 %7381, %v5510_v27  }
  0xd7   : > { %7376 = vset.pattern.permute.xlu1 %v7422_v2  ;;  %v7785_v29 = vpop.permute.xlu1 %944 }
  0xd8   : > { %1146 = vperm.xlu1 %7376, %v7631_v37   ;;  %v7807_v37 = vpop.permute.xlu0 %1046 }
  0xda   : > { %1328 = vperm.xlu0 %7381, %v5513_v30  }
  0xdc   : > { %1151 = vperm.xlu1 %7376, %v5505_v31   ;;  %v7799_v34 = vpop.permute.xlu1 %688 }
  0xde   : > { %287 = vperm.xlu0 %7381, %v277_v32  }
  0xe0   : > { %1318 = vperm.xlu1 %7376, %v7643_v39   ;;  %v7805_v36 = vpop.permute.xlu1 %857  ;;  %v7818_v39 = vpop.permute.xlu0 %1384 }
  0xe2   : > { %292 = vperm.xlu0 %7381, %v278_v35  }
  0xe4   : > { %7377 = vset.pattern.permute.xlu1 %v7421_v1  ;;  %v7813_v41 = vpop.permute.xlu1 %523  ;;  %v7831_v49 = vpop.permute.xlu0 %1050 }
  0xe5   : > { %1396 = vperm.xlu1 %7377, %v5510_v27  }
  0xe6   : > { %297 = vperm.xlu0 %7381, %v279_v38  }
  0xe8   : > { %v7820_v43 = vpop.permute.xlu1 %861  ;;  %v7841_v8 = vpop.permute.xlu0 %1054 }
  0xe9   : > { %1231 = vperm.xlu1 %7377, %v5505_v31  }
  0xea   : > { %302 = vperm.xlu0 %7381, %v280_v42  }
  0xec   : > { %v7850_v27 = vpop.permute.xlu0 %1392 }
  0xed   : > { %7378 = vset.pattern.permute.xlu1 %v7422_v2  ;;  %v7829_v48 = vpop.permute.xlu1 %615 }
  0xee   : > { %1323 = vperm.xlu1 %7378, %v5512_v44   ;;  %307 = vperm.xlu0 %7381, %v281_v46  }
  0xf0   : > { %v7860_v54 = vpop.permute.xlu0 %1227 }
  0xf1   : > { %v7836_v62 = vpop.permute.xlu1 %949 }
  0xf2   : > { %7379 = vset.pattern.permute.xlu1 %v7421_v1  ;;  %312 = vperm.xlu0 %7381, %v282_v53   ;;  %v624_v1 = vmul.f32 %v7694_v56, %v7665_v45 }
  0xf3   : > { %1404 = vperm.xlu1 %7379, %v5512_v44  }
  0xf4   : > { %v7867_v44 = vpop.permute.xlu0 %1400 }
  0xf5   : > { %v7843_v14 = vpop.permute.xlu1 %1116 }
  0xf6   : > { %544 = vrot.lane.b32.xlu0 %v527_v5, %s7423_s20 }
  0xf7   : > { %1408 = vperm.xlu1 %7379, %v5513_v30   ;;  %v703_v30 = vmul.f32 %v7703_v59, %v7513_v11 }
  0xf8   : > { %v7874_v59 = vpop.permute.xlu0 %370 }
  0xf9   : > { %v7848_v24 = vpop.permute.xlu1 %787  ;;  %9945 = vst [vmem:[#allocation2_spill] sm:$0xff] %v7874_v59 }
  0xfa   : > { %639 = vrot.lane.b32.xlu0 %v623_v20, %s7424_s16 }
  0xfb   : > { %346 = vperm.xlu1 %7379, %v277_v32   ;;  %v704_v32 = vmul.f32 %v7696_v57, %v7513_v11 }
  0xfd   : > { %v7855_v50 = vpop.permute.xlu1 %1121 }
  0xfe   : > { %641 = vrot.lane.b32.xlu0 %v624_v1, %s7424_s16 }
  0xff   : > { %350 = vperm.xlu1 %7379, %v278_v35  }
 0x102   : > { %v7862_v31 = vpop.permute.xlu1 %865  ;;  %719 = vrot.lane.b32.xlu0 %v703_v30, %s7424_s16 }
 0x103   : > { %354 = vperm.xlu1 %7379, %v279_v38   ;;  %v7878_v20 = vpop.permute.xlu0 %462 }
 0x104   : > { %9946 = vst [vmem:[#allocation3_spill] sm:$0xff] %v7878_v20 }
 0x106   : > { %v7869_v56 = vpop.permute.xlu1 %1034  ;;  %721 = vrot.lane.b32.xlu0 %v704_v32, %s7424_s16 }
 0x107   : > { %358 = vperm.xlu1 %7379, %v280_v42   ;;  %v447_v42 = vmul.f32 %v7676_v51, %v7665_v45 }
 0x10a   : > { %v7872_v35 = vpop.permute.xlu1 %700 }
 0x10b   : > { %362 = vperm.xlu1 %7379, %v281_v46  }
 0x10e   : > { %v7876_v5 = vpop.permute.xlu1 %1038 }
 0x10f   : > { %366 = vperm.xlu1 %7379, %v282_v53  }
 0x113   : > { %v7880_v38 = vpop.permute.xlu1 %792  ;;  %7380 = vset.pattern.permute.xlu1 %v7422_v2  ;;  %v526_v2 = vmul.f32 %v7670_v47, %v7513_v11 }
 0x114   : > { %317 = vperm.xlu1 %7380, %v7650_v40   ;;  %v7884_v57 = vpop.permute.xlu0 %374 }
 0x115   : > { %9947 = vst [vmem:[#allocation4_spill] sm:$0xff] %v7884_v57 }
 0x117   : > { %v7888_v1 = vpop.permute.xlu1 %1126 }
 0x118   : > { %464 = vrot.lane.b32.xlu1 %v447_v42, %s7423_s20  ;;  %v451_v42 = vmul.f32 %v7731_v7, %v7665_v45 }
 0x119   : > { %v419_v46 = vpop.permute.xlu0 %418 }
 0x11a   : > { %v448_v40 = vmul.f32 %v419_v46, %v7665_v45 }
 0x11b   : > { %v7891_v30 = vpop.permute.xlu1 %1293 }
 0x11c   : > { %322 = vperm.xlu1 %7380, %v7681_v52  }
 0x11d   : > { %v424_v53 = vpop.permute.xlu0 %423 }
 0x11e   : > { %v449_v47 = vmul.f32 %v424_v53, %v7665_v45  ;;  %v529_v53 = vmul.f32 %v7709_v61, %v7513_v11 }
 0x11f   : > { %v7896_v32 = vpop.permute.xlu1 %964 }
 0x120   : > { %542 = vrot.lane.b32.xlu1 %v526_v2, %s7423_s20  ;;  %v528_v2 = vmul.f32 %v7690_v55, %v7513_v11 }
 0x121   : > { %v596_v51 = vpop.permute.xlu0 %595 }
 0x122   : > { %v625_v57 = vmul.f32 %v596_v51, %v7665_v45  ;;  %v705_v51 = vmul.f32 %v7745_v13, %v7513_v11  ;;  %v881_v13 = vmul.f32 %v7715_v63, %v7513_v11 }
 0x123   : > { %v7901_v59 = vpop.permute.xlu1 %1298 }
 0x124   : > { %466 = vrot.lane.b32.xlu1 %v448_v40, %s7423_s20  ;;  %643 = vrot.lane.b32.xlu0 %v625_v57, %s7424_s16  ;;  %v801_v40 = vmul.f32 %v7739_v10, %v7665_v45  ;;  %v531_v10 = vmul.f32 %v7706_v60, %v7513_v11 }
 0x125   : > { %v601_v52 = vpop.permute.xlu0 %600 }
 0x128   : > { %v7908_v20 = vpop.permute.xlu1 %1042  ;;  %468 = vrot.lane.b32.xlu1 %v449_v47, %s7423_s20  ;;  %472 = vrot.lane.b32.xlu0 %v451_v42, %s7423_s20  ;;  %v450_v47 = vmul.f32 %v7718_v0, %v7665_v45 }
 0x129   : > { %v606_v46 = vpop.permute.xlu0 %605 }
 0x12c   : > { %v7916_v57 = vpop.permute.xlu1 %1211  ;;  %546 = vrot.lane.b32.xlu1 %v528_v2, %s7423_s20  ;;  %818 = vrot.lane.b32.xlu0 %v801_v40, %s7425_s17  ;;  %v800_v40 = vmul.f32 %v7723_v4, %v7665_v45  ;;  %v530_v4 = vmul.f32 %v7700_v58, %v7513_v11 }
 0x12d   : > { %v444_v7 = vpop.permute.xlu0 %443 }
 0x130   : > { %v7924_v42 = vpop.permute.xlu1 %877  ;;  %548 = vrot.lane.b32.xlu1 %v529_v53, %s7423_s20  ;;  %723 = vrot.lane.b32.xlu0 %v705_v51, %s7424_s16  ;;  %v626_v53 = vmul.f32 %v601_v52, %v7665_v45  ;;  %v627_v51 = vmul.f32 %v606_v46, %v7665_v45 }
 0x131   : > { %v778_v55 = vpop.permute.xlu0 %777 }
 0x134   : > { %v7932_v2 = vpop.permute.xlu1 %1215  ;;  %470 = vrot.lane.b32.xlu1 %v450_v47, %s7423_s20  ;;  %552 = vrot.lane.b32.xlu0 %v531_v10, %s7423_s20  ;;  %v977_v47 = vmul.f32 %v7770_v23, %v7665_v45 }
 0x135   : > { %v783_v61 = vpop.permute.xlu0 %782 }
 0x138   : > { %816 = vrot.lane.b32.xlu1 %v800_v40, %s7425_s17  ;;  %898 = vrot.lane.b32.xlu0 %v881_v13, %s7425_s17  ;;  %v880_v13 = vmul.f32 %v7752_v16, %v7513_v11  ;;  %v628_v40 = vmul.f32 %v7777_v26, %v7665_v45  ;;  %v452_v26 = vmul.f32 %v7760_v19, %v7665_v45 }
 0x139   : > { %v7942_v60 = vpop.permute.xlu1 %969  ;;  %v7944_v0 = vpop.permute.xlu0 %620 }
 0x13c   : > { %645 = vrot.lane.b32.xlu1 %v626_v53, %s7424_s16  ;;  %647 = vrot.lane.b32.xlu0 %v627_v51, %s7424_s16  ;;  %v706_v53 = vmul.f32 %v7755_v17, %v7513_v11  ;;  %v978_v51 = vmul.f32 %v7785_v29, %v7665_v45  ;;  %v1057_v29 = vmul.f32 %v7729_v6, %v7513_v11 }
 0x13d   : > { %v7950_v63 = vpop.permute.xlu1 %1303  ;;  %v7952_v10 = vpop.permute.xlu0 %954 }
 0x140   : > { %550 = vrot.lane.b32.xlu1 %v530_v4, %s7423_s20  ;;  %993 = vrot.lane.b32.xlu0 %v977_v47, %s7426_s18  ;;  %v707_v4 = vmul.f32 %v7799_v34, %v7513_v11  ;;  %v708_v34 = vmul.f32 %v7737_v9, %v7513_v11 }
 0x141   : > { %v7960_v52 = vpop.permute.xlu1 %974  ;;  %v7962_v46 = vpop.permute.xlu0 %959 }
 0x144   : > { %896 = vrot.lane.b32.xlu1 %v880_v13, %s7425_s17  ;;  %649 = vrot.lane.b32.xlu0 %v628_v40, %s7424_s16  ;;  %v802_v13 = vmul.f32 %v7768_v22, %v7665_v45  ;;  %v1058_v22 = vmul.f32 %v7741_v12, %v7513_v11 }
 0x145   : > { %v7970_v58 = vpop.permute.xlu1 %1308  ;;  %v7972_v23 = vpop.permute.xlu0 %797 }
 0x148   : > { %725 = vrot.lane.b32.xlu1 %v706_v53, %s7424_s16  ;;  %995 = vrot.lane.b32.xlu0 %v978_v51, %s7426_s18  ;;  %v453_v53 = vmul.f32 %v444_v7, %v7665_v45  ;;  %v532_v7 = vmul.f32 %v7721_v3, %v7513_v11 }
 0x149   : > { %v7980_v16 = vpop.permute.xlu0 %1131 }
 0x14a   : > { %v7986_v47 = vpop.permute.xlu1 %1219 }
 0x14c   : > { %474 = vrot.lane.b32.xlu1 %v452_v26, %s7423_s20  ;;  %727 = vrot.lane.b32.xlu0 %v707_v4, %s7424_s16  ;;  %v803_v26 = vmul.f32 %v778_v55, %v7665_v45  ;;  %v882_v55 = vmul.f32 %v7805_v36, %v7513_v11 }
 0x14d   : > { %v7990_v17 = vpop.permute.xlu0 %1136 }
 0x14e   : > { %v7996_v40 = vpop.permute.xlu1 %1388 }
 0x150   : > { %820 = vrot.lane.b32.xlu1 %v802_v13, %s7425_s17  ;;  %1073 = vrot.lane.b32.xlu0 %v1057_v29, %s7426_s18  ;;  %v804_v29 = vmul.f32 %v783_v61, %v7665_v45  ;;  %v533_v61 = vmul.f32 %v7813_v41, %v7513_v11 }
 0x151   : > { %v8000_v19 = vpop.permute.xlu0 %1141 }
 0x152   : > { %v8005_v51 = vpop.permute.xlu1 %1223 }
 0x154   : > { %729 = vrot.lane.b32.xlu0 %v708_v34, %s7424_s16  ;;  %476 = vrot.lane.b32.xlu1 %v453_v53, %s7423_s20  ;;  %v1154_v34 = vmul.f32 %v7843_v14, %v7665_v45  ;;  %v883_v14 = vmul.f32 %v7820_v43, %v7513_v11 }
 0x155   : > { %v8009_v6 = vpop.permute.xlu0 %1313 }
 0x157   : > { %v8014_v4 = vpop.permute.xlu1 %1146 }
 0x158   : > { %1075 = vrot.lane.b32.xlu0 %v1058_v22, %s7426_s18  ;;  %822 = vrot.lane.b32.xlu1 %v803_v26, %s7425_s17  ;;  %v805_v22 = vmul.f32 %v7848_v24, %v7665_v45  ;;  %v709_v24 = vmul.f32 %v7750_v15, %v7513_v11  ;;  %v1460_v15 = vld [vmem:[%s9902_s2 + $0x8] sm:$0xff] }
 0x159   : > { %v8018_v9 = vpop.permute.xlu0 %1328 }
 0x15b   : > { %v8023_v13 = vpop.permute.xlu1 %1151 }
 0x15c   : > { %554 = vrot.lane.b32.xlu1 %v532_v7, %s7423_s20  ;;  %824 = vrot.lane.b32.xlu0 %v804_v29, %s7425_s17  ;;  %v1155_v7 = vmul.f32 %v7855_v50, %v7665_v45  ;;  %v979_v50 = vmul.f32 %v7836_v62, %v7665_v45  ;;  %v1060_v62 = vmul.f32 %v7876_v5, %v7513_v11 }
 0x15d   : > { %v8027_v12 = vpop.permute.xlu0 %287  ;;  %v884_v5 = vmul.f32 %v7862_v31, %v7513_v11  ;;  %v710_v31 = vmul.f32 %v7872_v35, %v7513_v11 }
 0x15f   : > { %v8033_v53 = vpop.permute.xlu1 %1318 }
 0x160   : > { %900 = vrot.lane.b32.xlu1 %v882_v55, %s7425_s17  ;;  %1170 = vrot.lane.b32.xlu0 %v1154_v34, %s7427_s19  ;;  %v629_v55 = vmul.f32 %v7829_v48, %v7665_v45  ;;  %v1059_v34 = vmul.f32 %v7869_v56, %v7513_v11  ;;  %v630_v48 = vmul.f32 %v7944_v0, %v7665_v45  ;;  %v1459_v0 = vld [vmem:[%s9902_s2] sm:$0xff] }
 0x161   : > { %v8037_v3 = vpop.permute.xlu0 %292  ;;  %v980_v56 = vmul.f32 %v7952_v10, %v7665_v45  ;;  %v1156_v10 = vmul.f32 %v7888_v1, %v7665_v45  ;;  %v1157_v1 = vmul.f32 %v7980_v16, %v7665_v45  ;;  %v1235_v16 = vmul.f32 %v7775_v25, %v7513_v11  ;;  %v1515_v25 = vld [vmem:[%s9905_s5] sm:$0xff] }
 0x164   : > { %v8043_v26 = vpop.permute.xlu1 %1396  ;;  %556 = vrot.lane.b32.xlu1 %v533_v61, %s7423_s20  ;;  %826 = vrot.lane.b32.xlu0 %v805_v22, %s7425_s17 }
 0x165   : > { %v8047_v36 = vpop.permute.xlu0 %297 }
 0x168   : > { %v8053_v29 = vpop.permute.xlu1 %1231  ;;  %902 = vrot.lane.b32.xlu1 %v883_v14, %s7425_s17  ;;  %1172 = vrot.lane.b32.xlu0 %v1155_v7, %s7427_s19 }
 0x169   : > { %v8057_v41 = vpop.permute.xlu0 %302 }
 0x16c   : > { %651 = vrot.lane.b32.xlu1 %v629_v55, %s7424_s16  ;;  %731 = vrot.lane.b32.xlu0 %v709_v24, %s7424_s16  ;;  %v806_v24 = vmul.f32 %v7880_v38, %v7665_v45  ;;  %v1234_v38 = vmul.f32 %v7757_v18, %v7513_v11  ;;  %v1461_v18 = vld [vmem:[%s9902_s2 + $0x10] sm:$0xff] }
 0x16d   : > { %v8065_v43 = vpop.permute.xlu1 %1323  ;;  %v8071_v61 = vpop.permute.xlu0 %307 }
 0x170   : > { %997 = vrot.lane.b32.xlu1 %v979_v50, %s7426_s18  ;;  %1077 = vrot.lane.b32.xlu0 %v1059_v34, %s7426_s18 }
 0x171   : > { %v8082_v14 = vpop.permute.xlu0 %312 }
 0x172   : > { %v8080_v22 = vpop.permute.xlu1 %1404  ;;  %9948 = vst [vmem:[#allocation5_spill] sm:$0xff] %v8082_v14 }
 0x174   : > { %1474 = vperm.xlu0 %7381, %v1460_v15   ;;  %653 = vrot.lane.b32.xlu1 %v630_v48, %s7424_s16  ;;  %v807_v48 = vmul.f32 %v7972_v23, %v7665_v45  ;;  %v885_v23 = vmul.f32 %v7765_v21, %v7513_v11  ;;  %v1411_v21 = vmul.f32 %v7797_v33, %v7513_v11  ;;  %v1516_v33 = vld [vmem:[%s9905_s5 + $0x8] sm:$0xff] }
 0x175   : > { %v8098_v55 = vpop.permute.xlu0 %544 }
 0x176   : > { %v8089_v7 = vpop.permute.xlu1 %1408 }
 0x178   : > { %1079 = vrot.lane.b32.xlu0 %v1060_v62, %s7426_s18  ;;  %999 = vrot.lane.b32.xlu1 %v980_v56, %s7426_s18 }
 0x179   : > { %v8109_v15 = vpop.permute.xlu0 %639 }
 0x17a   : > { %v8100_v50 = vpop.permute.xlu1 %346 }
 0x17c   : > { %828 = vrot.lane.b32.xlu0 %v806_v24, %s7425_s17  ;;  %1469 = vperm.xlu1 %7380, %v1459_v0  }
 0x17d   : > { %v8125_v56 = vpop.permute.xlu0 %641 }
 0x17e   : > { %v8107_v34 = vpop.permute.xlu1 %350 }
 0x180   : > { %1174 = vrot.lane.b32.xlu0 %v1156_v10, %s7427_s19  ;;  %904 = vrot.lane.b32.xlu1 %v884_v5, %s7425_s17  ;;  %v1061_v5 = vmul.f32 %v7908_v20, %v7513_v11  ;;  %v1331_v20 = vmul.f32 %v7891_v30, %v7665_v45  ;;  %v1518_v30 = vld [vmem:[%s9905_s5 + $0x18] sm:$0xff] }
 0x181   : > { %v8138_v35 = vpop.permute.xlu0 %719 }
 0x182   : > { %v8117_v62 = vpop.permute.xlu1 %354 }
 0x184   : > { %1250 = vrot.lane.b32.xlu1 %v1234_v38, %s7427_s19  ;;  %830 = vrot.lane.b32.xlu0 %v807_v48, %s7425_s17  ;;  %v981_v38 = vmul.f32 %v7962_v46, %v7665_v45  ;;  %v887_v46 = vmul.f32 %v7924_v42, %v7513_v11  ;;  %v982_v42 = vmul.f32 %v7896_v32, %v7665_v45  ;;  %v1520_v32 = vld [vmem:[%s9905_s5 + $0x28] sm:$0xff] }
 0x185   : > { %v8153_v48 = vpop.permute.xlu0 %721 }
 0x186   : > { %v8127_v0 = vpop.permute.xlu1 %358 }
 0x188   : > { %733 = vrot.lane.b32.xlu1 %v710_v31, %s7424_s16  ;;  %1176 = vrot.lane.b32.xlu0 %v1157_v1, %s7427_s19 }
 0x18a   : > { %v8136_v24 = vpop.permute.xlu1 %362 }
 0x18c   : > { %906 = vrot.lane.b32.xlu1 %v885_v23, %s7425_s17  ;;  %1479 = vperm.xlu0 %7381, %v1461_v18   ;;  %v6905_v18 = vpack.c.bf16 %v1516_v33, %v1515_v25  ;;  %v1519_v33 = vld [vmem:[%s9905_s5 + $0x20] sm:$0xff] }
 0x18e   : > { %v8145_v10 = vpop.permute.xlu1 %366  ;;  %6906 = vmatprep.subr.bf16.mxu0 %v6905_v18 }
 0x18f   : > { %9949 = vst [vmem:[#allocation6_spill] sm:$0xff] %v8145_v10  ;;  %6908 = vmatpush3.bf16.msra.mxu0 %v6905_v18  ;;  %v6913_v18 = vpack.c.bf16 %v1520_v32, %v1519_v33  ;;  %v1523_v32 = vld [vmem:[%s9905_s5 + $0x40] sm:$0xff] }
 0x190   : > { %1252 = vrot.lane.b32.xlu1 %v1235_v16, %s7427_s19  ;;  %1081 = vrot.lane.b32.xlu0 %v1061_v5, %s7426_s18  ;;  %v1517_v16 = vld [vmem:[%s9905_s5 + $0x10] sm:$0xff]  ;;  %v1237_v5 = vmul.f32 %v7932_v2, %v7513_v11  ;;  %v1332_v2 = vmul.f32 %v7901_v59, %v7665_v45  ;;  %v1522_v59 = vld [vmem:[%s9905_s5 + $0x38] sm:$0xff] }
 0x193   : > { %v8155_v31 = vpop.permute.xlu1 %317 }
 0x194   : > { %1001 = vrot.lane.b32.xlu1 %v981_v38, %s7426_s18  ;;  %1427 = vrot.lane.b32.xlu0 %v1411_v21, %s7428_s29  ;;  %v6909_v38 = vpack.c.bf16 %v1518_v30, %v1517_v16  ;;  %v1521_v30 = vld [vmem:[%s9905_s5 + $0x30] sm:$0xff] }
 0x196   : > { %v8169_v1 = vpop.permute.xlu0 %643  ;;  %6910 = vmatprep.subr.bf16.mxu0 %v6909_v38 }
 0x197   : > { %v8171_v23 = vpop.permute.xlu1 %464  ;;  %6912 = vmatpush3.bf16.msra.mxu0 %v6909_v38  ;;  %v6917_v38 = vpack.c.bf16 %v1522_v59, %v1521_v30  ;;  %v1462_v59 = vld [vmem:[%s9902_s2 + $0x18] sm:$0xff] }
 0x198   : > { %1347 = vrot.lane.b32.xlu1 %v1331_v20, %s7428_s29  ;;  %910 = vrot.lane.b32.xlu0 %v887_v46, %s7425_s17  ;;  %v983_v20 = vmul.f32 %v7942_v60, %v7665_v45  ;;  %v886_v60 = vmul.f32 %v7782_v28, %v7513_v11  ;;  %v1524_v28 = vld [vmem:[%s9905_s5 + $0x48] sm:$0xff] }
 0x199   : > { %6914 = vmatprep.subr.bf16.mxu0 %v6913_v18 }
 0x19a   : > { %v8185_v21 = vpop.permute.xlu0 %472 }
 0x19b   : > { %9950 = vst [vmem:[#allocation7_spill] sm:$0xff] %v8185_v21  ;;  %v8187_v25 = vpop.permute.xlu1 %322  ;;  %6916 = vmatpush3.bf16.msra.mxu0 %v6913_v18  ;;  %v6921_v18 = vpack.c.bf16 %v1524_v28, %v1523_v32  ;;  %v1527_v28 = vld [vmem:[%s9905_s5 + $0x60] sm:$0xff] }
 0x19c   : > { %9951 = vst [vmem:[#allocation8_spill] sm:$0xff] %v8187_v25  ;;  %1003 = vrot.lane.b32.xlu1 %v982_v42, %s7426_s18  ;;  %1256 = vrot.lane.b32.xlu0 %v1237_v5, %s7427_s19  ;;  %v1333_v42 = vmul.f32 %v7950_v63, %v7665_v45  ;;  %v1236_v63 = vmul.f32 %v7916_v57, %v7513_v11  ;;  %v1463_v57 = vld [vmem:[%s9902_s2 + $0x20] sm:$0xff] }
 0x19d   : > { %6918 = vmatprep.subr.bf16.mxu0 %v6917_v38 }
 0x19e   : > { %v8201_v46 = vpop.permute.xlu0 %818 }
 0x19f   : > { %v8203_v16 = vpop.permute.xlu1 %542  ;;  %6920 = vmatpush3.bf16.msra.mxu0 %v6917_v38 }
 0x1a0   : > { %1349 = vrot.lane.b32.xlu1 %v1332_v2, %s7428_s29  ;;  %1005 = vrot.lane.b32.xlu0 %v983_v20, %s7426_s18  ;;  %v1159_v2 = vmul.f32 %v8000_v19, %v7665_v45  ;;  %v1525_v19 = vld [vmem:[%s9905_s5 + $0x50] sm:$0xff] }
 0x1a1   : > { %6922 = vmatprep.subr.bf16.mxu0 %v6921_v18 }
 0x1a2   : > { %v8217_v5 = vpop.permute.xlu0 %723 }
 0x1a3   : > { %v8219_v33 = vpop.permute.xlu1 %466  ;;  %6924 = vmatpush3.bf16.msra.mxu0 %v6921_v18  ;;  %v1238_v18 = vmul.f32 %v7986_v47, %v7513_v11  ;;  %v1530_v47 = vld [vmem:[%s9905_s5 + $0x78] sm:$0x3] }
 0x1a4   : > { %908 = vrot.lane.b32.xlu1 %v886_v60, %s7425_s17  ;;  %1351 = vrot.lane.b32.xlu0 %v1333_v42, %s7428_s29  ;;  %v1526_v60 = vld [vmem:[%s9905_s5 + $0x58] sm:$0xff] }
 0x1a5   : > { %v6925_v38 = vpack.c.bf16 %v1526_v60, %v1525_v19  ;;  %v1464_v60 = vld [vmem:[%s9902_s2 + $0x28] sm:$0xff] }
 0x1a6   : > { %v8233_v20 = vpop.permute.xlu0 %552 }
 0x1a7   : > { %9952 = vst [vmem:[#allocation9_spill] sm:$0xff] %v8233_v20  ;;  %v8235_v30 = vpop.permute.xlu1 %468  ;;  %6926 = vmatprep.subr.bf16.mxu0 %v6925_v38 }
 0x1a8   : > { %1254 = vrot.lane.b32.xlu1 %v1236_v63, %s7427_s19  ;;  %1180 = vrot.lane.b32.xlu0 %v1159_v2, %s7427_s19  ;;  %v1528_v63 = vld [vmem:[%s9905_s5 + $0x68] sm:$0xff]  ;;  %v1062_v2 = vmul.f32 %v7807_v37, %v7513_v11  ;;  %v1529_v37 = vld [vmem:[%s9905_s5 + $0x70] sm:$0xff] }
 0x1a9   : > { %6928 = vmatpush3.bf16.msra.mxu0 %v6925_v38  ;;  %v1412_v38 = vmul.f32 %v7818_v39, %v7513_v11  ;;  %v1239_v39 = vmul.f32 %v8005_v51, %v7513_v11  ;;  %v1334_v51 = vmul.f32 %v7970_v58, %v7665_v45 }
 0x1aa   : > { %v8251_v42 = vpop.permute.xlu0 %898 }
 0x1ab   : > { %v8253_v32 = vpop.permute.xlu1 %546 }
 0x1ac   : > { %1484 = vperm.xlu1 %7380, %v1462_v59   ;;  %1489 = vperm.xlu0 %7381, %v1463_v57   ;;  %v6929_v59 = vpack.c.bf16 %v1528_v63, %v1527_v28  ;;  %v6933_v63 = vpack.c.bf16 %v1530_v47, %v1529_v37  ;;  %v984_v37 = vmul.f32 %v7960_v52, %v7665_v45 }
 0x1ae   : > { %v8265_v19 = vpop.permute.xlu0 %647  ;;  %6930 = vmatprep.subr.bf16.mxu0 %v6929_v59 }
 0x1af   : > { %v8267_v57 = vpop.permute.xlu1 %548  ;;  %6932 = vmatpush3.bf16.msra.mxu0 %v6929_v59 }
 0x1b0   : > { %1083 = vrot.lane.b32.xlu1 %v1062_v2, %s7426_s18  ;;  %1258 = vrot.lane.b32.xlu0 %v1238_v18, %s7427_s19  ;;  %v1158_v18 = vmul.f32 %v7990_v17, %v7665_v45 }
 0x1b1   : > { %6935 = vmatprep.subr.msk.bf16.mxu0 %vm6934_vm2, %v6933_v63 }
 0x1b2   : > { %v8282_v28 = vpop.permute.xlu0 %993 }
 0x1b3   : > { %v8284_v2 = vpop.permute.xlu1 %470  ;;  %6938 = vmatpush3.bf16.msk.msra.mxu0 %vm6934_vm2, %v6933_v63 }
 0x1b4   : > { %1429 = vrot.lane.b32.xlu1 %v1412_v38, %s7428_s29  ;;  %1494 = vperm.xlu0 %7381, %v1464_v60   ;;  %v1160_v60 = vmul.f32 %v8014_v4, %v7665_v45  ;;  %v1161_v38 = vmul.f32 %v8023_v13, %v7665_v45  ;;  %v1465_v4 = vld [vmem:[%s9902_s2 + $0x30] sm:$0xff]  ;;  %v1413_v13 = vmul.f32 %v7996_v40, %v7513_v11 }
 0x1b6   : > { %v8292_v20 = vpop.permute.xlu0 %649 }
 0x1b7   : > { %9953 = vst [vmem:[#allocation10_spill] sm:$0xff] %v8292_v20  ;;  %v8294_v59 = vpop.permute.xlu1 %816  ;;  %v329_v20 = vmul.f32 %v7665_v45, %v8027_v12 }
 0x1b8   : > { %1178 = vrot.lane.b32.xlu1 %v1158_v18, %s7427_s19  ;;  %1260 = vrot.lane.b32.xlu0 %v1239_v39, %s7427_s19  ;;  %v1063_v18 = vmul.f32 %v7831_v49, %v7513_v11  ;;  %v1064_v49 = vmul.f32 %v7841_v8, %v7513_v11 }
 0x1ba   : > { %v8302_v47 = vpop.permute.xlu0 %995 }
 0x1bb   : > { %v8304_v17 = vpop.permute.xlu1 %645 }
 0x1bc   : > { %1007 = vrot.lane.b32.xlu1 %v984_v37, %s7426_s18  ;;  %1182 = vrot.lane.b32.xlu0 %v1160_v60, %s7427_s19  ;;  %v1415_v37 = vmul.f32 %v8043_v26, %v7513_v11  ;;  %v1414_v26 = vmul.f32 %v7850_v27, %v7513_v11  ;;  %v1691_v27 = vld [vmem:[%s9904_s4] sm:$0xff] }
 0x1be   : > { %v8312_v63 = vpop.permute.xlu0 %727 }
 0x1bf   : > { %v8314_v52 = vpop.permute.xlu1 %550 }
 0x1c0   : > { %1353 = vrot.lane.b32.xlu1 %v1334_v51, %s7428_s29  ;;  %1184 = vrot.lane.b32.xlu0 %v1161_v38, %s7427_s19  ;;  %v1241_v38 = vmul.f32 %v8053_v29, %v7513_v11  ;;  %v1335_v29 = vmul.f32 %v8009_v6, %v7665_v45  ;;  %v1693_v6 = vld [vmem:[%s9904_s4 + $0x10] sm:$0xff] }
 0x1c2   : > { %v8323_v39 = vpop.permute.xlu0 %1073 }
 0x1c3   : > { %v8325_v58 = vpop.permute.xlu1 %896 }
 0x1c4   : > { %1085 = vrot.lane.b32.xlu1 %v1063_v18, %s7426_s18  ;;  %1499 = vperm.xlu0 %7381, %v1465_v4   ;;  %v1337_v18 = vmul.f32 %v8065_v43, %v7665_v45  ;;  %v1336_v43 = vmul.f32 %v8033_v53, %v7665_v45 }
 0x1c6   : > { %v8332_v60 = vpop.permute.xlu0 %729 }
 0x1c7   : > { %9954 = vst [vmem:[#allocation11_spill] sm:$0xff] %v8332_v60  ;;  %v8334_v51 = vpop.permute.xlu1 %725 }
 0x1c8   : > { %1431 = vrot.lane.b32.xlu1 %v1413_v13, %s7428_s29  ;;  %1435 = vrot.lane.b32.xlu0 %v1415_v37, %s7428_s29  ;;  %v1417_v37 = vmul.f32 %v8080_v22, %v7513_v11  ;;  %v1240_v22 = vmul.f32 %v7860_v54, %v7513_v11  ;;  %v1697_v54 = vld [vmem:[%s9904_s4 + $0x30] sm:$0xff] }
 0x1ca   : > { %v8342_v4 = vpop.permute.xlu0 %1075 }
 0x1cb   : > { %v8344_v40 = vpop.permute.xlu1 %474 }
 0x1cc   : > { %1087 = vrot.lane.b32.xlu1 %v1064_v49, %s7426_s18  ;;  %1264 = vrot.lane.b32.xlu0 %v1241_v38, %s7427_s19 }
 0x1ce   : > { %v8356_v8 = vpop.permute.xlu0 %824 }
 0x1cf   : > { %v8352_v13 = vpop.permute.xlu1 %820 }
 0x1d0   : > { %1433 = vrot.lane.b32.xlu1 %v1414_v26, %s7428_s29  ;;  %1359 = vrot.lane.b32.xlu0 %v1337_v18, %s7428_s29 }
 0x1d2   : > { %v8371_v38 = vpop.permute.xlu0 %1170 }
 0x1d3   : > { %v8362_v49 = vpop.permute.xlu1 %476 }
 0x1d4   : > { %9955 = vst [vmem:[#allocation12_spill] sm:$0xff] %v8362_v49  ;;  %1355 = vrot.lane.b32.xlu1 %v1335_v29, %s7428_s29  ;;  %1439 = vrot.lane.b32.xlu0 %v1417_v37, %s7428_s29  ;;  %v1466_v29 = vld [vmem:[%s9902_s2 + $0x38] sm:$0xff]  ;;  %v1695_v37 = vld [vmem:[%s9904_s4 + $0x20] sm:$0xff] }
 0x1d5   : > { %v1696_v49 = vld [vmem:[%s9904_s4 + $0x28] sm:$0xff] }
 0x1d6   : > { %v8384_v53 = vpop.permute.xlu0 %826 }
 0x1d7   : > { %v8373_v26 = vpop.permute.xlu1 %822  ;;  %9957 = vst [vmem:[#allocation14_spill] sm:$0xff] %v8384_v53  ;;  %v1338_v53 = vmul.f32 %v8018_v9, %v7665_v45 }
 0x1d8   : > { %1357 = vrot.lane.b32.xlu1 %v1336_v43, %s7428_s29  ;;  %2187 = vperm.xlu0 %7381, %v1691_v27   ;;  %v1416_v43 = vmul.f32 %v7867_v44, %v7513_v11 }
 0x1db   : > { %v8381_v18 = vpop.permute.xlu1 %554 }
 0x1dc   : > { %9956 = vst [vmem:[#allocation13_spill] sm:$0xff] %v8381_v18  ;;  %1262 = vrot.lane.b32.xlu1 %v1240_v22, %s7427_s19  ;;  %2197 = vperm.xlu0 %7381, %v1693_v6   ;;  %v8399_v6 = vpop.permute.xlu0 %1172 }
 0x1df   : > { %v8392_v27 = vpop.permute.xlu1 %900 }
 0x1e0   : > { %1504 = vperm.xlu1 %7380, %v1466_v29   ;;  %2207 = vperm.xlu0 %7381, %v1695_v37   ;;  %v8409_v29 = vpop.permute.xlu0 %731  ;;  %v1418_v37 = vmul.f32 %v8089_v7, %v7513_v11 }
 0x1e1   : > { %9959 = vst [vmem:[#allocation16_spill] sm:$0xff] %v8409_v29 }
 0x1e3   : > { %v8401_v22 = vpop.permute.xlu1 %556 }
 0x1e4   : > { %9958 = vst [vmem:[#allocation15_spill] sm:$0xff] %v8401_v22  ;;  %1437 = vrot.lane.b32.xlu1 %v1416_v43, %s7428_s29  ;;  %2217 = vperm.xlu0 %7381, %v1697_v54   ;;  %v1692_v54 = vld [vmem:[%s9904_s4 + $0x8] sm:$0xff]  ;;  %v8419_v43 = vpop.permute.xlu0 %1077 }
 0x1e7   : > { %v8406_v60 = vpop.permute.xlu1 %902 }
 0x1e8   : > { %1361 = vrot.lane.b32.xlu1 %v1338_v53, %s7428_s29  ;;  %v1694_v53 = vld [vmem:[%s9904_s4 + $0x18] sm:$0xff] }
 0x1eb   : > { %v8413_v44 = vpop.permute.xlu1 %651 }
 0x1ec   : > { %9960 = vst [vmem:[#allocation17_spill] sm:$0xff] %v8413_v44  ;;  %1441 = vrot.lane.b32.xlu1 %v1418_v37, %s7428_s29  ;;  %v381_v37 = vmul.f32 %v7513_v11, %v8100_v50 }
 0x1ee   : > { %v389_v21 = vadd.f32 %v381_v37, %v329_v20 }
 0x1ef   : > { %v8421_v9 = vpop.permute.xlu1 %997 }
 0x1f0   : > { %2192 = vperm.xlu1 %7380, %v1692_v54  }
 0x1f3   : > { %v8426_v22 = vpop.permute.xlu1 %653  ;;  %v8428_v7 = vpop.permute.xlu0 %1474 }
 0x1f4   : > { %9961 = vst [vmem:[#allocation18_spill] sm:$0xff] %v8426_v22  ;;  %2202 = vperm.xlu1 %7380, %v1694_v53   ;;  %v1698_v22 = vld [vmem:[%s9904_s4 + $0x38] sm:$0xff]  ;;  %v9965_v53 = vld [vmem:[#allocation3_spill] sm:$0xff] }
 0x1f5   : > { %v486_v44 = vadd.f32 %v9965_v53, %v389_v21 }
 0x1f7   : > { %v8437_v54 = vpop.permute.xlu1 %999  ;;  %v8439_v29 = vpop.permute.xlu0 %1079  ;;  %v566_v14 = vadd.f32 %v8203_v16, %v486_v44 }
 0x1f8   : > { %9962 = vst [vmem:[#allocation19_spill] sm:$0xff] %v8437_v54  ;;  %9963 = vst [vmem:[#allocation20_spill] sm:$0xff] %v8439_v29  ;;  %2212 = vperm.xlu1 %7380, %v1696_v49  }
 0x1f9   : > { %v663_v29 = vadd.f32 %v8109_v15, %v566_v14 }
 0x1fb   : > { %v1470_v25 = vpop.permute.xlu1 %1469  ;;  %v8444_v50 = vpop.permute.xlu0 %828  ;;  %v743_v37 = vadd.f32 %v8138_v35, %v663_v29  ;;  %v382_v35 = vmul.f32 %v7513_v11, %v8107_v34  ;;  %v330_v29 = vmul.f32 %v7665_v45, %v8037_v3 }
 0x1fc   : > { %9964 = vst [vmem:[#allocation21_spill] sm:$0xff] %v8444_v50  ;;  %2222 = vperm.xlu1 %7380, %v1698_v22  }
 0x1fd   : > { %v840_v21 = vadd.f32 %v8294_v59, %v743_v37  ;;  %v390_v37 = vadd.f32 %v382_v35, %v330_v29 }
 0x1ff   : > { %v8448_v18 = vpop.permute.xlu1 %904  ;;  %v8450_v12 = vpop.permute.xlu0 %1174  ;;  %v920_v22 = vadd.f32 %v8325_v58, %v840_v21 }
 0x201   : > { %v1017_v53 = vadd.f32 %v8282_v28, %v920_v22 }
 0x203   : > { %v1251_v20 = vpop.permute.xlu1 %1250  ;;  %v8453_v49 = vpop.permute.xlu0 %830 }
 0x204   : > { %9966 = vst [vmem:[#allocation3_spill] sm:$0xff] %v8453_v49  ;;  %v1097_v49 = vadd.f32 %v8323_v39, %v1017_v53 }
 0x206   : > { %v1194_v21 = vadd.f32 %v8371_v38, %v1097_v49 }
 0x207   : > { %v8456_v10 = vpop.permute.xlu1 %733  ;;  %v8458_v54 = vpop.permute.xlu0 %1176 }
 0x208   : > { %9967 = vst [vmem:[#allocation22_spill] sm:$0xff] %v8456_v10  ;;  %v1274_v28 = vadd.f32 %v1251_v20, %v1194_v21 }
 0x20b   : > { %v8462_v16 = vpop.permute.xlu1 %906  ;;  %v8464_v44 = vpop.permute.xlu0 %1479 }
 0x20c   : > { %9968 = vst [vmem:[#allocation23_spill] sm:$0xff] %v8462_v16  ;;  %9969 = vst [vmem:[#allocation24_spill] sm:$0xff] %v8464_v44  ;;  %v487_v16 = vadd.f32 %v8171_v23, %v390_v37 }
 0x20e   : > { %v567_v34 = vadd.f32 %v8098_v55, %v487_v16  ;;  %v383_v55 = vmul.f32 %v7513_v11, %v8117_v62 }
 0x20f   : > { %v1253_v14 = vpop.permute.xlu1 %1252  ;;  %v8467_v15 = vpop.permute.xlu0 %1081 }
 0x210   : > { %9970 = vst [vmem:[#allocation25_spill] sm:$0xff] %v8467_v15  ;;  %v664_v53 = vadd.f32 %v8125_v56, %v567_v34 }
 0x212   : > { %v744_v20 = vadd.f32 %v8153_v48, %v664_v53 }
 0x213   : > { %v8474_v59 = vpop.permute.xlu1 %1001  ;;  %v1428_v58 = vpop.permute.xlu0 %1427 }
 0x217   : > { %v1348_v22 = vpop.permute.xlu1 %1347  ;;  %v8478_v10 = vpop.permute.xlu0 %910 }
 0x218   : > { %v1371_v50 = vadd.f32 %v1348_v22, %v1274_v28 }
 0x21a   : > { %v1451_v15 = vadd.f32 %v1428_v58, %v1371_v50  ;;  %v331_v50 = vmul.f32 %v7665_v45, %v8047_v36 }
 0x21b   : > { %v8481_v44 = vpop.permute.xlu1 %1003  ;;  %v8483_v3 = vpop.permute.xlu0 %1256 }
 0x21c   : > { %v1507_v39 = vadd.f32 %v1470_v25, %v1451_v15  ;;  %v841_v25 = vadd.f32 %v8201_v46, %v744_v20  ;;  %v391_v15 = vadd.f32 %v383_v55, %v331_v50 }
 0x21e   : > { %6197 = vmatprep.mubr.msk.f32.mxu0 %vm1531_vm3, %v1507_v39  ;;  %v921_v29 = vadd.f32 %v8251_v42, %v841_v25  ;;  %v488_v48 = vadd.f32 %v8219_v33, %v391_v15  ;;  %v384_v33 = vmul.f32 %v7513_v11, %v8127_v0 }
 0x21f   : > { %v1350_v38 = vpop.permute.xlu1 %1349  ;;  %v8487_v23 = vpop.permute.xlu0 %1005 }
 0x220   : > { %v1018_v58 = vadd.f32 %v8302_v47, %v921_v29  ;;  %v568_v62 = vadd.f32 %v8253_v32, %v488_v48  ;;  %v385_v47 = vmul.f32 %v7513_v11, %v8136_v24 }
 0x222   : > { %v1098_v36 = vadd.f32 %v8342_v4, %v1018_v58  ;;  %v665_v42 = vadd.f32 %v8169_v1, %v568_v62  ;;  %v332_v4 = vmul.f32 %v7665_v45, %v8057_v41  ;;  %v9971_v62 = vld [vmem:[#allocation2_spill] sm:$0xff] }
 0x223   : > { %v8490_v49 = vpop.permute.xlu1 %908  ;;  %v8492_v35 = vpop.permute.xlu0 %1351 }
 0x224   : > { %v1195_v46 = vadd.f32 %v8399_v6, %v1098_v36  ;;  %v333_v6 = vmul.f32 %v7665_v45, %v8071_v61  ;;  %v745_v20 = vadd.f32 %v8217_v5, %v665_v42 }
 0x226   : > { %v1275_v34 = vadd.f32 %v1253_v14, %v1195_v46  ;;  %v392_v14 = vadd.f32 %v384_v33, %v332_v4  ;;  %v393_v55 = vadd.f32 %v385_v47, %v333_v6  ;;  %v842_v0 = vadd.f32 %v8352_v13, %v745_v20 }
 0x227   : > { %v1255_v56 = vpop.permute.xlu1 %1254  ;;  %v8499_v16 = vpop.permute.xlu0 %1180 }
 0x228   : > { %v1372_v39 = vadd.f32 %v1350_v38, %v1275_v34  ;;  %v489_v38 = vadd.f32 %v8235_v30, %v392_v14  ;;  %v490_v25 = vadd.f32 %v8284_v2, %v393_v55  ;;  %v922_v15 = vadd.f32 %v8392_v27, %v842_v0  ;;  %v9972_v34 = vld [vmem:[#allocation19_spill] sm:$0xff]  ;;  %v9978_v0 = vld [vmem:[#allocation8_spill] sm:$0xff] }
 0x229   : > { %v335_v30 = vmul.f32 %v7665_v45, %v8155_v31 }
 0x22a   : > { %v569_v61 = vadd.f32 %v8267_v57, %v489_v38  ;;  %v570_v5 = vadd.f32 %v8314_v52, %v490_v25  ;;  %v1019_v29 = vadd.f32 %v8421_v9, %v922_v15  ;;  %v387_v52 = vmul.f32 %v7513_v11, %v9971_v62  ;;  %v9979_v15 = vld [vmem:[#allocation24_spill] sm:$0xff] }
 0x22b   : > { %v8504_v37 = vpop.permute.xlu1 %1484  ;;  %v8506_v21 = vpop.permute.xlu0 %1489 }
 0x22c   : > { %v667_v2 = vadd.f32 %v8265_v19, %v570_v5  ;;  %v1099_v48 = vadd.f32 %v8419_v43, %v1019_v29 }
 0x22e   : > { %v1196_v36 = vadd.f32 %v8450_v12, %v1099_v48  ;;  %v747_v46 = vadd.f32 %v8312_v63, %v667_v2  ;;  %v9982_v2 = vld [vmem:[#allocation16_spill] sm:$0xff]  ;;  %v9983_v48 = vld [vmem:[#allocation25_spill] sm:$0xff] }
 0x22f   : > { %v8511_v28 = vpop.permute.xlu1 %1083  ;;  %v8513_v22 = vpop.permute.xlu0 %1258 }
 0x230   : > { %v1276_v19 = vadd.f32 %v1255_v56, %v1196_v36  ;;  %v844_v43 = vadd.f32 %v8356_v8, %v747_v46  ;;  %v9977_v8 = vld [vmem:[#allocation20_spill] sm:$0xff] }
 0x232   : > { %v924_v4 = vadd.f32 %v8448_v18, %v844_v43  ;;  %v1373_v63 = vadd.f32 %v8492_v35, %v1276_v19 }
 0x233   : > { %v1430_v53 = vpop.permute.xlu1 %1429  ;;  %v8520_v32 = vpop.permute.xlu0 %1494 }
 0x234   : > { %v1452_v1 = vadd.f32 %v1430_v53, %v1372_v39  ;;  %v9973_v39 = vld [vmem:[#allocation6_spill] sm:$0xff]  ;;  %v9974_v53 = vld [vmem:[#allocation13_spill] sm:$0xff]  ;;  %v1021_v14 = vadd.f32 %v8474_v59, %v924_v4 }
 0x236   : > { %v1508_v50 = vadd.f32 %v8428_v7, %v1452_v1  ;;  %v666_v7 = vadd.f32 %v8304_v17, %v569_v61  ;;  %v395_v17 = vadd.f32 %v387_v52, %v335_v30  ;;  %v9980_v61 = vld [vmem:[#allocation4_spill] sm:$0xff]  ;;  %v1101_v62 = vadd.f32 %v9983_v48, %v1021_v14  ;;  %v9984_v52 = vld [vmem:[#allocation9_spill] sm:$0xff] }
 0x237   : > { %v1179_v24 = vpop.permute.xlu1 %1178  ;;  %v8532_v41 = vpop.permute.xlu0 %1260  ;;  %v388_v5 = vmul.f32 %v7513_v11, %v9980_v61 }
 0x238   : > { %6198 = vmatmul.mubr.msk.f32.vlgmr.msra.gmra.mrb[0].mxu0 %vm1531_vm3, %v1508_v50  ;;  %v746_v27 = vadd.f32 %v8334_v51, %v666_v7  ;;  %v492_v51 = vadd.f32 %v8344_v40, %v395_v17  ;;  %v9976_v40 = vld [vmem:[#allocation17_spill] sm:$0xff]  ;;  %v336_v50 = vmul.f32 %v7665_v45, %v9978_v0  ;;  %v9981_v7 = vld [vmem:[#allocation7_spill] sm:$0xff]  ;;  %v1198_v17 = vadd.f32 %v1179_v24, %v1101_v62  ;;  %v9990_v24 = vld [vmem:[#allocation14_spill] sm:$0xff] }
 0x23a   : > { %v843_v9 = vadd.f32 %v8373_v26, %v746_v27  ;;  %v386_v26 = vmul.f32 %v7513_v11, %v9973_v39  ;;  %v572_v12 = vadd.f32 %v9974_v53, %v492_v51  ;;  %v9986_v11 = vld [vmem:[#allocation10_spill] sm:$0xff]  ;;  %v9987_v51 = vld [vmem:[#allocation12_spill] sm:$0xff]  ;;  %v9988_v39 = vld [vmem:[#allocation11_spill] sm:$0xff] }
 0x23b   : > { %v8538_v13 = vpop.permute.xlu1 %1007  ;;  %v8546_v58 = vpop.permute.xlu0 %1182  ;;  %v9989_v53 = vld [vmem:[#allocation15_spill] sm:$0xff] }
 0x23c   : > { %v923_v31 = vadd.f32 %v8406_v60, %v843_v9  ;;  %v9975_v60 = vld [vmem:[#allocation5_spill] sm:$0xff]  ;;  %v669_v20 = vadd.f32 %v9976_v40, %v572_v12 }
 0x23d   : > { %v334_v56 = vmul.f32 %v7665_v45, %v9975_v60  ;;  %v396_v45 = vadd.f32 %v388_v5, %v336_v50  ;;  %v9985_v9 = vld [vmem:[#allocation21_spill] sm:$0xff] }
 0x23e   : > { %v1020_v33 = vadd.f32 %v9972_v34, %v923_v31  ;;  %v749_v27 = vadd.f32 %v9982_v2, %v669_v20 }
 0x23f   : > { %v1354_v57 = vpop.permute.xlu1 %1353  ;;  %v8557_v47 = vpop.permute.xlu0 %1184  ;;  %v394_v38 = vadd.f32 %v386_v26, %v334_v56  ;;  %v493_v43 = vadd.f32 %v9987_v51, %v396_v45  ;;  %v9991_v56 = vld [vmem:[#allocation18_spill] sm:$0xff] }
 0x240   : > { %v1100_v1 = vadd.f32 %v9977_v8, %v1020_v33  ;;  %v846_v36 = vadd.f32 %v9985_v9, %v749_v27 }
 0x241   : > { %v491_v30 = vadd.f32 %v9981_v7, %v394_v38  ;;  %v573_v12 = vadd.f32 %v9989_v53, %v493_v43  ;;  %v8656_v53 = vld [vmem:[%s9903_s3 + $0x88] sm:$0xff] }
 0x242   : > { %v1197_v25 = vadd.f32 %v8458_v54, %v1100_v1  ;;  %v926_v34 = vadd.f32 %v8490_v49, %v846_v36  ;;  %v9992_v49 = vld [vmem:[#allocation22_spill] sm:$0xff]  ;;  %v9993_v1 = vld [vmem:[#allocation23_spill] sm:$0xff] }
 0x243   : > { %v1086_v42 = vpop.permute.xlu1 %1085  ;;  %v1500_v18 = vpop.permute.xlu0 %1499  ;;  %v571_v54 = vadd.f32 %v9984_v52, %v491_v30 }
 0x244   : > { %v1277_v59 = vadd.f32 %v8483_v3, %v1197_v25  ;;  %v1023_v40 = vadd.f32 %v8487_v23, %v926_v34  ;;  %v9994_v25 = vld [vmem:[#allocation3_spill] sm:$0xff] }
 0x245   : > { %v668_v19 = vadd.f32 %v9986_v11, %v571_v54 }
 0x246   : > { %v1374_v46 = vadd.f32 %v1354_v57, %v1277_v59 }
 0x247   : > { %v1432_v6 = vpop.permute.xlu1 %1431  ;;  %v1436_v33 = vpop.permute.xlu0 %1435  ;;  %v748_v26 = vadd.f32 %v9988_v39, %v668_v19 }
 0x248   : > { %v1453_v55 = vadd.f32 %v1432_v6, %v1373_v63  ;;  %v1278_v63 = vadd.f32 %v8513_v22, %v1198_v17  ;;  %v670_v6 = vadd.f32 %v9991_v56, %v573_v12  ;;  %v8661_v12 = vld [vmem:[%s9903_s3 + $0x10] sm:$0xff]  ;;  %v8705_v56 = vld [vmem:[%s9903_s3 + $0x28] sm:$0xff] }
 0x249   : > { %v845_v57 = vadd.f32 %v9990_v24, %v748_v26  ;;  %v8651_v26 = vld [vmem:[%s9903_s3 + $0x8] sm:$0xff]  ;;  %v8689_v24 = vld [vmem:[%s9903_s3 + $0x20] sm:$0xff] }
 0x24a   : > { %v1509_v35 = vadd.f32 %v9979_v15, %v1453_v55  ;;  %v750_v8 = vadd.f32 %v9992_v49, %v670_v6  ;;  %v1103_v55 = vadd.f32 %v1086_v42, %v1023_v40  ;;  %v8710_v6 = vld [vmem:[%s9903_s3 + $0xa8] sm:$0xff]  ;;  %v8717_v40 = vld [vmem:[%s9903_s3 + $0x30] sm:$0xff]  ;;  %v8733_v49 = vld [vmem:[%s9903_s3 + $0x38] sm:$0xff] }
 0x24b   : > { %v1088_v29 = vpop.permute.xlu1 %1087  ;;  %v925_v14 = vadd.f32 %v9993_v1, %v845_v57  ;;  %v1265_v0 = vpop.permute.xlu0 %1264  ;;  %v8694_v57 = vld [vmem:[%s9903_s3 + $0xa0] sm:$0xff]  ;;  %9998 = vst [vmem:[#allocation13_spill] sm:$0xff] %v8710_v6 }
 0x24c   : > { %6200 = vmatprep.mubr.msk.f32.mxu0 %vm1531_vm3, %v1509_v35  ;;  %v847_v15 = vadd.f32 %v9994_v25, %v750_v8  ;;  %v1200_v23 = vadd.f32 %v8546_v58, %v1103_v55  ;;  %9997 = vst [vmem:[#allocation6_spill] sm:$0xff] %v8694_v57  ;;  %v8738_v8 = vld [vmem:[%s9903_s3 + $0xb8] sm:$0xff]  ;;  %v8745_v1 = vld [vmem:[%s9903_s3 + $0x40] sm:$0xff]  ;;  %v8761_v55 = vld [vmem:[%s9903_s3 + $0x50] sm:$0xff] }
 0x24d   : > { %v1022_v22 = vadd.f32 %v8481_v44, %v925_v14  ;;  %10000 = vst [vmem:[#allocation17_spill] sm:$0xff] %v8738_v8  ;;  %10001 = vst [vmem:[#allocation20_spill] sm:$0xff] %v8745_v1  ;;  %v8756_v14 = vld [vmem:[%s9903_s3 + $0x48] sm:$0xff] }
 0x24e   : > { %v927_v5 = vadd.f32 %v8478_v10, %v847_v15 }
 0x24f   : > { %v1434_v31 = vpop.permute.xlu1 %1433  ;;  %v1102_v35 = vadd.f32 %v8511_v28, %v1022_v22  ;;  %v1360_v7 = vpop.permute.xlu0 %1359  ;;  %v8791_v22 = vld [vmem:[%s9903_s3 + $0x70] sm:$0xff] }
 0x250   : > { %v1454_v3 = vadd.f32 %v1434_v31, %v1374_v46  ;;  %v1024_v2 = vadd.f32 %v8538_v13, %v927_v5 }
 0x251   : > { %v1199_v30 = vadd.f32 %v8499_v16, %v1102_v35 }
 0x252   : > { %v1510_v4 = vadd.f32 %v8504_v37, %v1454_v3  ;;  %v1104_v59 = vadd.f32 %v1088_v29, %v1024_v2 }
 0x253   : > { %v1356_v60 = vpop.permute.xlu1 %1355  ;;  %v1440_v48 = vpop.permute.xlu0 %1439 }
 0x254   : > { %v1375_v20 = vadd.f32 %v1356_v60, %v1278_v63  ;;  %6201 = vmatmul.mubr.msk.f32.gmra.mrb[2].mxu0 %vm1531_vm3, %v1510_v4  ;;  %v1201_v58 = vadd.f32 %v8557_v47, %v1104_v59  ;;  %v8613_v47 = vld [vmem:[%s9903_s3] sm:$0xff]  ;;  %v8666_v4 = vld [vmem:[%s9903_s3 + $0x90] sm:$0xff]  ;;  %v8677_v63 = vld [vmem:[%s9903_s3 + $0x18] sm:$0xff] }
 0x255   : > { %6225 = vmatprep.mubr.msk.f32.mxu1 %vm1699_vm4, %v8613_v47  ;;  %9995 = vst [vmem:[#allocation2_spill] sm:$0xff] %v8666_v4  ;;  %v8682_v60 = vld [vmem:[%s9903_s3 + $0x98] sm:$0xff] }
 0x256   : > { %v1455_v50 = vadd.f32 %v1436_v33, %v1375_v20  ;;  %v1281_v36 = vadd.f32 %v1265_v0, %v1201_v58  ;;  %9996 = vst [vmem:[#allocation19_spill] sm:$0xff] %v8682_v60  ;;  %v8722_v20 = vld [vmem:[%s9903_s3 + $0xb0] sm:$0xff]  ;;  %v8772_v0 = vld [vmem:[%s9903_s3 + $0x58] sm:$0xff] }
 0x257   : > { %v1358_v37 = vpop.permute.xlu1 %1357  ;;  %9999 = vst [vmem:[#allocation5_spill] sm:$0xff] %v8722_v20 }
 0x258   : > { %v1511_v38 = vadd.f32 %v8506_v21, %v1455_v50  ;;  %v1279_v21 = vadd.f32 %v8532_v41, %v1199_v30  ;;  %v8777_v50 = vld [vmem:[%s9903_s3 + $0x60] sm:$0xff] }
 0x25a   : > { %6203 = vmatprep.mubr.msk.f32.mxu0 %vm1531_vm3, %v1511_v38  ;;  %v1376_v28 = vadd.f32 %v1358_v37, %v1279_v21  ;;  %v8786_v37 = vld [vmem:[%s9903_s3 + $0x68] sm:$0xff]  ;;  %v8800_v38 = vld [vmem:[%s9903_s3 + $0x78] sm:$0xff] }
 0x25b   : > { %v1263_v61 = vpop.permute.xlu1 %1262 }
 0x25c   : > { %v1280_v42 = vadd.f32 %v1263_v61, %v1200_v23 }
 0x25e   : > { %v1377_v44 = vadd.f32 %v1360_v7, %v1280_v42 }
 0x25f   : > { %v1505_v27 = vpop.permute.xlu1 %1504 }
 0x260   : > { %v1457_v62 = vadd.f32 %v1440_v48, %v1377_v44 }
 0x262   : > { %v1513_v9 = vadd.f32 %v1500_v18, %v1457_v62 }
 0x263   : > { %v1438_v45 = vpop.permute.xlu1 %1437 }
 0x264   : > { %v1456_v52 = vadd.f32 %v1438_v45, %v1376_v28 }
 0x266   : > { %v1512_v10 = vadd.f32 %v8520_v32, %v1456_v52  ;;  %v8620_v32 = vld [vmem:[%s9903_s3 + $0x80] sm:$0xff] }
 0x267   : > { %v1362_v54 = vpop.permute.xlu1 %1361 }
 0x268   : > { %6204 = vmatmul.mubr.msk.f32.gmra.mrb[4].mxu0 %vm1531_vm3, %v1512_v10  ;;  %v1378_v16 = vadd.f32 %v1362_v54, %v1281_v36 }
 0x269   : > { %6206 = vmatprep.mubr.msk.f32.mxu0 %vm1531_vm3, %v1513_v9 }
 0x26b   : > { %v1442_v13 = vpop.permute.xlu1 %1441 }
 0x26c   : > { %v1458_v41 = vadd.f32 %v1442_v13, %v1378_v16  ;;  %v8828_v13 = vpop.permute.xlu0 %2187 }
 0x26e   : > { %v1514_v29 = vadd.f32 %v1505_v27, %v1458_v41 }
 0x26f   : > { %v8826_v16 = vpop.permute.xlu1 %2192 }
 0x270   : > { %6207 = vmatmul.mubr.msk.f32.gmra.mrb[6].mxu0 %vm1531_vm3, %v1514_v29  ;;  %v8832_v29 = vpop.permute.xlu0 %2197 }
 0x271   : > { %6281 = vmatprep.mubr.msk.f32.mxu0 %vm1699_vm4, %v8620_v32 }
 0x273   : > { %v8830_v41 = vpop.permute.xlu1 %2202 }
 0x30b   : > { %v8624_v18 = vpop.f32.mrb[0].mxu0 }
 0x30c   : > { %v8626_v17 = vpop.f32.mrb[1].mxu0 }
 0x30d   : > { %v6939_v46 = vpack.c.bf16 %v8624_v18, %v8626_v17 }
 0x30f   : > { %6940 = vmatprep.subr.bf16.mxu1 %v6939_v46  ;;  %6972 = vmatprep.subr.bf16.mxu0 %v6939_v46 }
 0x310   : > { %6942 = vmatpush3.bf16.msra.mxu1 %v6939_v46  ;;  %6974 = vmatpush3.bf16.msra.mxu0 %v6939_v46 }
 0x327   : > { %v8630_v31 = vpop.f32.mrb[2].mxu0 }
 0x328   : > { %v8632_v11 = vpop.f32.mrb[3].mxu0 }
 0x329   : > { %v6943_v19 = vpack.c.bf16 %v8630_v31, %v8632_v11 }
 0x32b   : > { %6944 = vmatprep.subr.bf16.mxu1 %v6943_v19  ;;  %6976 = vmatprep.subr.bf16.mxu0 %v6943_v19 }
 0x32c   : > { %6946 = vmatpush3.bf16.msra.mxu1 %v6943_v19  ;;  %6978 = vmatpush3.bf16.msra.mxu0 %v6943_v19 }
 0x33b   : > { %v8636_v51 = vpop.f32.mrb[4].mxu0 }
 0x33c   : > { %v8638_v43 = vpop.f32.mrb[5].mxu0 }
 0x33d   : > { %v6947_v34 = vpack.c.bf16 %v8636_v51, %v8638_v43 }
 0x33f   : > { %6948 = vmatprep.subr.bf16.mxu1 %v6947_v34  ;;  %6980 = vmatprep.subr.bf16.mxu0 %v6947_v34 }
 0x340   : > { %6950 = vmatpush3.bf16.msra.mxu1 %v6947_v34  ;;  %6982 = vmatpush3.bf16.msra.mxu0 %v6947_v34 }
 0x343   : > { %v8642_v33 = vpop.f32.mrb[6].mxu0 }
 0x344   : > { %v8644_v3 = vpop.f32.mrb[7].mxu0 }
 0x345   : > { %v6951_v39 = vpack.c.bf16 %v8642_v33, %v8644_v3 }
 0x347   : > { %6952 = vmatprep.subr.bf16.mxu1 %v6951_v39  ;;  %6984 = vmatprep.subr.bf16.mxu0 %v6951_v39 }
 0x348   : > { %6954 = vmatpush3.bf16.msra.mxu1 %v6951_v39  ;;  %6986 = vmatpush3.bf16.msra.mxu0 %v6951_v39 }
 0x349   : > { %6956 = vmatprep.subr.bf16.mxu1 %v6939_v46 }
 0x34b   : > { %6226 = vmatmul.mubr.msk.f32.vlgmr.msra.gmra.mrb[0].mxu1 %vm1699_vm4, %v8651_v26  ;;  %6282 = vmatmul.mubr.msk.f32.vlgmr.msra.gmra.mrb[8].mxu0 %vm1699_vm4, %v8656_v53 }
 0x34c   : > { %6958 = vmatpush3.bf16.msra.mxu1 %v6939_v46  ;;  %6228 = vmatprep.mubr.msk.f32.mxu1 %vm1699_vm4, %v8661_v12  ;;  %v8834_v46 = vpop.permute.xlu1 %2212 }
 0x34d   : > { %6960 = vmatprep.subr.bf16.mxu1 %v6943_v19  ;;  %6284 = vmatprep.mubr.msk.f32.mxu0 %vm1699_vm4, %v8666_v4 }
 0x34f   : > { %6229 = vmatmul.mubr.msk.f32.gmra.mrb[2].mxu1 %vm1699_vm4, %v8677_v63  ;;  %6285 = vmatmul.mubr.msk.f32.gmra.mrb[10].mxu0 %vm1699_vm4, %v8682_v60 }
 0x350   : > { %6962 = vmatpush3.bf16.msra.mxu1 %v6943_v19  ;;  %6231 = vmatprep.mubr.msk.f32.mxu1 %vm1699_vm4, %v8689_v24  ;;  %v8836_v19 = vpop.permute.xlu0 %2207 }
 0x351   : > { %6964 = vmatprep.subr.bf16.mxu1 %v6947_v34  ;;  %6287 = vmatprep.mubr.msk.f32.mxu0 %vm1699_vm4, %v8694_v57 }
 0x353   : > { %6232 = vmatmul.mubr.msk.f32.gmra.mrb[4].mxu1 %vm1699_vm4, %v8705_v56  ;;  %6288 = vmatmul.mubr.msk.f32.gmra.mrb[12].mxu0 %vm1699_vm4, %v8710_v6 }
 0x354   : > { %6966 = vmatpush3.bf16.msra.mxu1 %v6947_v34  ;;  %6234 = vmatprep.mubr.msk.f32.mxu1 %vm1699_vm4, %v8717_v40  ;;  %v8838_v34 = vpop.permute.xlu1 %2222 }
 0x355   : > { %6968 = vmatprep.subr.bf16.mxu1 %v6951_v39  ;;  %6290 = vmatprep.mubr.msk.f32.mxu0 %vm1699_vm4, %v8722_v20 }
 0x357   : > { %6235 = vmatmul.mubr.msk.f32.gmra.mrb[6].mxu1 %vm1699_vm4, %v8733_v49  ;;  %6291 = vmatmul.mubr.msk.f32.gmra.mrb[14].mxu0 %vm1699_vm4, %v8738_v8 }
 0x358   : > { %6970 = vmatpush3.bf16.msra.mxu1 %v6951_v39  ;;  %6253 = vmatprep.mubr.msk.f32.mxu1 %vm1699_vm4, %v8745_v1  ;;  %v8840_v39 = vpop.permute.xlu0 %2217 }
 0x359   : > { %6337 = vmatprep.mubr.msk.f32.mxu0 %vm1699_vm4, %v8745_v1 }
 0x35b   : > { %6254 = vmatmul.mubr.msk.f32.vlgmr.msra.gmra.mrb[8].mxu1 %vm1699_vm4, %v8756_v14 }
 0x35c   : > { %6256 = vmatprep.mubr.msk.f32.mxu1 %vm1699_vm4, %v8761_v55 }
 0x35f   : > { %6257 = vmatmul.mubr.msk.f32.gmra.mrb[10].mxu1 %vm1699_vm4, %v8772_v0 }
 0x360   : > { %6259 = vmatprep.mubr.msk.f32.mxu1 %vm1699_vm4, %v8777_v50 }
 0x363   : > { %6260 = vmatmul.mubr.msk.f32.gmra.mrb[12].mxu1 %vm1699_vm4, %v8786_v37 }
 0x364   : > { %6262 = vmatprep.mubr.msk.f32.mxu1 %vm1699_vm4, %v8791_v22 }
 0x367   : > { %6263 = vmatmul.mubr.msk.f32.gmra.mrb[14].mxu1 %vm1699_vm4, %v8800_v38 }
 0x368   : > { %6309 = vmatprep.mubr.msk.f32.mxu1 %vm1699_vm4, %v8613_v47 }
 0x41e   : > { %v6227_v25 = vpop.f32.mrb[0].mxu1  ;;  %v6283_v15 = vpop.f32.mrb[8].mxu0 }
 0x41f   : > { %2097 = vrot.lane.b32.xlu1 %v6227_v25, %s7430_s22  ;;  %v1790_v35 = vpop.f32.mrb[1].mxu1  ;;  %v2048_v23 = vpop.f32.mrb[9].mxu0 }
 0x420   : > { %2095 = vrot.lane.b32.xlu0 %v1790_v35, %s7430_s22 }
 0x422   : > { %v6230_v61 = vpop.f32.mrb[2].mxu1  ;;  %v6286_v5 = vpop.f32.mrb[10].mxu0 }
 0x423   : > { %2138 = vrot.lane.b32.xlu1 %v6283_v15, %s7423_s20  ;;  %v1800_v7 = vpop.f32.mrb[3].mxu1  ;;  %v2058_v42 = vpop.f32.mrb[11].mxu0 }
 0x424   : > { %2136 = vrot.lane.b32.xlu0 %v2048_v23, %s7423_s20 }
 0x426   : > { %v6233_v30 = vpop.f32.mrb[4].mxu1  ;;  %v6289_v2 = vpop.f32.mrb[12].mxu0 }
 0x427   : > { %2101 = vrot.lane.b32.xlu1 %v6230_v61, %s7430_s22  ;;  %v1810_v44 = vpop.f32.mrb[5].mxu1  ;;  %v2068_v27 = vpop.f32.mrb[13].mxu0 }
 0x428   : > { %2099 = vrot.lane.b32.xlu0 %v1800_v7, %s7430_s22 }
 0x42a   : > { %v6236_v21 = vpop.f32.mrb[6].mxu1  ;;  %v6292_v59 = vpop.f32.mrb[14].mxu0 }
 0x42b   : > { %2142 = vrot.lane.b32.xlu1 %v6286_v5, %s7423_s20  ;;  %v1820_v48 = vpop.f32.mrb[7].mxu1  ;;  %v2078_v28 = vpop.f32.mrb[15].mxu0 }
 0x42c   : > { %2140 = vrot.lane.b32.xlu0 %v2058_v42, %s7423_s20 }
 0x42e   : > { %v6255_v62 = vpop.f32.mrb[8].mxu1 }
 0x42f   : > { %2105 = vrot.lane.b32.xlu1 %v6233_v30, %s7430_s22  ;;  %v1919_v45 = vpop.f32.mrb[9].mxu1 }
 0x430   : > { %2103 = vrot.lane.b32.xlu0 %v1810_v44, %s7430_s22 }
 0x432   : > { %v6258_v58 = vpop.f32.mrb[10].mxu1 }
 0x433   : > { %2146 = vrot.lane.b32.xlu1 %v6289_v2, %s7423_s20  ;;  %v1929_v52 = vpop.f32.mrb[11].mxu1 }
 0x434   : > { %2144 = vrot.lane.b32.xlu0 %v2068_v27, %s7423_s20 }
 0x436   : > { %v6261_v10 = vpop.f32.mrb[12].mxu1 }
 0x437   : > { %2109 = vrot.lane.b32.xlu1 %v6236_v21, %s7430_s22  ;;  %v1939_v54 = vpop.f32.mrb[13].mxu1 }
 0x438   : > { %2107 = vrot.lane.b32.xlu0 %v1820_v48, %s7430_s22 }
 0x43a   : > { %v8820_v9 = vpop.f32.mrb[14].mxu1 }
 0x43b   : > { %2150 = vrot.lane.b32.xlu1 %v6292_v59, %s7423_s20  ;;  %v8823_v36 = vpop.f32.mrb[15].mxu1 }
 0x43c   : > { %2148 = vrot.lane.b32.xlu0 %v2078_v28, %s7423_s20 }
 0x491   : > { %v2098_v25 = vpop.permute.xlu1 %2097 }
 0x492   : > { %v2096_v15 = vpop.permute.xlu0 %2095  ;;  %v2121_v35 = vsel %vm2119_vm5, 0.0, %v2098_v25 }
 0x493   : > { %v2120_v23 = vsel %vm2119_vm5, 0.0, %v2096_v15  ;;  %v2170_v61 = vadd.f32 %v6255_v62, %v2121_v35 }
 0x494   : > { %v2169_v7 = vadd.f32 %v2120_v23, %v1919_v45 }
 0x495   : > { %v2139_v5 = vpop.permute.xlu1 %2138 }
 0x496   : > { %v2162_v42 = vsel %vm2160_vm6, %v2139_v5, 0.0  ;;  %v2137_v30 = vpop.permute.xlu0 %2136 }
 0x497   : > { %v2178_v2 = vadd.f32 %v2170_v61, %v2162_v42  ;;  %v2161_v44 = vsel %vm2160_vm6, %v2137_v30, 0.0 }
 0x498   : > { %v2177_v27 = vadd.f32 %v2169_v7, %v2161_v44 }
 0x499   : > { %v2226_v21 = vadd.f32 %v8826_v16, %v2178_v2  ;;  %v2102_v59 = vpop.permute.xlu1 %2101 }
 0x49a   : > { %v2225_v48 = vadd.f32 %v8828_v13, %v2177_v27  ;;  %v2100_v28 = vpop.permute.xlu0 %2099  ;;  %v2123_v25 = vsel %vm2119_vm5, 0.0, %v2102_v59 }
 0x49b   : > { %v2234_v15 = vmax.f32 %v2226_v21, 0.0  ;;  %v2122_v62 = vsel %vm2119_vm5, 0.0, %v2100_v28  ;;  %v2172_v45 = vadd.f32 %v6258_v58, %v2123_v25 }
 0x49c   : > { %v2233_v35 = vmax.f32 %v2225_v48, 0.0  ;;  %v2171_v61 = vadd.f32 %v2122_v62, %v1929_v52 }
 0x49d   : > { %v2143_v23 = vpop.permute.xlu1 %2142 }
 0x49e   : > { %v8850_v5 = vpack.c.bf16 %v2234_v15, %v2233_v35  ;;  %v2164_v42 = vsel %vm2160_vm6, %v2143_v23, 0.0  ;;  %v2141_v7 = vpop.permute.xlu0 %2140 }
 0x49f   : > { %v2180_v30 = vadd.f32 %v2172_v45, %v2164_v42  ;;  %v2163_v2 = vsel %vm2160_vm6, %v2141_v7, 0.0 }
 0x4a0   : > { %v2179_v44 = vadd.f32 %v2171_v61, %v2163_v2  ;;  %6988 = vmatprep.subr.bf16.mxu1 %v8850_v5  ;;  %7004 = vmatprep.subr.bf16.mxu0 %v8850_v5 }
 0x4a1   : > { %v2228_v27 = vadd.f32 %v8830_v41, %v2180_v30  ;;  %v2106_v21 = vpop.permute.xlu1 %2105  ;;  %6990 = vmatpush3.bf16.msra.mxu1 %v8850_v5  ;;  %7006 = vmatpush3.bf16.msra.mxu0 %v8850_v5 }
 0x4a2   : > { %v2227_v58 = vadd.f32 %v8832_v29, %v2179_v44  ;;  %v2104_v52 = vpop.permute.xlu0 %2103  ;;  %v2125_v59 = vsel %vm2119_vm5, 0.0, %v2106_v21 }
 0x4a3   : > { %v2236_v48 = vmax.f32 %v2228_v27, 0.0  ;;  %v2124_v28 = vsel %vm2119_vm5, 0.0, %v2104_v52  ;;  %v2174_v15 = vadd.f32 %v6261_v10, %v2125_v59 }
 0x4a4   : > { %v2235_v25 = vmax.f32 %v2227_v58, 0.0  ;;  %v2173_v45 = vadd.f32 %v2124_v28, %v1939_v54 }
 0x4a5   : > { %v2147_v62 = vpop.permute.xlu1 %2146 }
 0x4a6   : > { %v6991_v35 = vpack.c.bf16 %v2236_v48, %v2235_v25  ;;  %v2166_v23 = vsel %vm2160_vm6, %v2147_v62, 0.0  ;;  %v2145_v61 = vpop.permute.xlu0 %2144 }
 0x4a7   : > { %v2182_v42 = vadd.f32 %v2174_v15, %v2166_v23  ;;  %v2165_v7 = vsel %vm2160_vm6, %v2145_v61, 0.0 }
 0x4a8   : > { %v2181_v30 = vadd.f32 %v2173_v45, %v2165_v7  ;;  %6992 = vmatprep.subr.bf16.mxu1 %v6991_v35  ;;  %7008 = vmatprep.subr.bf16.mxu0 %v6991_v35 }
 0x4a9   : > { %v2230_v2 = vadd.f32 %v8834_v46, %v2182_v42  ;;  %v2110_v44 = vpop.permute.xlu1 %2109  ;;  %6994 = vmatpush3.bf16.msra.mxu1 %v6991_v35  ;;  %7010 = vmatpush3.bf16.msra.mxu0 %v6991_v35 }
 0x4aa   : > { %v2229_v27 = vadd.f32 %v8836_v19, %v2181_v30  ;;  %v2108_v10 = vpop.permute.xlu0 %2107  ;;  %v2127_v21 = vsel %vm2119_vm5, 0.0, %v2110_v44 }
 0x4ab   : > { %v2238_v54 = vmax.f32 %v2230_v2, 0.0  ;;  %v2126_v58 = vsel %vm2119_vm5, 0.0, %v2108_v10  ;;  %v2176_v59 = vadd.f32 %v8820_v9, %v2127_v21 }
 0x4ac   : > { %v2237_v52 = vmax.f32 %v2229_v27, 0.0  ;;  %v2175_v25 = vadd.f32 %v2126_v58, %v8823_v36 }
 0x4ad   : > { %v2151_v48 = vpop.permute.xlu1 %2150 }
 0x4ae   : > { %v6995_v28 = vpack.c.bf16 %v2238_v54, %v2237_v52  ;;  %v2168_v15 = vsel %vm2160_vm6, %v2151_v48, 0.0  ;;  %v2149_v62 = vpop.permute.xlu0 %2148 }
 0x4af   : > { %v2184_v45 = vadd.f32 %v2176_v59, %v2168_v15  ;;  %v2167_v23 = vsel %vm2160_vm6, %v2149_v62, 0.0 }
 0x4b0   : > { %v2183_v61 = vadd.f32 %v2175_v25, %v2167_v23  ;;  %6996 = vmatprep.subr.bf16.mxu1 %v6995_v28  ;;  %7012 = vmatprep.subr.bf16.mxu0 %v6995_v28 }
 0x4b1   : > { %v2232_v42 = vadd.f32 %v8838_v34, %v2184_v45  ;;  %6998 = vmatpush3.bf16.msra.mxu1 %v6995_v28  ;;  %7014 = vmatpush3.bf16.msra.mxu0 %v6995_v28 }
 0x4b2   : > { %v2231_v7 = vadd.f32 %v8840_v39, %v2183_v61 }
 0x4b3   : > { %v2240_v9 = vmax.f32 %v2232_v42, 0.0 }
 0x4b4   : > { %v2239_v30 = vmax.f32 %v2231_v7, 0.0 }
 0x4b6   : > { %v6999_v2 = vpack.c.bf16 %v2240_v9, %v2239_v30 }
 0x4b8   : > { %7000 = vmatprep.subr.bf16.mxu1 %v6999_v2  ;;  %7016 = vmatprep.subr.bf16.mxu0 %v6999_v2 }
 0x4b9   : > { %7002 = vmatpush3.bf16.msra.mxu1 %v6999_v2  ;;  %7018 = vmatpush3.bf16.msra.mxu0 %v6999_v2 }
 0x4ba   : > { %7020 = vmatprep.subr.bf16.mxu1 %v8850_v5 }
 0x4bc   : > { %6310 = vmatmul.mubr.msk.f32.vlgmr.msra.gmra.mrb[16].mxu1 %vm1699_vm4, %v8651_v26  ;;  %6338 = vmatmul.mubr.msk.f32.vlgmr.msra.gmra.mrb[16].mxu0 %vm1699_vm4, %v8756_v14 }
 0x4bd   : > { %7022 = vmatpush3.bf16.msra.mxu1 %v8850_v5  ;;  %6312 = vmatprep.mubr.msk.f32.mxu1 %vm1699_vm4, %v8661_v12 }
 0x4be   : > { %7024 = vmatprep.subr.bf16.mxu1 %v6991_v35  ;;  %6340 = vmatprep.mubr.msk.f32.mxu0 %vm1699_vm4, %v8761_v55 }
 0x4c0   : > { %6313 = vmatmul.mubr.msk.f32.gmra.mrb[18].mxu1 %vm1699_vm4, %v8677_v63  ;;  %6341 = vmatmul.mubr.msk.f32.gmra.mrb[18].mxu0 %vm1699_vm4, %v8772_v0 }
 0x4c1   : > { %7026 = vmatpush3.bf16.msra.mxu1 %v6991_v35  ;;  %6315 = vmatprep.mubr.msk.f32.mxu1 %vm1699_vm4, %v8689_v24 }
 0x4c2   : > { %7028 = vmatprep.subr.bf16.mxu1 %v6995_v28  ;;  %6343 = vmatprep.mubr.msk.f32.mxu0 %vm1699_vm4, %v8777_v50 }
 0x4c4   : > { %6316 = vmatmul.mubr.msk.f32.gmra.mrb[20].mxu1 %vm1699_vm4, %v8705_v56  ;;  %6344 = vmatmul.mubr.msk.f32.gmra.mrb[20].mxu0 %vm1699_vm4, %v8786_v37 }
 0x4c5   : > { %7030 = vmatpush3.bf16.msra.mxu1 %v6995_v28  ;;  %6318 = vmatprep.mubr.msk.f32.mxu1 %vm1699_vm4, %v8717_v40 }
 0x4c6   : > { %7032 = vmatprep.subr.bf16.mxu1 %v6999_v2  ;;  %6346 = vmatprep.mubr.msk.f32.mxu0 %vm1699_vm4, %v8791_v22 }
 0x4c8   : > { %6319 = vmatmul.mubr.msk.f32.gmra.mrb[22].mxu1 %vm1699_vm4, %v8733_v49  ;;  %6347 = vmatmul.mubr.msk.f32.gmra.mrb[22].mxu0 %vm1699_vm4, %v8800_v38 }
 0x4c9   : > { %7034 = vmatpush3.bf16.msra.mxu1 %v6999_v2  ;;  %6365 = vmatprep.mubr.msk.f32.mxu1 %vm1699_vm4, %v8620_v32 }
 0x4ca   : > { %6393 = vmatprep.mubr.msk.f32.mxu0 %vm1699_vm4, %v8613_v47 }
 0x4cc   : > { %6366 = vmatmul.mubr.msk.f32.vlgmr.msra.gmra.mrb[24].mxu1 %vm1699_vm4, %v8656_v53 }
 0x4cd   : > { %6368 = vmatprep.mubr.msk.f32.mxu1 %vm1699_vm4, %v8666_v4 }
 0x4d0   : > { %6369 = vmatmul.mubr.msk.f32.gmra.mrb[26].mxu1 %vm1699_vm4, %v8682_v60 }
 0x4d1   : > { %6371 = vmatprep.mubr.msk.f32.mxu1 %vm1699_vm4, %v8694_v57 }
 0x4d4   : > { %6372 = vmatmul.mubr.msk.f32.gmra.mrb[28].mxu1 %vm1699_vm4, %v8710_v6 }
 0x4d5   : > { %6374 = vmatprep.mubr.msk.f32.mxu1 %vm1699_vm4, %v8722_v20 }
 0x4d8   : > { %6375 = vmatmul.mubr.msk.f32.gmra.mrb[30].mxu1 %vm1699_vm4, %v8738_v8 }
 0x4d9   : > { %6421 = vmatprep.mubr.msk.f32.mxu1 %vm1699_vm4, %v8745_v1 }
 0x58f   : > { %v6311_v36 = vpop.f32.mrb[16].mxu1  ;;  %v6339_v5 = vpop.f32.mrb[16].mxu0 }
 0x590   : > { %2566 = vrot.lane.b32.xlu1 %v6311_v36, %s7430_s22  ;;  %v2307_v35 = vpop.f32.mrb[17].mxu1  ;;  %v2412_v44 = vpop.f32.mrb[17].mxu0 }
 0x591   : > { %2564 = vrot.lane.b32.xlu0 %v2307_v35, %s7430_s22 }
 0x593   : > { %v6314_v27 = vpop.f32.mrb[18].mxu1  ;;  %v6342_v10 = vpop.f32.mrb[18].mxu0 }
 0x594   : > { %2570 = vrot.lane.b32.xlu1 %v6314_v27, %s7430_s22  ;;  %v2317_v21 = vpop.f32.mrb[19].mxu1  ;;  %v2422_v54 = vpop.f32.mrb[19].mxu0 }
 0x595   : > { %2568 = vrot.lane.b32.xlu0 %v2317_v21, %s7430_s22 }
 0x597   : > { %v6317_v58 = vpop.f32.mrb[20].mxu1  ;;  %v6345_v52 = vpop.f32.mrb[20].mxu0 }
 0x598   : > { %2574 = vrot.lane.b32.xlu1 %v6317_v58, %s7430_s22  ;;  %v2327_v59 = vpop.f32.mrb[21].mxu1  ;;  %v2432_v48 = vpop.f32.mrb[21].mxu0 }
 0x599   : > { %2572 = vrot.lane.b32.xlu0 %v2327_v59, %s7430_s22 }
 0x59b   : > { %v6320_v28 = vpop.f32.mrb[22].mxu1  ;;  %v8930_v25 = vpop.f32.mrb[22].mxu0 }
 0x59c   : > { %2578 = vrot.lane.b32.xlu1 %v6320_v28, %s7430_s22  ;;  %v2337_v15 = vpop.f32.mrb[23].mxu1  ;;  %v8933_v62 = vpop.f32.mrb[23].mxu0 }
 0x59d   : > { %2576 = vrot.lane.b32.xlu0 %v2337_v15, %s7430_s22 }
 0x59f   : > { %v6367_v45 = vpop.f32.mrb[24].mxu1 }
 0x5a0   : > { %2606 = vrot.lane.b32.xlu1 %v6367_v45, %s7423_s20  ;;  %v2517_v23 = vpop.f32.mrb[25].mxu1 }
 0x5a1   : > { %2604 = vrot.lane.b32.xlu0 %v2517_v23, %s7423_s20 }
 0x5a3   : > { %v6370_v61 = vpop.f32.mrb[26].mxu1 }
 0x5a4   : > { %2610 = vrot.lane.b32.xlu1 %v6370_v61, %s7423_s20  ;;  %v2527_v42 = vpop.f32.mrb[27].mxu1 }
 0x5a5   : > { %2608 = vrot.lane.b32.xlu0 %v2527_v42, %s7423_s20 }
 0x5a7   : > { %v6373_v7 = vpop.f32.mrb[28].mxu1 }
 0x5a8   : > { %2614 = vrot.lane.b32.xlu1 %v6373_v7, %s7423_s20  ;;  %v2537_v9 = vpop.f32.mrb[29].mxu1 }
 0x5a9   : > { %2612 = vrot.lane.b32.xlu0 %v2537_v9, %s7423_s20 }
 0x5ab   : > { %v6376_v30 = vpop.f32.mrb[30].mxu1 }
 0x5ac   : > { %2618 = vrot.lane.b32.xlu1 %v6376_v30, %s7423_s20  ;;  %v2547_v2 = vpop.f32.mrb[31].mxu1 }
 0x5ad   : > { %2616 = vrot.lane.b32.xlu0 %v2547_v2, %s7423_s20 }
 0x602   : > { %v2567_v36 = vpop.permute.xlu1 %2566 }
 0x603   : > { %v2565_v35 = vpop.permute.xlu0 %2564  ;;  %v2589_v15 = vsel %vm2119_vm5, 0.0, %v2567_v36 }
 0x604   : > { %v2588_v23 = vsel %vm2119_vm5, 0.0, %v2565_v35  ;;  %v2637_v61 = vadd.f32 %v6339_v5, %v2589_v15 }
 0x605   : > { %v2636_v7 = vadd.f32 %v2588_v23, %v2412_v44 }
 0x606   : > { %v2571_v27 = vpop.permute.xlu1 %2570 }
 0x607   : > { %v2569_v21 = vpop.permute.xlu0 %2568  ;;  %v2591_v9 = vsel %vm2119_vm5, 0.0, %v2571_v27 }
 0x608   : > { %v2590_v30 = vsel %vm2119_vm5, 0.0, %v2569_v21  ;;  %v2639_v57 = vadd.f32 %v6342_v10, %v2591_v9 }
 0x609   : > { %v2638_v60 = vadd.f32 %v2590_v30, %v2422_v54 }
 0x60a   : > { %v2575_v58 = vpop.permute.xlu1 %2574 }
 0x60b   : > { %v2573_v59 = vpop.permute.xlu0 %2572  ;;  %v2593_v5 = vsel %vm2119_vm5, 0.0, %v2575_v58 }
 0x60c   : > { %v2592_v44 = vsel %vm2119_vm5, 0.0, %v2573_v59  ;;  %v2641_v10 = vadd.f32 %v6345_v52, %v2593_v5 }
 0x60d   : > { %v2640_v54 = vadd.f32 %v2592_v44, %v2432_v48 }
 0x60e   : > { %v2579_v28 = vpop.permute.xlu1 %2578 }
 0x60f   : > { %v2577_v45 = vpop.permute.xlu0 %2576 }
 0x612   : > { %v2607_v42 = vpop.permute.xlu1 %2606 }
 0x613   : > { %v2629_v2 = vsel %vm2160_vm6, %v2607_v42, 0.0  ;;  %v2605_v1 = vpop.permute.xlu0 %2604 }
 0x614   : > { %v2645_v8 = vadd.f32 %v2637_v61, %v2629_v2  ;;  %v2628_v20 = vsel %vm2160_vm6, %v2605_v1, 0.0 }
 0x615   : > { %v2644_v6 = vadd.f32 %v2636_v7, %v2628_v20 }
 0x616   : > { %v2653_v36 = vadd.f32 %v2645_v8, %v8826_v16  ;;  %v2611_v4 = vpop.permute.xlu1 %2610 }
 0x617   : > { %v2652_v35 = vadd.f32 %v2644_v6, %v8828_v13  ;;  %v2631_v27 = vsel %vm2160_vm6, %v2611_v4, 0.0  ;;  %v2609_v21 = vpop.permute.xlu0 %2608  ;;  %v2595_v4 = vsel %vm2119_vm5, 0.0, %v2579_v28 }
 0x618   : > { %v8956_v15 = vadd.f32 %v8624_v18, %v2653_v36  ;;  %v2647_v23 = vadd.f32 %v2639_v57, %v2631_v27  ;;  %v2630_v20 = vsel %vm2160_vm6, %v2609_v21, 0.0  ;;  %v2643_v30 = vadd.f32 %v8930_v25, %v2595_v4 }
 0x619   : > { %v8960_v1 = vadd.f32 %v2652_v35, %v8626_v17  ;;  %v2646_v8 = vadd.f32 %v2638_v60, %v2630_v20  ;;  %v2594_v17 = vsel %vm2119_vm5, 0.0, %v2577_v45 }
 0x61a   : > { %v2669_v58 = vmax.f32 %v8956_v15, 0.0  ;;  %v2655_v59 = vadd.f32 %v2647_v23, %v8830_v41  ;;  %v2615_v6 = vpop.permute.xlu1 %2614  ;;  %v2642_v36 = vadd.f32 %v2594_v17, %v8933_v62  ;;  %v10005_v17 = vld [vmem:[#allocation13_spill] sm:$0xff] }
 0x61b   : > { %v9923_v61 = vmax.f32 %v8960_v1, 0.0  ;;  %v2654_v18 = vadd.f32 %v2646_v8, %v8832_v29  ;;  %v2633_v57 = vsel %vm2160_vm6, %v2615_v6, 0.0  ;;  %v2613_v42 = vpop.permute.xlu0 %2612 }
 0x61c   : > { %v8970_v60 = vadd.f32 %v8630_v31, %v2655_v59  ;;  %v2649_v52 = vadd.f32 %v2641_v10, %v2633_v57  ;;  %v2632_v48 = vsel %vm2160_vm6, %v2613_v42, 0.0  ;;  %v10003_v57 = vld [vmem:[#allocation19_spill] sm:$0xff]  ;;  %v10004_v42 = vld [vmem:[#allocation6_spill] sm:$0xff] }
 0x61d   : > { %v7035_v28 = vpack.c.bf16 %v2669_v58, %v9923_v61  ;;  %v8978_v7 = vadd.f32 %v2654_v18, %v8632_v11  ;;  %v2648_v9 = vadd.f32 %v2640_v54, %v2632_v48 }
 0x61e   : > { %v9922_v2 = vmax.f32 %v8970_v60, 0.0  ;;  %v2657_v45 = vadd.f32 %v2649_v52, %v8834_v46  ;;  %v2619_v31 = vpop.permute.xlu1 %2618  ;;  %v10006_v52 = vld [vmem:[#allocation5_spill] sm:$0xff] }
 0x61f   : > { %v9921_v5 = vmax.f32 %v8978_v7, 0.0  ;;  %v2656_v44 = vadd.f32 %v2648_v9, %v8836_v19  ;;  %v2635_v35 = vsel %vm2160_vm6, %v2619_v31, 0.0  ;;  %7036 = vmatprep.subr.bf16.mxu0 %v7035_v28  ;;  %7052 = vmatprep.subr.bf16.mxu1 %v7035_v28  ;;  %v2617_v11 = vpop.permute.xlu0 %2616 }
 0x620   : > { %v8988_v27 = vadd.f32 %v8636_v51, %v2657_v45  ;;  %v2651_v25 = vadd.f32 %v2643_v30, %v2635_v35  ;;  %v2634_v21 = vsel %vm2160_vm6, %v2617_v11, 0.0  ;;  %7038 = vmatpush3.bf16.msra.mxu0 %v7035_v28  ;;  %7054 = vmatpush3.bf16.msra.mxu1 %v7035_v28 }
 0x621   : > { %v7039_v62 = vpack.c.bf16 %v9922_v2, %v9921_v5  ;;  %v8996_v23 = vadd.f32 %v2656_v44, %v8638_v43  ;;  %v2650_v20 = vadd.f32 %v2642_v36, %v2634_v21 }
 0x622   : > { %v9920_v8 = vmax.f32 %v8988_v27, 0.0  ;;  %v2659_v10 = vadd.f32 %v2651_v25, %v8838_v34 }
 0x623   : > { %v9919_v51 = vmax.f32 %v8996_v23, 0.0  ;;  %v2658_v54 = vadd.f32 %v2650_v20, %v8840_v39  ;;  %7040 = vmatprep.subr.bf16.mxu0 %v7039_v62  ;;  %7056 = vmatprep.subr.bf16.mxu1 %v7039_v62 }
 0x624   : > { %v9003_v59 = vadd.f32 %v8642_v33, %v2659_v10  ;;  %7042 = vmatpush3.bf16.msra.mxu0 %v7039_v62  ;;  %7058 = vmatpush3.bf16.msra.mxu1 %v7039_v62 }
 0x625   : > { %v7043_v43 = vpack.c.bf16 %v9920_v8, %v9919_v51  ;;  %v9010_v6 = vadd.f32 %v2658_v54, %v8644_v3  ;;  %v10002_v3 = vld [vmem:[#allocation2_spill] sm:$0xff] }
 0x626   : > { %v9918_v4 = vmax.f32 %v9003_v59, 0.0 }
 0x627   : > { %v9917_v18 = vmax.f32 %v9010_v6, 0.0  ;;  %7044 = vmatprep.subr.bf16.mxu0 %v7043_v43  ;;  %7060 = vmatprep.subr.bf16.mxu1 %v7043_v43 }
 0x628   : > { %7046 = vmatpush3.bf16.msra.mxu0 %v7043_v43  ;;  %7062 = vmatpush3.bf16.msra.mxu1 %v7043_v43 }
 0x629   : > { %v7047_v33 = vpack.c.bf16 %v9918_v4, %v9917_v18 }
 0x62b   : > { %7048 = vmatprep.subr.bf16.mxu0 %v7047_v33  ;;  %7064 = vmatprep.subr.bf16.mxu1 %v7047_v33 }
 0x62c   : > { %7050 = vmatpush3.bf16.msra.mxu0 %v7047_v33  ;;  %7066 = vmatpush3.bf16.msra.mxu1 %v7047_v33 }
 0x62d   : > { %7068 = vmatprep.subr.bf16.mxu0 %v7035_v28 }
 0x62f   : > { %6394 = vmatmul.mubr.msk.f32.vlgmr.msra.gmra.mrb[24].mxu0 %vm1699_vm4, %v8651_v26  ;;  %6422 = vmatmul.mubr.msk.f32.vlgmr.msra.gmra.mrb[32].mxu1 %vm1699_vm4, %v8756_v14 }
 0x630   : > { %7070 = vmatpush3.bf16.msra.mxu0 %v7035_v28  ;;  %6396 = vmatprep.mubr.msk.f32.mxu0 %vm1699_vm4, %v8661_v12 }
 0x631   : > { %7072 = vmatprep.subr.bf16.mxu0 %v7039_v62  ;;  %6424 = vmatprep.mubr.msk.f32.mxu1 %vm1699_vm4, %v8761_v55 }
 0x633   : > { %6397 = vmatmul.mubr.msk.f32.gmra.mrb[26].mxu0 %vm1699_vm4, %v8677_v63  ;;  %6425 = vmatmul.mubr.msk.f32.gmra.mrb[34].mxu1 %vm1699_vm4, %v8772_v0 }
 0x634   : > { %7074 = vmatpush3.bf16.msra.mxu0 %v7039_v62  ;;  %6399 = vmatprep.mubr.msk.f32.mxu0 %vm1699_vm4, %v8689_v24 }
 0x635   : > { %7076 = vmatprep.subr.bf16.mxu0 %v7043_v43  ;;  %6427 = vmatprep.mubr.msk.f32.mxu1 %vm1699_vm4, %v8777_v50 }
 0x637   : > { %6400 = vmatmul.mubr.msk.f32.gmra.mrb[28].mxu0 %vm1699_vm4, %v8705_v56  ;;  %6428 = vmatmul.mubr.msk.f32.gmra.mrb[36].mxu1 %vm1699_vm4, %v8786_v37 }
 0x638   : > { %7078 = vmatpush3.bf16.msra.mxu0 %v7043_v43  ;;  %6402 = vmatprep.mubr.msk.f32.mxu0 %vm1699_vm4, %v8717_v40 }
 0x639   : > { %7080 = vmatprep.subr.bf16.mxu0 %v7047_v33  ;;  %6430 = vmatprep.mubr.msk.f32.mxu1 %vm1699_vm4, %v8791_v22 }
 0x63b   : > { %6403 = vmatmul.mubr.msk.f32.gmra.mrb[30].mxu0 %vm1699_vm4, %v8733_v49  ;;  %6431 = vmatmul.mubr.msk.f32.gmra.mrb[38].mxu1 %vm1699_vm4, %v8800_v38 }
 0x63c   : > { %7082 = vmatpush3.bf16.msra.mxu0 %v7047_v33  ;;  %6449 = vmatprep.mubr.msk.f32.mxu0 %vm1699_vm4, %v8620_v32  ;;  %v10007_v32 = vld [vmem:[#allocation17_spill] sm:$0xff] }
 0x63d   : > { %6477 = vmatprep.mubr.msk.f32.mxu1 %vm1699_vm4, %v8613_v47  ;;  %v10008_v47 = vld [vmem:[#allocation20_spill] sm:$0xff] }
 0x63f   : > { %6450 = vmatmul.mubr.msk.f32.vlgmr.msra.gmra.mrb[32].mxu0 %vm1699_vm4, %v8656_v53 }
 0x640   : > { %6452 = vmatprep.mubr.msk.f32.mxu0 %vm1699_vm4, %v10002_v3 }
 0x643   : > { %6453 = vmatmul.mubr.msk.f32.gmra.mrb[34].mxu0 %vm1699_vm4, %v10003_v57 }
 0x644   : > { %6455 = vmatprep.mubr.msk.f32.mxu0 %vm1699_vm4, %v10004_v42 }
 0x647   : > { %6456 = vmatmul.mubr.msk.f32.gmra.mrb[36].mxu0 %vm1699_vm4, %v10005_v17 }
 0x648   : > { %6458 = vmatprep.mubr.msk.f32.mxu0 %vm1699_vm4, %v10006_v52 }
 0x64b   : > { %6459 = vmatmul.mubr.msk.f32.gmra.mrb[38].mxu0 %vm1699_vm4, %v10007_v32 }
 0x64c   : > { %6505 = vmatprep.mubr.msk.f32.mxu0 %vm1699_vm4, %v10008_v47 }
 0x702   : > { %v6395_v53 = vpop.f32.mrb[24].mxu0  ;;  %v6423_v48 = vpop.f32.mrb[32].mxu1 }
 0x703   : > { %3001 = vrot.lane.b32.xlu1 %v6395_v53, %s7430_s22  ;;  %v2742_v28 = vpop.f32.mrb[25].mxu0  ;;  %v2847_v9 = vpop.f32.mrb[33].mxu1 }
 0x704   : > { %2999 = vrot.lane.b32.xlu0 %v2742_v28, %s7430_s22 }
 0x706   : > { %v6398_v30 = vpop.f32.mrb[26].mxu0  ;;  %v6426_v45 = vpop.f32.mrb[34].mxu1 }
 0x707   : > { %3005 = vrot.lane.b32.xlu1 %v6398_v30, %s7430_s22  ;;  %v2752_v31 = vpop.f32.mrb[27].mxu0  ;;  %v2857_v36 = vpop.f32.mrb[35].mxu1 }
 0x708   : > { %3003 = vrot.lane.b32.xlu0 %v2752_v31, %s7430_s22 }
 0x70a   : > { %v6401_v44 = vpop.f32.mrb[28].mxu0  ;;  %v6429_v35 = vpop.f32.mrb[36].mxu1 }
 0x70b   : > { %3009 = vrot.lane.b32.xlu1 %v6401_v44, %s7430_s22  ;;  %v2762_v11 = vpop.f32.mrb[29].mxu0  ;;  %v2867_v25 = vpop.f32.mrb[37].mxu1 }
 0x70c   : > { %3007 = vrot.lane.b32.xlu0 %v2762_v11, %s7430_s22 }
 0x70e   : > { %v6404_v21 = vpop.f32.mrb[30].mxu0  ;;  %v9072_v62 = vpop.f32.mrb[38].mxu1 }
 0x70f   : > { %3013 = vrot.lane.b32.xlu1 %v6404_v21, %s7430_s22  ;;  %v2772_v20 = vpop.f32.mrb[31].mxu0  ;;  %v9075_v10 = vpop.f32.mrb[39].mxu1 }
 0x710   : > { %3011 = vrot.lane.b32.xlu0 %v2772_v20, %s7430_s22 }
 0x712   : > { %v6451_v54 = vpop.f32.mrb[32].mxu0 }
 0x713   : > { %3041 = vrot.lane.b32.xlu1 %v6451_v54, %s7423_s20  ;;  %v2952_v43 = vpop.f32.mrb[33].mxu0 }
 0x714   : > { %3039 = vrot.lane.b32.xlu0 %v2952_v43, %s7423_s20 }
 0x716   : > { %v6454_v33 = vpop.f32.mrb[34].mxu0 }
 0x717   : > { %3045 = vrot.lane.b32.xlu1 %v6454_v33, %s7423_s20  ;;  %v2962_v3 = vpop.f32.mrb[35].mxu0 }
 0x718   : > { %3043 = vrot.lane.b32.xlu0 %v2962_v3, %s7423_s20 }
 0x71a   : > { %v6457_v57 = vpop.f32.mrb[36].mxu0 }
 0x71b   : > { %3049 = vrot.lane.b32.xlu1 %v6457_v57, %s7423_s20  ;;  %v2972_v42 = vpop.f32.mrb[37].mxu0 }
 0x71c   : > { %3047 = vrot.lane.b32.xlu0 %v2972_v42, %s7423_s20 }
 0x71e   : > { %v6460_v17 = vpop.f32.mrb[38].mxu0 }
 0x71f   : > { %3053 = vrot.lane.b32.xlu1 %v6460_v17, %s7423_s20  ;;  %v2982_v52 = vpop.f32.mrb[39].mxu0 }
 0x720   : > { %3051 = vrot.lane.b32.xlu0 %v2982_v52, %s7423_s20 }
 0x775   : > { %v3002_v53 = vpop.permute.xlu1 %3001 }
 0x776   : > { %v3000_v28 = vpop.permute.xlu0 %2999  ;;  %v3024_v20 = vsel %vm2119_vm5, 0.0, %v3002_v53 }
 0x777   : > { %v3023_v43 = vsel %vm2119_vm5, 0.0, %v3000_v28  ;;  %v3072_v33 = vadd.f32 %v6423_v48, %v3024_v20 }
 0x778   : > { %v3071_v57 = vadd.f32 %v3023_v43, %v2847_v9 }
 0x779   : > { %v3006_v30 = vpop.permute.xlu1 %3005 }
 0x77a   : > { %v3004_v31 = vpop.permute.xlu0 %3003  ;;  %v3026_v42 = vsel %vm2119_vm5, 0.0, %v3006_v30 }
 0x77b   : > { %v3025_v17 = vsel %vm2119_vm5, 0.0, %v3004_v31  ;;  %v3074_v5 = vadd.f32 %v6426_v45, %v3026_v42 }
 0x77c   : > { %v3073_v2 = vadd.f32 %v3025_v17, %v2857_v36 }
 0x77d   : > { %v3010_v44 = vpop.permute.xlu1 %3009 }
 0x77e   : > { %v3008_v11 = vpop.permute.xlu0 %3007  ;;  %v3028_v48 = vsel %vm2119_vm5, 0.0, %v3010_v44 }
 0x77f   : > { %v3027_v9 = vsel %vm2119_vm5, 0.0, %v3008_v11  ;;  %v3076_v45 = vadd.f32 %v6429_v35, %v3028_v48 }
 0x780   : > { %v3075_v36 = vadd.f32 %v3027_v9, %v2867_v25 }
 0x781   : > { %v3014_v21 = vpop.permute.xlu1 %3013 }
 0x782   : > { %v3012_v54 = vpop.permute.xlu0 %3011  ;;  %v3030_v44 = vsel %vm2119_vm5, 0.0, %v3014_v21 }
 0x783   : > { %v3029_v42 = vsel %vm2119_vm5, 0.0, %v3012_v54  ;;  %v3078_v25 = vadd.f32 %v9072_v62, %v3030_v44 }
 0x784   : > { %v3077_v48 = vadd.f32 %v3029_v42, %v9075_v10 }
 0x785   : > { %v3042_v3 = vpop.permute.xlu1 %3041 }
 0x786   : > { %v3064_v52 = vsel %vm2160_vm6, %v3042_v3, 0.0  ;;  %v3040_v18 = vpop.permute.xlu0 %3039 }
 0x787   : > { %v3080_v4 = vadd.f32 %v3072_v33, %v3064_v52  ;;  %v3063_v51 = vsel %vm2160_vm6, %v3040_v18, 0.0 }
 0x788   : > { %v3079_v8 = vadd.f32 %v3071_v57, %v3063_v51 }
 0x789   : > { %v3088_v53 = vadd.f32 %v3080_v4, %v8826_v16  ;;  %v3046_v61 = vpop.permute.xlu1 %3045 }
 0x78a   : > { %v3087_v28 = vadd.f32 %v3079_v8, %v8828_v13  ;;  %v3066_v30 = vsel %vm2160_vm6, %v3046_v61, 0.0  ;;  %v3044_v31 = vpop.permute.xlu0 %3043 }
 0x78b   : > { %v3096_v20 = vmax.f32 %v3088_v53, 0.0  ;;  %v3082_v43 = vadd.f32 %v3074_v5, %v3066_v30  ;;  %v3065_v33 = vsel %vm2160_vm6, %v3044_v31, 0.0 }
 0x78c   : > { %v3095_v18 = vmax.f32 %v3087_v28, 0.0  ;;  %v3081_v51 = vadd.f32 %v3073_v2, %v3065_v33 }
 0x78d   : > { %v3090_v4 = vadd.f32 %v3082_v43, %v8830_v41  ;;  %v3050_v3 = vpop.permute.xlu1 %3049 }
 0x78e   : > { %v7083_v57 = vpack.c.bf16 %v3096_v20, %v3095_v18  ;;  %v3089_v11 = vadd.f32 %v3081_v51, %v8832_v29  ;;  %v3068_v8 = vsel %vm2160_vm6, %v3050_v3, 0.0  ;;  %v3048_v61 = vpop.permute.xlu0 %3047 }
 0x78f   : > { %v3098_v5 = vmax.f32 %v3090_v4, 0.0  ;;  %v3084_v17 = vadd.f32 %v3076_v45, %v3068_v8  ;;  %v3067_v52 = vsel %vm2160_vm6, %v3048_v61, 0.0 }
 0x790   : > { %v3097_v2 = vmax.f32 %v3089_v11, 0.0  ;;  %v3083_v35 = vadd.f32 %v3075_v36, %v3067_v52  ;;  %7084 = vmatprep.subr.bf16.mxu1 %v7083_v57  ;;  %7100 = vmatprep.subr.bf16.mxu0 %v7083_v57 }
 0x791   : > { %v3092_v21 = vadd.f32 %v3084_v17, %v8834_v46  ;;  %7086 = vmatpush3.bf16.msra.mxu1 %v7083_v57  ;;  %7102 = vmatpush3.bf16.msra.mxu0 %v7083_v57  ;;  %v3054_v53 = vpop.permute.xlu1 %3053 }
 0x792   : > { %v7087_v9 = vpack.c.bf16 %v3098_v5, %v3097_v2  ;;  %v3091_v54 = vadd.f32 %v3083_v35, %v8836_v19  ;;  %v3070_v28 = vsel %vm2160_vm6, %v3054_v53, 0.0  ;;  %v3052_v30 = vpop.permute.xlu0 %3051 }
 0x793   : > { %v3100_v31 = vmax.f32 %v3092_v21, 0.0  ;;  %v3086_v20 = vadd.f32 %v3078_v25, %v3070_v28  ;;  %v3069_v43 = vsel %vm2160_vm6, %v3052_v30, 0.0 }
 0x794   : > { %v3099_v33 = vmax.f32 %v3091_v54, 0.0  ;;  %v3085_v18 = vadd.f32 %v3077_v48, %v3069_v43  ;;  %7088 = vmatprep.subr.bf16.mxu1 %v7087_v9  ;;  %7104 = vmatprep.subr.bf16.mxu0 %v7087_v9 }
 0x795   : > { %v3094_v62 = vadd.f32 %v3086_v20, %v8838_v34  ;;  %7090 = vmatpush3.bf16.msra.mxu1 %v7087_v9  ;;  %7106 = vmatpush3.bf16.msra.mxu0 %v7087_v9 }
 0x796   : > { %v7091_v51 = vpack.c.bf16 %v3100_v31, %v3099_v33  ;;  %v3093_v10 = vadd.f32 %v3085_v18, %v8840_v39 }
 0x797   : > { %v3102_v45 = vmax.f32 %v3094_v62, 0.0 }
 0x798   : > { %v3101_v36 = vmax.f32 %v3093_v10, 0.0  ;;  %7092 = vmatprep.subr.bf16.mxu1 %v7091_v51  ;;  %7108 = vmatprep.subr.bf16.mxu0 %v7091_v51 }
 0x799   : > { %7094 = vmatpush3.bf16.msra.mxu1 %v7091_v51  ;;  %7110 = vmatpush3.bf16.msra.mxu0 %v7091_v51 }
 0x79a   : > { %v7095_v4 = vpack.c.bf16 %v3102_v45, %v3101_v36 }
 0x79c   : > { %7096 = vmatprep.subr.bf16.mxu1 %v7095_v4  ;;  %7112 = vmatprep.subr.bf16.mxu0 %v7095_v4 }
 0x79d   : > { %7098 = vmatpush3.bf16.msra.mxu1 %v7095_v4  ;;  %7114 = vmatpush3.bf16.msra.mxu0 %v7095_v4 }
 0x79e   : > { %7116 = vmatprep.subr.bf16.mxu1 %v7083_v57 }
 0x7a0   : > { %6478 = vmatmul.mubr.msk.f32.vlgmr.msra.gmra.mrb[40].mxu1 %vm1699_vm4, %v8651_v26  ;;  %6506 = vmatmul.mubr.msk.f32.vlgmr.msra.gmra.mrb[40].mxu0 %vm1699_vm4, %v8756_v14  ;;  %v9143_v26 = vld [vmem:[%s9903_s3 + $0x80] sm:$0xff]  ;;  %v9192_v14 = vld [vmem:[%s9903_s3 + $0xb0] sm:$0xff] }
 0x7a1   : > { %7118 = vmatpush3.bf16.msra.mxu1 %v7083_v57  ;;  %6480 = vmatprep.mubr.msk.f32.mxu1 %vm1699_vm4, %v8661_v12  ;;  %v9150_v12 = vld [vmem:[%s9903_s3] sm:$0xff] }
 0x7a2   : > { %7120 = vmatprep.subr.bf16.mxu1 %v7087_v9  ;;  %6508 = vmatprep.mubr.msk.f32.mxu0 %vm1699_vm4, %v8761_v55 }
 0x7a4   : > { %6481 = vmatmul.mubr.msk.f32.gmra.mrb[42].mxu1 %vm1699_vm4, %v8677_v63  ;;  %6509 = vmatmul.mubr.msk.f32.gmra.mrb[42].mxu0 %vm1699_vm4, %v8772_v0  ;;  %v9157_v63 = vld [vmem:[%s9903_s3 + $0x88] sm:$0xff] }
 0x7a5   : > { %7122 = vmatpush3.bf16.msra.mxu1 %v7087_v9  ;;  %6483 = vmatprep.mubr.msk.f32.mxu1 %vm1699_vm4, %v8689_v24  ;;  %v9164_v24 = vld [vmem:[%s9903_s3 + $0x90] sm:$0xff] }
 0x7a6   : > { %7124 = vmatprep.subr.bf16.mxu1 %v7091_v51  ;;  %6511 = vmatprep.mubr.msk.f32.mxu0 %vm1699_vm4, %v8777_v50 }
 0x7a8   : > { %6484 = vmatmul.mubr.msk.f32.gmra.mrb[44].mxu1 %vm1699_vm4, %v8705_v56  ;;  %6512 = vmatmul.mubr.msk.f32.gmra.mrb[44].mxu0 %vm1699_vm4, %v8786_v37  ;;  %v9171_v56 = vld [vmem:[%s9903_s3 + $0x98] sm:$0xff] }
 0x7a9   : > { %7126 = vmatpush3.bf16.msra.mxu1 %v7091_v51  ;;  %6486 = vmatprep.mubr.msk.f32.mxu1 %vm1699_vm4, %v8717_v40  ;;  %v9178_v40 = vld [vmem:[%s9903_s3 + $0xa0] sm:$0xff] }
 0x7aa   : > { %7128 = vmatprep.subr.bf16.mxu1 %v7095_v4  ;;  %6514 = vmatprep.mubr.msk.f32.mxu0 %vm1699_vm4, %v8791_v22 }
 0x7ac   : > { %6487 = vmatmul.mubr.msk.f32.gmra.mrb[46].mxu1 %vm1699_vm4, %v8733_v49  ;;  %6515 = vmatmul.mubr.msk.f32.gmra.mrb[46].mxu0 %vm1699_vm4, %v8800_v38  ;;  %v9185_v49 = vld [vmem:[%s9903_s3 + $0xa8] sm:$0xff] }
 0x7ad   : > { %7130 = vmatpush3.bf16.msra.mxu1 %v7095_v4  ;;  %6533 = vmatprep.mubr.msk.f32.mxu1 %vm1699_vm4, %v9143_v26 }
 0x7ae   : > { %6561 = vmatprep.mubr.msk.f32.mxu0 %vm1699_vm4, %v9150_v12 }
 0x7b0   : > { %6534 = vmatmul.mubr.msk.f32.vlgmr.msra.gmra.mrb[48].mxu1 %vm1699_vm4, %v9157_v63 }
 0x7b1   : > { %6536 = vmatprep.mubr.msk.f32.mxu1 %vm1699_vm4, %v9164_v24 }
 0x7b4   : > { %6537 = vmatmul.mubr.msk.f32.gmra.mrb[50].mxu1 %vm1699_vm4, %v9171_v56 }
 0x7b5   : > { %6539 = vmatprep.mubr.msk.f32.mxu1 %vm1699_vm4, %v9178_v40 }
 0x7b8   : > { %6540 = vmatmul.mubr.msk.f32.gmra.mrb[52].mxu1 %vm1699_vm4, %v9185_v49 }
 0x7b9   : > { %6542 = vmatprep.mubr.msk.f32.mxu1 %vm1699_vm4, %v9192_v14 }
 0x7bc   : > { %6543 = vmatmul.mubr.msk.f32.gmra.mrb[54].mxu1 %vm1699_vm4, %v10007_v32 }
 0x7bd   : > { %6589 = vmatprep.mubr.msk.f32.mxu1 %vm1699_vm4, %v10008_v47 }
 0x873   : > { %v6479_v55 = vpop.f32.mrb[40].mxu1  ;;  %v6507_v0 = vpop.f32.mrb[40].mxu0 }
 0x874   : > { %3428 = vrot.lane.b32.xlu1 %v6479_v55, %s7430_s22  ;;  %v3169_v50 = vpop.f32.mrb[41].mxu1  ;;  %v3274_v37 = vpop.f32.mrb[41].mxu0 }
 0x875   : > { %3426 = vrot.lane.b32.xlu0 %v3169_v50, %s7430_s22 }
 0x877   : > { %v6482_v22 = vpop.f32.mrb[42].mxu1  ;;  %v6510_v38 = vpop.f32.mrb[42].mxu0 }
 0x878   : > { %3432 = vrot.lane.b32.xlu1 %v6482_v22, %s7430_s22  ;;  %v3179_v3 = vpop.f32.mrb[43].mxu1  ;;  %v3284_v44 = vpop.f32.mrb[43].mxu0 }
 0x879   : > { %3430 = vrot.lane.b32.xlu0 %v3179_v3, %s7430_s22 }
 0x87b   : > { %v6485_v32 = vpop.f32.mrb[44].mxu1  ;;  %v6513_v57 = vpop.f32.mrb[44].mxu0 }
 0x87c   : > { %3436 = vrot.lane.b32.xlu1 %v6485_v32, %s7430_s22  ;;  %v3189_v47 = vpop.f32.mrb[45].mxu1  ;;  %v3294_v11 = vpop.f32.mrb[45].mxu0 }
 0x87d   : > { %3434 = vrot.lane.b32.xlu0 %v3189_v47, %s7430_s22 }
 0x87f   : > { %v6488_v8 = vpop.f32.mrb[46].mxu1  ;;  %v9206_v61 = vpop.f32.mrb[46].mxu0 }
 0x880   : > { %3440 = vrot.lane.b32.xlu1 %v6488_v8, %s7430_s22  ;;  %v3199_v42 = vpop.f32.mrb[47].mxu1  ;;  %v9209_v5 = vpop.f32.mrb[47].mxu0 }
 0x881   : > { %3438 = vrot.lane.b32.xlu0 %v3199_v42, %s7430_s22 }
 0x883   : > { %v6535_v17 = vpop.f32.mrb[48].mxu1 }
 0x884   : > { %3468 = vrot.lane.b32.xlu1 %v6535_v17, %s7423_s20  ;;  %v3379_v52 = vpop.f32.mrb[49].mxu1 }
 0x885   : > { %3466 = vrot.lane.b32.xlu0 %v3379_v52, %s7423_s20 }
 0x887   : > { %v6538_v2 = vpop.f32.mrb[50].mxu1 }
 0x888   : > { %3472 = vrot.lane.b32.xlu1 %v6538_v2, %s7423_s20  ;;  %v3389_v35 = vpop.f32.mrb[51].mxu1 }
 0x889   : > { %3470 = vrot.lane.b32.xlu0 %v3389_v35, %s7423_s20 }
 0x88b   : > { %v6541_v25 = vpop.f32.mrb[52].mxu1 }
 0x88c   : > { %3476 = vrot.lane.b32.xlu1 %v6541_v25, %s7423_s20  ;;  %v3399_v21 = vpop.f32.mrb[53].mxu1 }
 0x88d   : > { %3474 = vrot.lane.b32.xlu0 %v3399_v21, %s7423_s20 }
 0x88f   : > { %v6544_v53 = vpop.f32.mrb[54].mxu1 }
 0x890   : > { %3480 = vrot.lane.b32.xlu1 %v6544_v53, %s7423_s20  ;;  %v3409_v48 = vpop.f32.mrb[55].mxu1 }
 0x891   : > { %3478 = vrot.lane.b32.xlu0 %v3409_v48, %s7423_s20 }
 0x8e6   : > { %v3429_v9 = vpop.permute.xlu1 %3428 }
 0x8e7   : > { %v3427_v54 = vpop.permute.xlu0 %3426  ;;  %v3451_v33 = vsel %vm2119_vm5, 0.0, %v3429_v9 }
 0x8e8   : > { %v3450_v62 = vsel %vm2119_vm5, 0.0, %v3427_v54  ;;  %v3499_v51 = vadd.f32 %v6507_v0, %v3451_v33 }
 0x8e9   : > { %v3498_v45 = vadd.f32 %v3450_v62, %v3274_v37 }
 0x8ea   : > { %v3433_v28 = vpop.permute.xlu1 %3432 }
 0x8eb   : > { %v3431_v30 = vpop.permute.xlu0 %3430  ;;  %v3453_v36 = vsel %vm2119_vm5, 0.0, %v3433_v28 }
 0x8ec   : > { %v3452_v4 = vsel %vm2119_vm5, 0.0, %v3431_v30  ;;  %v3501_v47 = vadd.f32 %v6510_v38, %v3453_v36 }
 0x8ed   : > { %v3500_v8 = vadd.f32 %v3452_v4, %v3284_v44  ;;  %v10009_v44 = vmax.f32 %v8960_v1, 0.0 }
 0x8ee   : > { %v3437_v31 = vpop.permute.xlu1 %3436 }
 0x8ef   : > { %v3435_v20 = vpop.permute.xlu0 %3434  ;;  %v3455_v0 = vsel %vm2119_vm5, 0.0, %v3437_v31 }
 0x8f0   : > { %v3454_v37 = vsel %vm2119_vm5, 0.0, %v3435_v20  ;;  %v3503_v9 = vadd.f32 %v6513_v57, %v3455_v0  ;;  %v10017_v0 = vmax.f32 %v8996_v23, 0.0 }
 0x8f1   : > { %v3502_v54 = vadd.f32 %v3454_v37, %v3294_v11 }
 0x8f2   : > { %v3441_v43 = vpop.permute.xlu1 %3440 }
 0x8f3   : > { %v3439_v18 = vpop.permute.xlu0 %3438  ;;  %v3457_v20 = vsel %vm2119_vm5, 0.0, %v3441_v43 }
 0x8f4   : > { %v3456_v1 = vsel %vm2119_vm5, 0.0, %v3439_v18 }
 0x8f6   : > { %v3469_v10 = vpop.permute.xlu1 %3468 }
 0x8f7   : > { %v3491_v55 = vsel %vm2160_vm6, %v3469_v10, 0.0  ;;  %v3467_v50 = vpop.permute.xlu0 %3466 }
 0x8f8   : > { %v3507_v22 = vadd.f32 %v3499_v51, %v3491_v55  ;;  %v3490_v3 = vsel %vm2160_vm6, %v3467_v50, 0.0  ;;  %v10011_v51 = vmax.f32 %v8970_v60, 0.0  ;;  %v3505_v55 = vadd.f32 %v9206_v61, %v3457_v20  ;;  %v9319_v20 = vld [vmem:[%s9903_s3 + $0x10] sm:$0xff] }
 0x8f9   : > { %v3506_v32 = vadd.f32 %v3498_v45, %v3490_v3  ;;  %v10013_v45 = vmax.f32 %v8978_v7, 0.0 }
 0x8fa   : > { %v3515_v42 = vadd.f32 %v3507_v22, %v8826_v16  ;;  %v3473_v17 = vpop.permute.xlu1 %3472  ;;  %v3504_v22 = vadd.f32 %v3456_v1, %v9209_v5  ;;  %v9347_v1 = vld [vmem:[%s9903_s3 + $0x20] sm:$0xff] }
 0x8fb   : > { %v3514_v52 = vadd.f32 %v3506_v32, %v8828_v13  ;;  %v3493_v2 = vsel %vm2160_vm6, %v3473_v17, 0.0  ;;  %v3471_v35 = vpop.permute.xlu0 %3470 }
 0x8fc   : > { %v9233_v25 = vadd.f32 %v3515_v42, %v2669_v58  ;;  %v3509_v21 = vadd.f32 %v3501_v47, %v3493_v2  ;;  %v3492_v38 = vsel %vm2160_vm6, %v3471_v35, 0.0 }
 0x8fd   : > { %v9238_v53 = vadd.f32 %v3514_v52, %v10009_v44  ;;  %v3508_v48 = vadd.f32 %v3500_v8, %v3492_v38  ;;  %v10015_v8 = vmax.f32 %v8988_v27, 0.0  ;;  %v10019_v38 = vmax.f32 %v9003_v59, 0.0 }
 0x8fe   : > { %v9931_v28 = vmax.f32 %v9233_v25, 0.0  ;;  %v3517_v30 = vadd.f32 %v3509_v21, %v8830_v41  ;;  %v3477_v31 = vpop.permute.xlu1 %3476 }
 0x8ff   : > { %10010 = vst [vmem:[#allocation8_spill] sm:$0xff] %v9238_v53  ;;  %v9930_v15 = vmax.f32 %v9238_v53, 0.0  ;;  %v3516_v58 = vadd.f32 %v3508_v48, %v8832_v29  ;;  %v3495_v33 = vsel %vm2160_vm6, %v3477_v31, 0.0  ;;  %v3475_v62 = vpop.permute.xlu0 %3474  ;;  %v10021_v48 = vmax.f32 %v9010_v6, 0.0  ;;  %v9305_v6 = vld [vmem:[%s9903_s3 + $0x8] sm:$0xff] }
 0x900   : > { %v9249_v57 = vadd.f32 %v3517_v30, %v10011_v51  ;;  %v3511_v11 = vadd.f32 %v3503_v9, %v3495_v33  ;;  %v3494_v10 = vsel %vm2160_vm6, %v3475_v62, 0.0  ;;  %v9312_v31 = vld [vmem:[%s9903_s3 + $0x48] sm:$0xff]  ;;  %v9333_v33 = vld [vmem:[%s9903_s3 + $0x18] sm:$0xff]  ;;  %v9354_v51 = vld [vmem:[%s9903_s3 + $0x60] sm:$0xff] }
 0x901   : > { %v7131_v43 = vpack.c.bf16 %v9931_v28, %v9930_v15  ;;  %v9258_v36 = vadd.f32 %v3516_v58, %v10013_v45  ;;  %v3510_v4 = vadd.f32 %v3502_v54, %v3494_v10  ;;  %v9326_v58 = vld [vmem:[%s9903_s3 + $0x50] sm:$0xff]  ;;  %v9340_v62 = vld [vmem:[%s9903_s3 + $0x58] sm:$0xff]  ;;  %v9368_v10 = vld [vmem:[%s9903_s3 + $0x68] sm:$0xff] }
 0x902   : > { %10012 = vst [vmem:[#allocation24_spill] sm:$0xff] %v9249_v57  ;;  %v9929_v18 = vmax.f32 %v9249_v57, 0.0  ;;  %v3519_v60 = vadd.f32 %v3511_v11, %v8834_v46  ;;  %v3481_v50 = vpop.permute.xlu1 %3480  ;;  %v9361_v11 = vld [vmem:[%s9903_s3 + $0x28] sm:$0xff]  ;;  %v9382_v45 = vld [vmem:[%s9903_s3 + $0x70] sm:$0xff] }
 0x903   : > { %10014 = vst [vmem:[#allocation4_spill] sm:$0xff] %v9258_v36  ;;  %v9928_v3 = vmax.f32 %v9258_v36, 0.0  ;;  %v3518_v32 = vadd.f32 %v3510_v4, %v8836_v19  ;;  %v3497_v47 = vsel %vm2160_vm6, %v3481_v50, 0.0  ;;  %7132 = vmatprep.subr.bf16.mxu0 %v7131_v43  ;;  %7148 = vmatprep.subr.bf16.mxu1 %v7131_v43  ;;  %v3479_v7 = vpop.permute.xlu0 %3478  ;;  %v9389_v4 = vld [vmem:[%s9903_s3 + $0x38] sm:$0xff]  ;;  %v9426_v50 = vld [vmem:[%s9903_s3 + $0x40] sm:$0xff] }
 0x904   : > { %v9269_v42 = vadd.f32 %v3519_v60, %v10015_v8  ;;  %v3513_v61 = vadd.f32 %v3505_v55, %v3497_v47  ;;  %v3496_v17 = vsel %vm2160_vm6, %v3479_v7, 0.0  ;;  %7134 = vmatpush3.bf16.msra.mxu0 %v7131_v43  ;;  %7150 = vmatpush3.bf16.msra.mxu1 %v7131_v43  ;;  %v9396_v55 = vld [vmem:[%s9903_s3 + $0x78] sm:$0xff] }
 0x905   : > { %v7135_v5 = vpack.c.bf16 %v9929_v18, %v9928_v3  ;;  %v9278_v37 = vadd.f32 %v3518_v32, %v10017_v0  ;;  %v3512_v52 = vadd.f32 %v3504_v22, %v3496_v17  ;;  %v9419_v60 = vld [vmem:[%s9903_s3 + $0xb8] sm:$0xff] }
 0x906   : > { %10016 = vst [vmem:[#allocation7_spill] sm:$0xff] %v9269_v42  ;;  %v9927_v2 = vmax.f32 %v9269_v42, 0.0  ;;  %v3521_v27 = vadd.f32 %v3513_v61, %v8838_v34 }
 0x907   : > { %10018 = vst [vmem:[#allocation16_spill] sm:$0xff] %v9278_v37  ;;  %v9926_v35 = vmax.f32 %v9278_v37, 0.0  ;;  %v3520_v21 = vadd.f32 %v3512_v52, %v8840_v39  ;;  %7136 = vmatprep.subr.bf16.mxu0 %v7135_v5  ;;  %7152 = vmatprep.subr.bf16.mxu1 %v7135_v5 }
 0x908   : > { %v9286_v44 = vadd.f32 %v3521_v27, %v10019_v38  ;;  %7138 = vmatpush3.bf16.msra.mxu0 %v7135_v5  ;;  %7154 = vmatpush3.bf16.msra.mxu1 %v7135_v5 }
 0x909   : > { %v7139_v23 = vpack.c.bf16 %v9927_v2, %v9926_v35  ;;  %v9294_v9 = vadd.f32 %v3520_v21, %v10021_v48 }
 0x90a   : > { %10020 = vst [vmem:[#allocation25_spill] sm:$0xff] %v9286_v44  ;;  %v9925_v54 = vmax.f32 %v9286_v44, 0.0 }
 0x90b   : > { %10022 = vst [vmem:[#allocation9_spill] sm:$0xff] %v9294_v9  ;;  %v9924_v30 = vmax.f32 %v9294_v9, 0.0  ;;  %7140 = vmatprep.subr.bf16.mxu0 %v7139_v23  ;;  %7156 = vmatprep.subr.bf16.mxu1 %v7139_v23 }
 0x90c   : > { %7142 = vmatpush3.bf16.msra.mxu0 %v7139_v23  ;;  %7158 = vmatpush3.bf16.msra.mxu1 %v7139_v23 }
 0x90d   : > { %v7143_v59 = vpack.c.bf16 %v9925_v54, %v9924_v30 }
 0x90f   : > { %7144 = vmatprep.subr.bf16.mxu0 %v7143_v59  ;;  %7160 = vmatprep.subr.bf16.mxu1 %v7143_v59 }
 0x910   : > { %7146 = vmatpush3.bf16.msra.mxu0 %v7143_v59  ;;  %7162 = vmatpush3.bf16.msra.mxu1 %v7143_v59 }
 0x911   : > { %7164 = vmatprep.subr.bf16.mxu0 %v7131_v43 }
 0x913   : > { %6562 = vmatmul.mubr.msk.f32.vlgmr.msra.gmra.mrb[48].mxu0 %vm1699_vm4, %v9305_v6  ;;  %6590 = vmatmul.mubr.msk.f32.vlgmr.msra.gmra.mrb[56].mxu1 %vm1699_vm4, %v9312_v31 }
 0x914   : > { %7166 = vmatpush3.bf16.msra.mxu0 %v7131_v43  ;;  %6564 = vmatprep.mubr.msk.f32.mxu0 %vm1699_vm4, %v9319_v20  ;;  %v9375_v43 = vld [vmem:[%s9903_s3 + $0x30] sm:$0xff] }
 0x915   : > { %7168 = vmatprep.subr.bf16.mxu0 %v7135_v5  ;;  %6592 = vmatprep.mubr.msk.f32.mxu1 %vm1699_vm4, %v9326_v58 }
 0x917   : > { %6565 = vmatmul.mubr.msk.f32.gmra.mrb[50].mxu0 %vm1699_vm4, %v9333_v33  ;;  %6593 = vmatmul.mubr.msk.f32.gmra.mrb[58].mxu1 %vm1699_vm4, %v9340_v62 }
 0x918   : > { %7170 = vmatpush3.bf16.msra.mxu0 %v7135_v5  ;;  %6567 = vmatprep.mubr.msk.f32.mxu0 %vm1699_vm4, %v9347_v1 }
 0x919   : > { %7172 = vmatprep.subr.bf16.mxu0 %v7139_v23  ;;  %6595 = vmatprep.mubr.msk.f32.mxu1 %vm1699_vm4, %v9354_v51 }
 0x91b   : > { %6568 = vmatmul.mubr.msk.f32.gmra.mrb[52].mxu0 %vm1699_vm4, %v9361_v11  ;;  %6596 = vmatmul.mubr.msk.f32.gmra.mrb[60].mxu1 %vm1699_vm4, %v9368_v10 }
 0x91c   : > { %7174 = vmatpush3.bf16.msra.mxu0 %v7139_v23  ;;  %6570 = vmatprep.mubr.msk.f32.mxu0 %vm1699_vm4, %v9375_v43 }
 0x91d   : > { %7176 = vmatprep.subr.bf16.mxu0 %v7143_v59  ;;  %6598 = vmatprep.mubr.msk.f32.mxu1 %vm1699_vm4, %v9382_v45 }
 0x91f   : > { %6571 = vmatmul.mubr.msk.f32.gmra.mrb[54].mxu0 %vm1699_vm4, %v9389_v4  ;;  %6599 = vmatmul.mubr.msk.f32.gmra.mrb[62].mxu1 %vm1699_vm4, %v9396_v55 }
 0x920   : > { %7178 = vmatpush3.bf16.msra.mxu0 %v7143_v59  ;;  %6617 = vmatprep.mubr.msk.f32.mxu0 %vm1699_vm4, %v9143_v26 }
 0x921   : > { %6645 = vmatprep.mubr.msk.f32.mxu1 %vm1699_vm4, %v9150_v12 }
 0x923   : > { %6618 = vmatmul.mubr.msk.f32.vlgmr.msra.gmra.mrb[56].mxu0 %vm1699_vm4, %v9157_v63 }
 0x924   : > { %6620 = vmatprep.mubr.msk.f32.mxu0 %vm1699_vm4, %v9164_v24 }
 0x927   : > { %6621 = vmatmul.mubr.msk.f32.gmra.mrb[58].mxu0 %vm1699_vm4, %v9171_v56 }
 0x928   : > { %6623 = vmatprep.mubr.msk.f32.mxu0 %vm1699_vm4, %v9178_v40 }
 0x92b   : > { %6624 = vmatmul.mubr.msk.f32.gmra.mrb[60].mxu0 %vm1699_vm4, %v9185_v49 }
 0x92c   : > { %6626 = vmatprep.mubr.msk.f32.mxu0 %vm1699_vm4, %v9192_v14 }
 0x92f   : > { %6627 = vmatmul.mubr.msk.f32.gmra.mrb[62].mxu0 %vm1699_vm4, %v9419_v60 }
 0x930   : > { %6673 = vmatprep.mubr.msk.f32.mxu0 %vm1699_vm4, %v9426_v50 }
 0x9e6   : > { %v6563_v22 = vpop.f32.mrb[48].mxu0  ;;  %v6591_v32 = vpop.f32.mrb[56].mxu1 }
 0x9e7   : > { %3863 = vrot.lane.b32.xlu1 %v6563_v22, %s7430_s22  ;;  %v3604_v47 = vpop.f32.mrb[49].mxu0  ;;  %v3709_v7 = vpop.f32.mrb[57].mxu1 }
 0x9e8   : > { %3861 = vrot.lane.b32.xlu0 %v3604_v47, %s7430_s22 }
 0x9ea   : > { %v6566_v8 = vpop.f32.mrb[50].mxu0  ;;  %v6594_v61 = vpop.f32.mrb[58].mxu1 }
 0x9eb   : > { %3867 = vrot.lane.b32.xlu1 %v6566_v8, %s7430_s22  ;;  %v3614_v17 = vpop.f32.mrb[51].mxu0  ;;  %v3719_v5 = vpop.f32.mrb[59].mxu1 }
 0x9ec   : > { %3865 = vrot.lane.b32.xlu0 %v3614_v17, %s7430_s22 }
 0x9ee   : > { %v6569_v0 = vpop.f32.mrb[52].mxu0  ;;  %v6597_v52 = vpop.f32.mrb[60].mxu1 }
 0x9ef   : > { %3871 = vrot.lane.b32.xlu1 %v6569_v0, %s7430_s22  ;;  %v3624_v27 = vpop.f32.mrb[53].mxu0  ;;  %v3729_v21 = vpop.f32.mrb[61].mxu1 }
 0x9f0   : > { %3869 = vrot.lane.b32.xlu0 %v3624_v27, %s7430_s22 }
 0x9f2   : > { %v6572_v38 = vpop.f32.mrb[54].mxu0  ;;  %v9436_v23 = vpop.f32.mrb[62].mxu1 }
 0x9f3   : > { %3875 = vrot.lane.b32.xlu1 %v6572_v38, %s7430_s22  ;;  %v3634_v48 = vpop.f32.mrb[55].mxu0  ;;  %v9439_v59 = vpop.f32.mrb[63].mxu1 }
 0x9f4   : > { %3873 = vrot.lane.b32.xlu0 %v3634_v48, %s7430_s22 }
 0x9f6   : > { %v6619_v22 = vpop.f32.mrb[56].mxu0 }
 0x9f7   : > { %3903 = vrot.lane.b32.xlu1 %v6619_v22, %s7423_s20  ;;  %v3814_v47 = vpop.f32.mrb[57].mxu0 }
 0x9f8   : > { %3901 = vrot.lane.b32.xlu0 %v3814_v47, %s7423_s20 }
 0x9fa   : > { %v6622_v8 = vpop.f32.mrb[58].mxu0 }
 0x9fb   : > { %3907 = vrot.lane.b32.xlu1 %v6622_v8, %s7423_s20  ;;  %v3824_v17 = vpop.f32.mrb[59].mxu0 }
 0x9fc   : > { %3905 = vrot.lane.b32.xlu0 %v3824_v17, %s7423_s20 }
 0x9fe   : > { %v6625_v0 = vpop.f32.mrb[60].mxu0 }
 0x9ff   : > { %3911 = vrot.lane.b32.xlu1 %v6625_v0, %s7423_s20  ;;  %v3834_v27 = vpop.f32.mrb[61].mxu0 }
 0xa00   : > { %3909 = vrot.lane.b32.xlu0 %v3834_v27, %s7423_s20 }
 0xa02   : > { %v6628_v38 = vpop.f32.mrb[62].mxu0 }
 0xa03   : > { %3915 = vrot.lane.b32.xlu1 %v6628_v38, %s7423_s20  ;;  %v3844_v48 = vpop.f32.mrb[63].mxu0 }
 0xa04   : > { %3913 = vrot.lane.b32.xlu0 %v3844_v48, %s7423_s20 }
 0xa59   : > { %v3864_v22 = vpop.permute.xlu1 %3863 }
 0xa5a   : > { %v3862_v47 = vpop.permute.xlu0 %3861  ;;  %v3886_v17 = vsel %vm2119_vm5, 0.0, %v3864_v22 }
 0xa5b   : > { %v3885_v0 = vsel %vm2119_vm5, 0.0, %v3862_v47  ;;  %v3934_v18 = vadd.f32 %v6591_v32, %v3886_v17 }
 0xa5c   : > { %v3933_v15 = vadd.f32 %v3885_v0, %v3709_v7 }
 0xa5d   : > { %v3868_v30 = vpop.permute.xlu1 %3867 }
 0xa5e   : > { %v3866_v54 = vpop.permute.xlu0 %3865  ;;  %v3888_v38 = vsel %vm2119_vm5, 0.0, %v3868_v30 }
 0xa5f   : > { %v3887_v28 = vsel %vm2119_vm5, 0.0, %v3866_v54  ;;  %v3936_v36 = vadd.f32 %v6594_v61, %v3888_v38 }
 0xa60   : > { %v3935_v57 = vadd.f32 %v3887_v28, %v3719_v5 }
 0xa61   : > { %v3872_v8 = vpop.permute.xlu1 %3871 }
 0xa62   : > { %v3870_v35 = vpop.permute.xlu0 %3869  ;;  %v3890_v32 = vsel %vm2119_vm5, 0.0, %v3872_v8 }
 0xa63   : > { %v3889_v7 = vsel %vm2119_vm5, 0.0, %v3870_v35 }
 0xa64   : > { %v3937_v28 = vadd.f32 %v3889_v7, %v3729_v21 }
 0xa65   : > { %v3876_v2 = vpop.permute.xlu1 %3875 }
 0xa66   : > { %v3874_v3 = vpop.permute.xlu0 %3873  ;;  %v3892_v5 = vsel %vm2119_vm5, 0.0, %v3876_v2 }
 0xa67   : > { %v3940_v21 = vadd.f32 %v9436_v23, %v3892_v5 }
 0xa69   : > { %v3904_v27 = vpop.permute.xlu1 %3903 }
 0xa6a   : > { %v3926_v48 = vsel %vm2160_vm6, %v3904_v27, 0.0  ;;  %v3902_v9 = vpop.permute.xlu0 %3901  ;;  %v3891_v27 = vsel %vm2119_vm5, 0.0, %v3874_v3 }
 0xa6b   : > { %v3942_v44 = vadd.f32 %v3934_v18, %v3926_v48  ;;  %v3925_v37 = vsel %vm2160_vm6, %v3902_v9, 0.0 }
 0xa6c   : > { %v3941_v42 = vadd.f32 %v3933_v15, %v3925_v37  ;;  %v3938_v37 = vadd.f32 %v6597_v52, %v3890_v32  ;;  %v3939_v32 = vadd.f32 %v3891_v27, %v9439_v59 }
 0xa6d   : > { %v3950_v22 = vadd.f32 %v3942_v44, %v8826_v16  ;;  %v3908_v53 = vpop.permute.xlu1 %3907 }
 0xa6e   : > { %v3949_v30 = vadd.f32 %v3941_v42, %v8828_v13  ;;  %v3928_v54 = vsel %vm2160_vm6, %v3908_v53, 0.0  ;;  %v3906_v47 = vpop.permute.xlu0 %3905 }
 0xa6f   : > { %v3958_v17 = vmax.f32 %v3950_v22, 0.0  ;;  %v3944_v0 = vadd.f32 %v3936_v36, %v3928_v54  ;;  %v3927_v18 = vsel %vm2160_vm6, %v3906_v47, 0.0 }
 0xa70   : > { %v3957_v9 = vmax.f32 %v3949_v30, 0.0  ;;  %v3943_v15 = vadd.f32 %v3935_v57, %v3927_v18 }
 0xa71   : > { %v3952_v44 = vadd.f32 %v3944_v0, %v8830_v41  ;;  %v3912_v61 = vpop.permute.xlu1 %3911 }
 0xa72   : > { %v7179_v8 = vpack.c.bf16 %v3958_v17, %v3957_v9  ;;  %v3951_v35 = vadd.f32 %v3943_v15, %v8832_v29  ;;  %v3930_v42 = vsel %vm2160_vm6, %v3912_v61, 0.0  ;;  %v3910_v53 = vpop.permute.xlu0 %3909 }
 0xa73   : > { %v3960_v36 = vmax.f32 %v3952_v44, 0.0  ;;  %v3946_v38 = vadd.f32 %v3938_v37, %v3930_v42  ;;  %v3929_v48 = vsel %vm2160_vm6, %v3910_v53, 0.0 }
 0xa74   : > { %v3959_v57 = vmax.f32 %v3951_v35, 0.0  ;;  %v3945_v52 = vadd.f32 %v3937_v28, %v3929_v48  ;;  %7180 = vmatprep.subr.bf16.mxu1 %v7179_v8  ;;  %7196 = vmatprep.subr.bf16.mxu0 %v7179_v8 }
 0xa75   : > { %v3954_v2 = vadd.f32 %v3946_v38, %v8834_v46  ;;  %7182 = vmatpush3.bf16.msra.mxu1 %v7179_v8  ;;  %7198 = vmatpush3.bf16.msra.mxu0 %v7179_v8  ;;  %v3916_v22 = vpop.permute.xlu1 %3915 }
 0xa76   : > { %v7183_v7 = vpack.c.bf16 %v3960_v36, %v3959_v57  ;;  %v3953_v3 = vadd.f32 %v3945_v52, %v8836_v19  ;;  %v3932_v30 = vsel %vm2160_vm6, %v3916_v22, 0.0  ;;  %v3914_v54 = vpop.permute.xlu0 %3913 }
 0xa77   : > { %v3962_v47 = vmax.f32 %v3954_v2, 0.0  ;;  %v3948_v17 = vadd.f32 %v3940_v21, %v3932_v30  ;;  %v3931_v0 = vsel %vm2160_vm6, %v3914_v54, 0.0 }
 0xa78   : > { %v3961_v18 = vmax.f32 %v3953_v3, 0.0  ;;  %v3947_v9 = vadd.f32 %v3939_v32, %v3931_v0  ;;  %7184 = vmatprep.subr.bf16.mxu1 %v7183_v7  ;;  %7200 = vmatprep.subr.bf16.mxu0 %v7183_v7 }
 0xa79   : > { %v3956_v23 = vadd.f32 %v3948_v17, %v8838_v34  ;;  %7186 = vmatpush3.bf16.msra.mxu1 %v7183_v7  ;;  %7202 = vmatpush3.bf16.msra.mxu0 %v7183_v7 }
 0xa7a   : > { %v7187_v15 = vpack.c.bf16 %v3962_v47, %v3961_v18  ;;  %v3955_v59 = vadd.f32 %v3947_v9, %v8840_v39 }
 0xa7b   : > { %v3964_v37 = vmax.f32 %v3956_v23, 0.0 }
 0xa7c   : > { %v3963_v28 = vmax.f32 %v3955_v59, 0.0  ;;  %7188 = vmatprep.subr.bf16.mxu1 %v7187_v15  ;;  %7204 = vmatprep.subr.bf16.mxu0 %v7187_v15 }
 0xa7d   : > { %7190 = vmatpush3.bf16.msra.mxu1 %v7187_v15  ;;  %7206 = vmatpush3.bf16.msra.mxu0 %v7187_v15 }
 0xa7e   : > { %v7191_v44 = vpack.c.bf16 %v3964_v37, %v3963_v28 }
 0xa80   : > { %7192 = vmatprep.subr.bf16.mxu1 %v7191_v44  ;;  %7208 = vmatprep.subr.bf16.mxu0 %v7191_v44 }
 0xa81   : > { %7194 = vmatpush3.bf16.msra.mxu1 %v7191_v44  ;;  %7210 = vmatpush3.bf16.msra.mxu0 %v7191_v44 }
 0xa82   : > { %7212 = vmatprep.subr.bf16.mxu1 %v7179_v8 }
 0xa84   : > { %6646 = vmatmul.mubr.msk.f32.vlgmr.msra.gmra.mrb[64].mxu1 %vm1699_vm4, %v9305_v6  ;;  %6674 = vmatmul.mubr.msk.f32.vlgmr.msra.gmra.mrb[64].mxu0 %vm1699_vm4, %v9312_v31 }
 0xa85   : > { %7214 = vmatpush3.bf16.msra.mxu1 %v7179_v8  ;;  %6648 = vmatprep.mubr.msk.f32.mxu1 %vm1699_vm4, %v9319_v20 }
 0xa86   : > { %7216 = vmatprep.subr.bf16.mxu1 %v7183_v7  ;;  %6676 = vmatprep.mubr.msk.f32.mxu0 %vm1699_vm4, %v9326_v58 }
 0xa88   : > { %6649 = vmatmul.mubr.msk.f32.gmra.mrb[66].mxu1 %vm1699_vm4, %v9333_v33  ;;  %6677 = vmatmul.mubr.msk.f32.gmra.mrb[66].mxu0 %vm1699_vm4, %v9340_v62 }
 0xa89   : > { %7218 = vmatpush3.bf16.msra.mxu1 %v7183_v7  ;;  %6651 = vmatprep.mubr.msk.f32.mxu1 %vm1699_vm4, %v9347_v1 }
 0xa8a   : > { %7220 = vmatprep.subr.bf16.mxu1 %v7187_v15  ;;  %6679 = vmatprep.mubr.msk.f32.mxu0 %vm1699_vm4, %v9354_v51 }
 0xa8c   : > { %6652 = vmatmul.mubr.msk.f32.gmra.mrb[68].mxu1 %vm1699_vm4, %v9361_v11  ;;  %6680 = vmatmul.mubr.msk.f32.gmra.mrb[68].mxu0 %vm1699_vm4, %v9368_v10 }
 0xa8d   : > { %7222 = vmatpush3.bf16.msra.mxu1 %v7187_v15  ;;  %6654 = vmatprep.mubr.msk.f32.mxu1 %vm1699_vm4, %v9375_v43 }
 0xa8e   : > { %7224 = vmatprep.subr.bf16.mxu1 %v7191_v44  ;;  %6682 = vmatprep.mubr.msk.f32.mxu0 %vm1699_vm4, %v9382_v45 }
 0xa90   : > { %6655 = vmatmul.mubr.msk.f32.gmra.mrb[70].mxu1 %vm1699_vm4, %v9389_v4  ;;  %6683 = vmatmul.mubr.msk.f32.gmra.mrb[70].mxu0 %vm1699_vm4, %v9396_v55 }
 0xa91   : > { %7226 = vmatpush3.bf16.msra.mxu1 %v7191_v44  ;;  %6701 = vmatprep.mubr.msk.f32.mxu1 %vm1699_vm4, %v9143_v26 }
 0xa92   : > { %6729 = vmatprep.mubr.msk.f32.mxu0 %vm1699_vm4, %v9150_v12 }
 0xa94   : > { %6702 = vmatmul.mubr.msk.f32.vlgmr.msra.gmra.mrb[72].mxu1 %vm1699_vm4, %v9157_v63 }
 0xa95   : > { %6704 = vmatprep.mubr.msk.f32.mxu1 %vm1699_vm4, %v9164_v24 }
 0xa98   : > { %6705 = vmatmul.mubr.msk.f32.gmra.mrb[74].mxu1 %vm1699_vm4, %v9171_v56 }
 0xa99   : > { %6707 = vmatprep.mubr.msk.f32.mxu1 %vm1699_vm4, %v9178_v40 }
 0xa9c   : > { %6708 = vmatmul.mubr.msk.f32.gmra.mrb[76].mxu1 %vm1699_vm4, %v9185_v49 }
 0xa9d   : > { %6710 = vmatprep.mubr.msk.f32.mxu1 %vm1699_vm4, %v9192_v14 }
 0xaa0   : > { %6711 = vmatmul.mubr.msk.f32.gmra.mrb[78].mxu1 %vm1699_vm4, %v9419_v60 }
 0xaa1   : > { %6757 = vmatprep.mubr.msk.f32.mxu1 %vm1699_vm4, %v9426_v50 }
 0xb57   : > { %v6647_v61 = vpop.f32.mrb[64].mxu1  ;;  %v6675_v5 = vpop.f32.mrb[64].mxu0 }
 0xb58   : > { %4290 = vrot.lane.b32.xlu1 %v6647_v61, %s7430_s22  ;;  %v4031_v8 = vpop.f32.mrb[65].mxu1  ;;  %v4136_v35 = vpop.f32.mrb[65].mxu0 }
 0xb59   : > { %4288 = vrot.lane.b32.xlu0 %v4031_v8, %s7430_s22 }
 0xb5b   : > { %v6650_v42 = vpop.f32.mrb[66].mxu1  ;;  %v6678_v53 = vpop.f32.mrb[66].mxu0 }
 0xb5c   : > { %4294 = vrot.lane.b32.xlu1 %v6650_v42, %s7430_s22  ;;  %v4041_v27 = vpop.f32.mrb[67].mxu1  ;;  %v4146_v36 = vpop.f32.mrb[67].mxu0 }
 0xb5d   : > { %4292 = vrot.lane.b32.xlu0 %v4041_v27, %s7430_s22 }
 0xb5f   : > { %v6653_v38 = vpop.f32.mrb[68].mxu1  ;;  %v6681_v48 = vpop.f32.mrb[68].mxu0 }
 0xb60   : > { %4298 = vrot.lane.b32.xlu1 %v6653_v38, %s7430_s22  ;;  %v4051_v57 = vpop.f32.mrb[69].mxu1  ;;  %v4156_v52 = vpop.f32.mrb[69].mxu0 }
 0xb61   : > { %4296 = vrot.lane.b32.xlu0 %v4051_v57, %s7430_s22 }
 0xb63   : > { %v6656_v21 = vpop.f32.mrb[70].mxu1  ;;  %v9530_v2 = vpop.f32.mrb[70].mxu0 }
 0xb64   : > { %4302 = vrot.lane.b32.xlu1 %v6656_v21, %s7430_s22  ;;  %v4061_v22 = vpop.f32.mrb[71].mxu1  ;;  %v9533_v32 = vpop.f32.mrb[71].mxu0 }
 0xb65   : > { %4300 = vrot.lane.b32.xlu0 %v4061_v22, %s7430_s22 }
 0xb67   : > { %v6703_v7 = vpop.f32.mrb[72].mxu1 }
 0xb68   : > { %4330 = vrot.lane.b32.xlu1 %v6703_v7, %s7423_s20  ;;  %v4241_v3 = vpop.f32.mrb[73].mxu1 }
 0xb69   : > { %4328 = vrot.lane.b32.xlu0 %v4241_v3, %s7423_s20 }
 0xb6b   : > { %v6706_v30 = vpop.f32.mrb[74].mxu1 }
 0xb6c   : > { %4334 = vrot.lane.b32.xlu1 %v6706_v30, %s7423_s20  ;;  %v4251_v54 = vpop.f32.mrb[75].mxu1 }
 0xb6d   : > { %4332 = vrot.lane.b32.xlu0 %v4251_v54, %s7423_s20 }
 0xb6f   : > { %v6709_v47 = vpop.f32.mrb[76].mxu1 }
 0xb70   : > { %4338 = vrot.lane.b32.xlu1 %v6709_v47, %s7423_s20  ;;  %v4261_v17 = vpop.f32.mrb[77].mxu1 }
 0xb71   : > { %4336 = vrot.lane.b32.xlu0 %v4261_v17, %s7423_s20 }
 0xb73   : > { %v6712_v0 = vpop.f32.mrb[78].mxu1 }
 0xb74   : > { %4342 = vrot.lane.b32.xlu1 %v6712_v0, %s7423_s20  ;;  %v4271_v18 = vpop.f32.mrb[79].mxu1 }
 0xb75   : > { %4340 = vrot.lane.b32.xlu0 %v4271_v18, %s7423_s20 }
 0xbca   : > { %v4291_v9 = vpop.permute.xlu1 %4290 }
 0xbcb   : > { %v4289_v23 = vpop.permute.xlu0 %4288  ;;  %v4313_v61 = vsel %vm2119_vm5, 0.0, %v4291_v9 }
 0xbcc   : > { %v4312_v42 = vsel %vm2119_vm5, 0.0, %v4289_v23  ;;  %v4361_v27 = vadd.f32 %v6675_v5, %v4313_v61  ;;  %v10023_v61 = vmax.f32 %v9233_v25, 0.0 }
 0xbcd   : > { %v4360_v57 = vadd.f32 %v4312_v42, %v4136_v35 }
 0xbce   : > { %v4295_v15 = vpop.permute.xlu1 %4294 }
 0xbcf   : > { %v4293_v59 = vpop.permute.xlu0 %4292  ;;  %v4315_v21 = vsel %vm2119_vm5, 0.0, %v4295_v15 }
 0xbd0   : > { %v4314_v22 = vsel %vm2119_vm5, 0.0, %v4293_v59  ;;  %v4363_v17 = vadd.f32 %v6678_v53, %v4315_v21 }
 0xbd1   : > { %v4362_v0 = vadd.f32 %v4314_v22, %v4146_v36  ;;  %v10024_v36 = vld [vmem:[#allocation8_spill] sm:$0xff] }
 0xbd2   : > { %v4299_v37 = vpop.permute.xlu1 %4298 }
 0xbd3   : > { %v4297_v28 = vpop.permute.xlu0 %4296  ;;  %v4317_v5 = vsel %vm2119_vm5, 0.0, %v4299_v37 }
 0xbd4   : > { %v4316_v35 = vsel %vm2119_vm5, 0.0, %v4297_v28  ;;  %v4365_v37 = vadd.f32 %v6681_v48, %v4317_v5 }
 0xbd5   : > { %v4364_v22 = vadd.f32 %v4316_v35, %v4156_v52  ;;  %v10028_v35 = vld [vmem:[#allocation4_spill] sm:$0xff] }
 0xbd6   : > { %v4303_v44 = vpop.permute.xlu1 %4302 }
 0xbd7   : > { %v4301_v8 = vpop.permute.xlu0 %4300 }
 0xbda   : > { %v4331_v38 = vpop.permute.xlu1 %4330 }
 0xbdb   : > { %v4353_v7 = vsel %vm2160_vm6, %v4331_v38, 0.0  ;;  %v4329_v3 = vpop.permute.xlu0 %4328  ;;  %v10025_v38 = vmax.f32 %v10024_v36, 0.0 }
 0xbdc   : > { %v4369_v30 = vadd.f32 %v4361_v27, %v4353_v7  ;;  %v4352_v54 = vsel %vm2160_vm6, %v4329_v3, 0.0 }
 0xbdd   : > { %v4368_v47 = vadd.f32 %v4360_v57, %v4352_v54 }
 0xbde   : > { %v4377_v18 = vadd.f32 %v4369_v30, %v8826_v16  ;;  %v4335_v9 = vpop.permute.xlu1 %4334  ;;  %v4319_v30 = vsel %vm2119_vm5, 0.0, %v4303_v44 }
 0xbdf   : > { %v4376_v23 = vadd.f32 %v4368_v47, %v8828_v13  ;;  %v4355_v15 = vsel %vm2160_vm6, %v4335_v9, 0.0  ;;  %v4333_v59 = vpop.permute.xlu0 %4332  ;;  %v10026_v9 = vld [vmem:[#allocation24_spill] sm:$0xff] }
 0xbe0   : > { %v9557_v42 = vadd.f32 %v4377_v18, %v10023_v61  ;;  %v4371_v27 = vadd.f32 %v4363_v17, %v4355_v15  ;;  %v4354_v53 = vsel %vm2160_vm6, %v4333_v59, 0.0  ;;  %v4318_v18 = vsel %vm2119_vm5, 0.0, %v4301_v8 }
 0xbe1   : > { %v9562_v57 = vadd.f32 %v4376_v23, %v10025_v38  ;;  %v4370_v21 = vadd.f32 %v4362_v0, %v4354_v53  ;;  %v10027_v0 = vmax.f32 %v10026_v9, 0.0  ;;  %v10029_v23 = vmax.f32 %v10028_v35, 0.0 }
 0xbe2   : > { %v4393_v28 = vmax.f32 %v9557_v42, 0.0  ;;  %v4379_v7 = vadd.f32 %v4371_v27, %v8830_v41  ;;  %v4339_v3 = vpop.permute.xlu1 %4338  ;;  %v4367_v61 = vadd.f32 %v9530_v2, %v4319_v30  ;;  %v4366_v36 = vadd.f32 %v4318_v18, %v9533_v32 }
 0xbe3   : > { %v4392_v25 = vmax.f32 %v9562_v57, 0.0  ;;  %v4378_v54 = vadd.f32 %v4370_v21, %v8832_v29  ;;  %v4357_v47 = vsel %vm2160_vm6, %v4339_v3, 0.0  ;;  %v4337_v17 = vpop.permute.xlu0 %4336  ;;  %v10030_v3 = vld [vmem:[#allocation7_spill] sm:$0xff] }
 0xbe4   : > { %v9573_v48 = vadd.f32 %v4379_v7, %v10027_v0  ;;  %v4373_v52 = vadd.f32 %v4365_v37, %v4357_v47  ;;  %v4356_v5 = vsel %vm2160_vm6, %v4337_v17, 0.0  ;;  %v10032_v47 = vld [vmem:[#allocation16_spill] sm:$0xff] }
 0xbe5   : > { %v7227_v44 = vpack.c.bf16 %v4393_v28, %v4392_v25  ;;  %v9582_v15 = vadd.f32 %v4378_v54, %v10029_v23  ;;  %v4372_v59 = vadd.f32 %v4364_v22, %v4356_v5  ;;  %v10031_v22 = vmax.f32 %v10030_v3, 0.0  ;;  %v10034_v23 = vld [vmem:[#allocation25_spill] sm:$0xff] }
 0xbe6   : > { %v9943_v8 = vmax.f32 %v9573_v48, 0.0  ;;  %v4381_v27 = vadd.f32 %v4373_v52, %v8834_v46  ;;  %v4343_v53 = vpop.permute.xlu1 %4342  ;;  %v10033_v17 = vmax.f32 %v10032_v47, 0.0 }
 0xbe7   : > { %v9944_v38 = vmax.f32 %v9582_v15, 0.0  ;;  %v4380_v21 = vadd.f32 %v4372_v59, %v8836_v19  ;;  %v4359_v37 = vsel %vm2160_vm6, %v4343_v53, 0.0  ;;  %7228 = vmatprep.subr.bf16.mxu0 %v7227_v44  ;;  %7244 = vmatprep.subr.bf16.mxu1 %v7227_v44  ;;  %v4341_v7 = vpop.permute.xlu0 %4340  ;;  %v10035_v59 = vmax.f32 %v10034_v23, 0.0  ;;  %v10036_v53 = vld [vmem:[#allocation9_spill] sm:$0xff] }
 0xbe8   : > { %v9593_v54 = vadd.f32 %v4381_v27, %v10031_v22  ;;  %v4375_v2 = vadd.f32 %v4367_v61, %v4359_v37  ;;  %v4358_v30 = vsel %vm2160_vm6, %v4341_v7, 0.0  ;;  %7230 = vmatpush3.bf16.msra.mxu0 %v7227_v44  ;;  %7246 = vmatpush3.bf16.msra.mxu1 %v7227_v44  ;;  %v10038_v42 = vmax.f32 %v9582_v15, 0.0 }
 0xbe9   : > { %v7231_v32 = vpack.c.bf16 %v9943_v8, %v9944_v38  ;;  %v9602_v18 = vadd.f32 %v4380_v21, %v10033_v17  ;;  %v4374_v9 = vadd.f32 %v4366_v36, %v4358_v30  ;;  %v10037_v36 = vmax.f32 %v10036_v53, 0.0 }
 0xbea   : > { %v9941_v0 = vmax.f32 %v9593_v54, 0.0  ;;  %v4383_v52 = vadd.f32 %v4375_v2, %v8838_v34  ;;  %v10039_v15 = vmax.f32 %v9573_v48, 0.0 }
 0xbeb   : > { %v9942_v5 = vmax.f32 %v9602_v18, 0.0  ;;  %v4382_v35 = vadd.f32 %v4374_v9, %v8840_v39  ;;  %7232 = vmatprep.subr.bf16.mxu0 %v7231_v32  ;;  %7248 = vmatprep.subr.bf16.mxu1 %v7231_v32 }
 0xbec   : > { %v9610_v61 = vadd.f32 %v4383_v52, %v10035_v59  ;;  %7234 = vmatpush3.bf16.msra.mxu0 %v7231_v32  ;;  %7250 = vmatpush3.bf16.msra.mxu1 %v7231_v32 }
 0xbed   : > { %v7235_v27 = vpack.c.bf16 %v9941_v0, %v9942_v5  ;;  %v9618_v21 = vadd.f32 %v4382_v35, %v10037_v36 }
 0xbee   : > { %v9939_v37 = vmax.f32 %v9610_v61, 0.0 }
 0xbef   : > { %v9940_v7 = vmax.f32 %v9618_v21, 0.0  ;;  %7236 = vmatprep.subr.bf16.mxu0 %v7235_v27  ;;  %7252 = vmatprep.subr.bf16.mxu1 %v7235_v27 }
 0xbf0   : > { %7238 = vmatpush3.bf16.msra.mxu0 %v7235_v27  ;;  %7254 = vmatpush3.bf16.msra.mxu1 %v7235_v27 }
 0xbf1   : > { %v7239_v3 = vpack.c.bf16 %v9939_v37, %v9940_v7 }
 0xbf3   : > { %7240 = vmatprep.subr.bf16.mxu0 %v7239_v3  ;;  %7256 = vmatprep.subr.bf16.mxu1 %v7239_v3 }
 0xbf4   : > { %7242 = vmatpush3.bf16.msra.mxu0 %v7239_v3  ;;  %7258 = vmatpush3.bf16.msra.mxu1 %v7239_v3 }
 0xbf5   : > { %7260 = vmatprep.subr.bf16.mxu0 %v7227_v44 }
 0xbf7   : > { %6730 = vmatmul.mubr.msk.f32.vlgmr.msra.gmra.mrb[72].mxu0 %vm1699_vm4, %v9305_v6  ;;  %6758 = vmatmul.mubr.msk.f32.vlgmr.msra.gmra.mrb[80].mxu1 %vm1699_vm4, %v9312_v31 }
 0xbf8   : > { %7262 = vmatpush3.bf16.msra.mxu0 %v7227_v44  ;;  %6732 = vmatprep.mubr.msk.f32.mxu0 %vm1699_vm4, %v9319_v20 }
 0xbf9   : > { %7264 = vmatprep.subr.bf16.mxu0 %v7231_v32  ;;  %6760 = vmatprep.mubr.msk.f32.mxu1 %vm1699_vm4, %v9326_v58 }
 0xbfb   : > { %6733 = vmatmul.mubr.msk.f32.gmra.mrb[74].mxu0 %vm1699_vm4, %v9333_v33  ;;  %6761 = vmatmul.mubr.msk.f32.gmra.mrb[82].mxu1 %vm1699_vm4, %v9340_v62 }
 0xbfc   : > { %7266 = vmatpush3.bf16.msra.mxu0 %v7231_v32  ;;  %6735 = vmatprep.mubr.msk.f32.mxu0 %vm1699_vm4, %v9347_v1 }
 0xbfd   : > { %7268 = vmatprep.subr.bf16.mxu0 %v7235_v27  ;;  %6763 = vmatprep.mubr.msk.f32.mxu1 %vm1699_vm4, %v9354_v51 }
 0xbff   : > { %6736 = vmatmul.mubr.msk.f32.gmra.mrb[76].mxu0 %vm1699_vm4, %v9361_v11  ;;  %6764 = vmatmul.mubr.msk.f32.gmra.mrb[84].mxu1 %vm1699_vm4, %v9368_v10 }
 0xc00   : > { %7270 = vmatpush3.bf16.msra.mxu0 %v7235_v27  ;;  %6738 = vmatprep.mubr.msk.f32.mxu0 %vm1699_vm4, %v9375_v43 }
 0xc01   : > { %7272 = vmatprep.subr.bf16.mxu0 %v7239_v3  ;;  %6766 = vmatprep.mubr.msk.f32.mxu1 %vm1699_vm4, %v9382_v45 }
 0xc03   : > { %6739 = vmatmul.mubr.msk.f32.gmra.mrb[78].mxu0 %vm1699_vm4, %v9389_v4  ;;  %6767 = vmatmul.mubr.msk.f32.gmra.mrb[86].mxu1 %vm1699_vm4, %v9396_v55 }
 0xc04   : > { %7274 = vmatpush3.bf16.msra.mxu0 %v7239_v3  ;;  %6785 = vmatprep.mubr.msk.f32.mxu0 %vm1699_vm4, %v9143_v26 }
 0xc05   : > { %6813 = vmatprep.mubr.msk.f32.mxu1 %vm1699_vm4, %v9150_v12 }
 0xc07   : > { %6786 = vmatmul.mubr.msk.f32.vlgmr.msra.gmra.mrb[80].mxu0 %vm1699_vm4, %v9157_v63 }
 0xc08   : > { %6788 = vmatprep.mubr.msk.f32.mxu0 %vm1699_vm4, %v9164_v24 }
 0xc0b   : > { %6789 = vmatmul.mubr.msk.f32.gmra.mrb[82].mxu0 %vm1699_vm4, %v9171_v56 }
 0xc0c   : > { %6791 = vmatprep.mubr.msk.f32.mxu0 %vm1699_vm4, %v9178_v40 }
 0xc0f   : > { %6792 = vmatmul.mubr.msk.f32.gmra.mrb[84].mxu0 %vm1699_vm4, %v9185_v49 }
 0xc10   : > { %6794 = vmatprep.mubr.msk.f32.mxu0 %vm1699_vm4, %v9192_v14 }
 0xc13   : > { %6795 = vmatmul.mubr.msk.f32.gmra.mrb[86].mxu0 %vm1699_vm4, %v9419_v60 }
 0xc14   : > { %6841 = vmatprep.mubr.msk.f32.mxu0 %vm1699_vm4, %v9426_v50 }
 0xcca   : > { %v6731_v26 = vpop.f32.mrb[72].mxu0  ;;  %v6759_v12 = vpop.f32.mrb[80].mxu1 }
 0xccb   : > { %4725 = vrot.lane.b32.xlu1 %v6731_v26, %s7430_s22  ;;  %v4466_v63 = vpop.f32.mrb[73].mxu0  ;;  %v4571_v24 = vpop.f32.mrb[81].mxu1 }
 0xccc   : > { %4723 = vrot.lane.b32.xlu0 %v4466_v63, %s7430_s22 }
 0xcce   : > { %v6734_v56 = vpop.f32.mrb[74].mxu0  ;;  %v6762_v40 = vpop.f32.mrb[82].mxu1 }
 0xccf   : > { %4729 = vrot.lane.b32.xlu1 %v6734_v56, %s7430_s22  ;;  %v4476_v49 = vpop.f32.mrb[75].mxu0  ;;  %v4581_v14 = vpop.f32.mrb[83].mxu1 }
 0xcd0   : > { %4727 = vrot.lane.b32.xlu0 %v4476_v49, %s7430_s22 }
 0xcd2   : > { %v6737_v44 = vpop.f32.mrb[76].mxu0  ;;  %v6765_v22 = vpop.f32.mrb[84].mxu1 }
 0xcd3   : > { %4733 = vrot.lane.b32.xlu1 %v6737_v44, %s7430_s22  ;;  %v4486_v50 = vpop.f32.mrb[77].mxu0  ;;  %v4591_v2 = vpop.f32.mrb[85].mxu1 }
 0xcd4   : > { %4731 = vrot.lane.b32.xlu0 %v4486_v50, %s7430_s22 }
 0xcd6   : > { %v6740_v30 = vpop.f32.mrb[78].mxu0  ;;  %v9680_v32 = vpop.f32.mrb[86].mxu1 }
 0xcd7   : > { %4737 = vrot.lane.b32.xlu1 %v6740_v30, %s7430_s22  ;;  %v4496_v47 = vpop.f32.mrb[79].mxu0  ;;  %v9683_v17 = vpop.f32.mrb[87].mxu1 }
 0xcd8   : > { %4735 = vrot.lane.b32.xlu0 %v4496_v47, %s7430_s22 }
 0xcda   : > { %v6787_v9 = vpop.f32.mrb[80].mxu0 }
 0xcdb   : > { %4765 = vrot.lane.b32.xlu1 %v6787_v9, %s7423_s20  ;;  %v4676_v52 = vpop.f32.mrb[81].mxu0 }
 0xcdc   : > { %4763 = vrot.lane.b32.xlu0 %v4676_v52, %s7423_s20 }
 0xcde   : > { %v6790_v35 = vpop.f32.mrb[82].mxu0 }
 0xcdf   : > { %4769 = vrot.lane.b32.xlu1 %v6790_v35, %s7423_s20  ;;  %v4686_v23 = vpop.f32.mrb[83].mxu0 }
 0xce0   : > { %4767 = vrot.lane.b32.xlu0 %v4686_v23, %s7423_s20 }
 0xce2   : > { %v6793_v59 = vpop.f32.mrb[84].mxu0 }
 0xce3   : > { %4773 = vrot.lane.b32.xlu1 %v6793_v59, %s7423_s20  ;;  %v4696_v27 = vpop.f32.mrb[85].mxu0 }
 0xce4   : > { %4771 = vrot.lane.b32.xlu0 %v4696_v27, %s7423_s20 }
 0xce6   : > { %v6796_v53 = vpop.f32.mrb[86].mxu0 }
 0xce7   : > { %4777 = vrot.lane.b32.xlu1 %v6796_v53, %s7423_s20  ;;  %v4706_v36 = vpop.f32.mrb[87].mxu0 }
 0xce8   : > { %4775 = vrot.lane.b32.xlu0 %v4706_v36, %s7423_s20 }
 0xd3d   : > { %v4726_v3 = vpop.permute.xlu1 %4725 }
 0xd3e   : > { %v4724_v26 = vpop.permute.xlu0 %4723  ;;  %v4748_v30 = vsel %vm2119_vm5, 0.0, %v4726_v3 }
 0xd3f   : > { %v4747_v9 = vsel %vm2119_vm5, 0.0, %v4724_v26  ;;  %v4796_v52 = vadd.f32 %v6759_v12, %v4748_v30 }
 0xd40   : > { %v4795_v23 = vadd.f32 %v4747_v9, %v4571_v24 }
 0xd41   : > { %v4730_v63 = vpop.permute.xlu1 %4729 }
 0xd42   : > { %v4728_v56 = vpop.permute.xlu0 %4727  ;;  %v4750_v59 = vsel %vm2119_vm5, 0.0, %v4730_v63 }
 0xd43   : > { %v4749_v27 = vsel %vm2119_vm5, 0.0, %v4728_v56  ;;  %v4798_v5 = vadd.f32 %v6762_v40, %v4750_v59 }
 0xd44   : > { %v4797_v8 = vadd.f32 %v4749_v27, %v4581_v14 }
 0xd45   : > { %v4734_v49 = vpop.permute.xlu1 %4733 }
 0xd46   : > { %v4732_v44 = vpop.permute.xlu0 %4731  ;;  %v4752_v12 = vsel %vm2119_vm5, 0.0, %v4734_v49 }
 0xd47   : > { %v4751_v24 = vsel %vm2119_vm5, 0.0, %v4732_v44  ;;  %v4800_v40 = vadd.f32 %v6765_v22, %v4752_v12 }
 0xd48   : > { %v4799_v14 = vadd.f32 %v4751_v24, %v4591_v2 }
 0xd49   : > { %v4738_v50 = vpop.permute.xlu1 %4737 }
 0xd4a   : > { %v4736_v47 = vpop.permute.xlu0 %4735  ;;  %v4754_v49 = vsel %vm2119_vm5, 0.0, %v4738_v50 }
 0xd4b   : > { %v4753_v27 = vsel %vm2119_vm5, 0.0, %v4736_v47  ;;  %v4802_v2 = vadd.f32 %v9680_v32, %v4754_v49 }
 0xd4c   : > { %v4801_v12 = vadd.f32 %v4753_v27, %v9683_v17 }
 0xd4d   : > { %v4766_v35 = vpop.permute.xlu1 %4765 }
 0xd4e   : > { %v4788_v53 = vsel %vm2160_vm6, %v4766_v35, 0.0  ;;  %v4764_v36 = vpop.permute.xlu0 %4763 }
 0xd4f   : > { %v4804_v37 = vadd.f32 %v4796_v52, %v4788_v53  ;;  %v4787_v7 = vsel %vm2160_vm6, %v4764_v36, 0.0 }
 0xd50   : > { %v4803_v0 = vadd.f32 %v4795_v23, %v4787_v7 }
 0xd51   : > { %v4812_v3 = vadd.f32 %v4804_v37, %v8826_v16  ;;  %v4770_v38 = vpop.permute.xlu1 %4769 }
 0xd52   : > { %v4811_v26 = vadd.f32 %v4803_v0, %v8828_v13  ;;  %v4790_v63 = vsel %vm2160_vm6, %v4770_v38, 0.0  ;;  %v4768_v56 = vpop.permute.xlu0 %4767 }
 0xd53   : > { %v4820_v30 = vmax.f32 %v4812_v3, 0.0  ;;  %v4806_v9 = vadd.f32 %v4798_v5, %v4790_v63  ;;  %v4789_v52 = vsel %vm2160_vm6, %v4768_v56, 0.0 }
 0xd54   : > { %v4819_v35 = vmax.f32 %v4811_v26, 0.0  ;;  %v4805_v7 = vadd.f32 %v4797_v8, %v4789_v52 }
 0xd55   : > { %v4814_v37 = vadd.f32 %v4806_v9, %v8830_v41  ;;  %v4774_v23 = vpop.permute.xlu1 %4773 }
 0xd56   : > { %v7275_v59 = vpack.c.bf16 %v4820_v30, %v4819_v35  ;;  %v4813_v44 = vadd.f32 %v4805_v7, %v8832_v29  ;;  %v4792_v0 = vsel %vm2160_vm6, %v4774_v23, 0.0  ;;  %v4772_v38 = vpop.permute.xlu0 %4771 }
 0xd57   : > { %v4822_v5 = vmax.f32 %v4814_v37, 0.0  ;;  %v4808_v53 = vadd.f32 %v4800_v40, %v4792_v0  ;;  %v4791_v36 = vsel %vm2160_vm6, %v4772_v38, 0.0  ;;  %v5257_v0 = vld [vmem:[%s9906_s6 + $0x18] sm:$0xff] }
 0xd58   : > { %v4821_v8 = vmax.f32 %v4813_v44, 0.0  ;;  %v4807_v22 = vadd.f32 %v4799_v14, %v4791_v36  ;;  %7276 = vmatprep.subr.bf16.mxu1 %v7275_v59  ;;  %7292 = vmatprep.subr.bf16.mxu0 %v7275_v59  ;;  %v5256_v44 = vld [vmem:[%s9906_s6 + $0x10] sm:$0xff] }
 0xd59   : > { %v4816_v50 = vadd.f32 %v4808_v53, %v8834_v46  ;;  %7278 = vmatpush3.bf16.msra.mxu1 %v7275_v59  ;;  %7294 = vmatpush3.bf16.msra.mxu0 %v7275_v59  ;;  %v4778_v3 = vpop.permute.xlu1 %4777  ;;  %v7327_v38 = vpack.c.bf16 %v5257_v0, %v5256_v44 }
 0xd5a   : > { %v7279_v24 = vpack.c.bf16 %v4822_v5, %v4821_v8  ;;  %v4815_v47 = vadd.f32 %v4807_v22, %v8836_v19  ;;  %v4794_v26 = vsel %vm2160_vm6, %v4778_v3, 0.0  ;;  %v4776_v63 = vpop.permute.xlu0 %4775  ;;  %v5258_v8 = vld [vmem:[%s9906_s6 + $0x20] sm:$0xff]  ;;  %v5259_v22 = vld [vmem:[%s9906_s6 + $0x28] sm:$0x1] }
 0xd5b   : > { %v4824_v56 = vmax.f32 %v4816_v50, 0.0  ;;  %v4810_v30 = vadd.f32 %v4802_v2, %v4794_v26  ;;  %v4793_v9 = vsel %vm2160_vm6, %v4776_v63, 0.0  ;;  %v7331_v2 = vpack.c.bf16 %v5259_v22, %v5258_v8 }
 0xd5c   : > { %v4823_v52 = vmax.f32 %v4815_v47, 0.0  ;;  %v4809_v35 = vadd.f32 %v4801_v12, %v4793_v9  ;;  %7280 = vmatprep.subr.bf16.mxu1 %v7279_v24  ;;  %7296 = vmatprep.subr.bf16.mxu0 %v7279_v24 }
 0xd5d   : > { %v4818_v32 = vadd.f32 %v4810_v30, %v8838_v34  ;;  %7282 = vmatpush3.bf16.msra.mxu1 %v7279_v24  ;;  %7298 = vmatpush3.bf16.msra.mxu0 %v7279_v24 }
 0xd5e   : > { %v7283_v7 = vpack.c.bf16 %v4824_v56, %v4823_v52  ;;  %v4817_v17 = vadd.f32 %v4809_v35, %v8840_v39 }
 0xd5f   : > { %v4826_v40 = vmax.f32 %v4818_v32, 0.0 }
 0xd60   : > { %v4825_v14 = vmax.f32 %v4817_v17, 0.0  ;;  %7284 = vmatprep.subr.bf16.mxu1 %v7283_v7  ;;  %7300 = vmatprep.subr.bf16.mxu0 %v7283_v7 }
 0xd61   : > { %7286 = vmatpush3.bf16.msra.mxu1 %v7283_v7  ;;  %7302 = vmatpush3.bf16.msra.mxu0 %v7283_v7 }
 0xd62   : > { %v7287_v37 = vpack.c.bf16 %v4826_v40, %v4825_v14 }
 0xd64   : > { %7288 = vmatprep.subr.bf16.mxu1 %v7287_v37  ;;  %7304 = vmatprep.subr.bf16.mxu0 %v7287_v37 }
 0xd65   : > { %7290 = vmatpush3.bf16.msra.mxu1 %v7287_v37  ;;  %7306 = vmatpush3.bf16.msra.mxu0 %v7287_v37 }
 0xd66   : > { %7308 = vmatprep.subr.bf16.mxu1 %v7275_v59 }
 0xd68   : > { %6814 = vmatmul.mubr.msk.f32.vlgmr.msra.gmra.mrb[88].mxu1 %vm1699_vm4, %v9305_v6  ;;  %6842 = vmatmul.mubr.msk.f32.vlgmr.msra.gmra.mrb[88].mxu0 %vm1699_vm4, %v9312_v31  ;;  %v7406_v6 = vld [vmem:[%s9903_s3 + $0x80] sm:$0xff]  ;;  %v7407_v31 = vld [vmem:[%s9903_s3 + $0x88] sm:$0xff] }
 0xd69   : > { %7310 = vmatpush3.bf16.msra.mxu1 %v7275_v59  ;;  %6816 = vmatprep.mubr.msk.f32.mxu1 %vm1699_vm4, %v9319_v20  ;;  %v7408_v20 = vld [vmem:[%s9903_s3 + $0x90] sm:$0xff] }
 0xd6a   : > { %7312 = vmatprep.subr.bf16.mxu1 %v7279_v24  ;;  %6844 = vmatprep.mubr.msk.f32.mxu0 %vm1699_vm4, %v9326_v58  ;;  %v7409_v58 = vld [vmem:[%s9903_s3 + $0x98] sm:$0xff] }
 0xd6c   : > { %6817 = vmatmul.mubr.msk.f32.gmra.mrb[90].mxu1 %vm1699_vm4, %v9333_v33  ;;  %6845 = vmatmul.mubr.msk.f32.gmra.mrb[90].mxu0 %vm1699_vm4, %v9340_v62  ;;  %v7410_v33 = vld [vmem:[%s9903_s3 + $0xa0] sm:$0xff]  ;;  %v7411_v62 = vld [vmem:[%s9903_s3 + $0xa8] sm:$0xff] }
 0xd6d   : > { %7314 = vmatpush3.bf16.msra.mxu1 %v7279_v24  ;;  %6819 = vmatprep.mubr.msk.f32.mxu1 %vm1699_vm4, %v9347_v1  ;;  %v7412_v1 = vld [vmem:[%s9903_s3 + $0xb0] sm:$0xff] }
 0xd6e   : > { %7316 = vmatprep.subr.bf16.mxu1 %v7283_v7  ;;  %6847 = vmatprep.mubr.msk.f32.mxu0 %vm1699_vm4, %v9354_v51 }
 0xd70   : > { %6820 = vmatmul.mubr.msk.f32.gmra.mrb[92].mxu1 %vm1699_vm4, %v9361_v11  ;;  %6848 = vmatmul.mubr.msk.f32.gmra.mrb[92].mxu0 %vm1699_vm4, %v9368_v10 }
 0xd71   : > { %7318 = vmatpush3.bf16.msra.mxu1 %v7283_v7  ;;  %6822 = vmatprep.mubr.msk.f32.mxu1 %vm1699_vm4, %v9375_v43 }
 0xd72   : > { %7320 = vmatprep.subr.bf16.mxu1 %v7287_v37  ;;  %6850 = vmatprep.mubr.msk.f32.mxu0 %vm1699_vm4, %v9382_v45  ;;  %v5254_v45 = vld [vmem:[%s9906_s6] sm:$0xff] }
 0xd74   : > { %6823 = vmatmul.mubr.msk.f32.gmra.mrb[94].mxu1 %vm1699_vm4, %v9389_v4  ;;  %6851 = vmatmul.mubr.msk.f32.gmra.mrb[94].mxu0 %vm1699_vm4, %v9396_v55  ;;  %v5255_v4 = vld [vmem:[%s9906_s6 + $0x8] sm:$0xff] }
 0xd75   : > { %7322 = vmatpush3.bf16.msra.mxu1 %v7287_v37  ;;  %6869 = vmatprep.mubr.msk.f32.mxu1 %vm1699_vm4, %v7406_v6  ;;  %v7323_v55 = vpack.c.bf16 %v5255_v4, %v5254_v45 }
 0xd77   : > { %7324 = vmatprep.subr.bf16.mxu0 %v7323_v55  ;;  %7337 = vmatprep.subr.bf16.mxu1 %v7323_v55 }
 0xd78   : > { %6870 = vmatmul.mubr.msk.f32.vlgmr.msra.gmra.mrb[96].mxu1 %vm1699_vm4, %v7407_v31  ;;  %7326 = vmatpush3.bf16.msra.mxu0 %v7323_v55 }
 0xd79   : > { %6872 = vmatprep.mubr.msk.f32.mxu1 %vm1699_vm4, %v7408_v20  ;;  %7340 = vmatpush3.bf16.msra.mxu1 %v7323_v55 }
 0xd7a   : > { %7328 = vmatprep.subr.bf16.mxu0 %v7327_v38  ;;  %7338 = vmatprep.subr.bf16.mxu1 %v7327_v38 }
 0xd7c   : > { %6873 = vmatmul.mubr.msk.f32.gmra.mrb[98].mxu1 %vm1699_vm4, %v7409_v58  ;;  %7330 = vmatpush3.bf16.msra.mxu0 %v7327_v38 }
 0xd7d   : > { %6875 = vmatprep.mubr.msk.f32.mxu1 %vm1699_vm4, %v7410_v33  ;;  %7341 = vmatpush3.bf16.msra.mxu1 %v7327_v38 }
 0xd7e   : > { %7333 = vmatprep.subr.msk.bf16.mxu0 %vm7332_vm8, %v7331_v2  ;;  %7339 = vmatprep.subr.msk.bf16.mxu1 %vm7332_vm8, %v7331_v2 }
 0xd80   : > { %6876 = vmatmul.mubr.msk.f32.gmra.mrb[100].mxu1 %vm1699_vm4, %v7411_v62  ;;  %7336 = vmatpush3.bf16.msk.msra.mxu0 %vm7332_vm8, %v7331_v2 }
 0xd81   : > { %6878 = vmatprep.mubr.msk.f32.mxu1 %vm1699_vm4, %v7412_v1  ;;  %7342 = vmatpush3.bf16.msk.msra.mxu1 %vm7332_vm8, %v7331_v2 }
 0xd84   : > { %6879 = vmatmul.mubr.msk.f32.gmra.mrb[102].mxu1 %vm1699_vm4, %v9419_v60 }
 0xe3b   : > { %v6815_v51 = vpop.f32.mrb[88].mxu1  ;;  %v9778_v11 = vpop.f32.mrb[88].mxu0 }
 0xe3c   : > { %5152 = vrot.lane.b32.xlu0 %v6815_v51, %s7430_s22  ;;  %v4893_v10 = vpop.f32.mrb[89].mxu1  ;;  %v9781_v43 = vpop.f32.mrb[89].mxu0 }
 0xe3f   : > { %v6818_v23 = vpop.f32.mrb[90].mxu1  ;;  %v9789_v49 = vpop.f32.mrb[90].mxu0 }
 0xe40   : > { %5150 = vrot.lane.b32.xlu0 %v4893_v10, %s7430_s22  ;;  %v4903_v60 = vpop.f32.mrb[91].mxu1  ;;  %v9792_v59 = vpop.f32.mrb[91].mxu0 }
 0xe43   : > { %v6821_v27 = vpop.f32.mrb[92].mxu1  ;;  %v9800_v5 = vpop.f32.mrb[92].mxu0 }
 0xe44   : > { %5156 = vrot.lane.b32.xlu0 %v6818_v23, %s7430_s22  ;;  %5160 = vrot.lane.b32.xlu1 %v6821_v27, %s7430_s22  ;;  %v4913_v53 = vpop.f32.mrb[93].mxu1  ;;  %v9804_v36 = vpop.f32.mrb[93].mxu0 }
 0xe47   : > { %v6824_v50 = vpop.f32.mrb[94].mxu1  ;;  %v9813_v3 = vpop.f32.mrb[94].mxu0 }
 0xe48   : > { %5154 = vrot.lane.b32.xlu0 %v4903_v60, %s7430_s22  ;;  %5158 = vrot.lane.b32.xlu1 %v4913_v53, %s7430_s22  ;;  %v4923_v12 = vpop.f32.mrb[95].mxu1  ;;  %v9817_v24 = vpop.f32.mrb[95].mxu0 }
 0xe4b   : > { %v6871_v47 = vpop.f32.mrb[96].mxu1 }
 0xe4c   : > { %5164 = vrot.lane.b32.xlu1 %v6824_v50, %s7430_s22  ;;  %5192 = vrot.lane.b32.xlu0 %v6871_v47, %s7423_s20  ;;  %v5103_v26 = vpop.f32.mrb[97].mxu1 }
 0xe4f   : > { %v6874_v63 = vpop.f32.mrb[98].mxu1 }
 0xe50   : > { %5162 = vrot.lane.b32.xlu1 %v4923_v12, %s7430_s22  ;;  %5190 = vrot.lane.b32.xlu0 %v5103_v26, %s7423_s20  ;;  %v5113_v56 = vpop.f32.mrb[99].mxu1 }
 0xe53   : > { %v6877_v30 = vpop.f32.mrb[100].mxu1 }
 0xe54   : > { %5194 = vrot.lane.b32.xlu0 %v5113_v56, %s7423_s20  ;;  %5200 = vrot.lane.b32.xlu1 %v6877_v30, %s7423_s20  ;;  %v5123_v9 = vpop.f32.mrb[101].mxu1 }
 0xe57   : > { %v6880_v52 = vpop.f32.mrb[102].mxu1 }
 0xe58   : > { %5196 = vrot.lane.b32.xlu0 %v6874_v63, %s7423_s20  ;;  %5198 = vrot.lane.b32.xlu1 %v5123_v9, %s7423_s20  ;;  %v5133_v35 = vpop.f32.mrb[103].mxu1 }
 0xe5c   : > { %5202 = vrot.lane.b32.xlu1 %v5133_v35, %s7423_s20 }
 0xe60   : > { %5204 = vrot.lane.b32.xlu1 %v6880_v52, %s7423_s20  ;;  %s5742_s20 = sshll.u32 %s10045_s25, 6 }
 0xe61   : > { %s275_s21 = scalar_lea.vmem %s9907_s7, %s5742_s20 }
 0xeae   : > { %v5153_v32 = vpop.permute.xlu0 %5152 }
 0xeaf   : > { %v5175_v6 = vsel %vm2119_vm5, 0.0, %v5153_v32 }
 0xeb0   : > { %v5223_v58 = vadd.f32 %v9778_v11, %v5175_v6 }
 0xeb2   : > { %v5151_v7 = vpop.permute.xlu0 %5150 }
 0xeb3   : > { %v5174_v33 = vsel %vm2119_vm5, 0.0, %v5151_v7 }
 0xeb4   : > { %v5222_v51 = vadd.f32 %v5174_v33, %v9781_v43 }
 0xeb6   : > { %v5157_v17 = vpop.permute.xlu0 %5156  ;;  %v5161_v40 = vpop.permute.xlu1 %5160 }
 0xeb7   : > { %v5179_v23 = vsel %vm2119_vm5, 0.0, %v5161_v40  ;;  %v5177_v11 = vsel %vm2119_vm5, 0.0, %v5157_v17  ;;  %v10040_v40 = vmax.f32 %v9602_v18, 0.0  ;;  %v10042_v18 = vmax.f32 %v9618_v21, 0.0 }
 0xeb8   : > { %v5227_v43 = vadd.f32 %v9800_v5, %v5179_v23 }
 0xeba   : > { %v5155_v14 = vpop.permute.xlu0 %5154  ;;  %v5159_v37 = vpop.permute.xlu1 %5158 }
 0xebb   : > { %v5176_v4 = vsel %vm2119_vm5, 0.0, %v5155_v14  ;;  %v5178_v8 = vsel %vm2119_vm5, 0.0, %v5159_v37 }
 0xebc   : > { %v5224_v0 = vadd.f32 %v5176_v4, %v9792_v59  ;;  %v5226_v47 = vadd.f32 %v5178_v8, %v9804_v36 }
 0xebe   : > { %v5165_v31 = vpop.permute.xlu1 %5164  ;;  %v5193_v20 = vpop.permute.xlu0 %5192 }
 0xebf   : > { %v5215_v62 = vsel %vm2160_vm6, %v5193_v20, 0.0  ;;  %v5181_v32 = vsel %vm2119_vm5, 0.0, %v5165_v31 }
 0xec0   : > { %v5231_v1 = vadd.f32 %v5223_v58, %v5215_v62 }
 0xec2   : > { %v5163_v10 = vpop.permute.xlu1 %5162  ;;  %v5191_v45 = vpop.permute.xlu0 %5190  ;;  %v5239_v44 = vadd.f32 %v5231_v1, %v8826_v16 }
 0xec3   : > { %v5214_v55 = vsel %vm2160_vm6, %v5191_v45, 0.0  ;;  %v5180_v56 = vsel %vm2119_vm5, 0.0, %v5163_v10 }
 0xec4   : > { %v5230_v60 = vadd.f32 %v5222_v51, %v5214_v55  ;;  %v5247_v59 = vmul.f32 %v5239_v44, %v4393_v28 }
 0xec6   : > { %v5238_v38 = vadd.f32 %v5230_v60, %v8828_v13  ;;  %v5195_v27 = vpop.permute.xlu0 %5194  ;;  %v5201_v53 = vpop.permute.xlu1 %5200  ;;  %v5225_v13 = vadd.f32 %v9789_v49, %v5177_v11 }
 0xec7   : > { %v5216_v22 = vsel %vm2160_vm6, %v5195_v27, 0.0  ;;  %v5219_v2 = vsel %vm2160_vm6, %v5201_v53, 0.0 }
 0xec8   : > { %v5246_v16 = vmul.f32 %v5238_v38, %v4392_v25  ;;  %v5232_v50 = vadd.f32 %v5224_v0, %v5216_v22  ;;  %v5235_v12 = vadd.f32 %v5227_v43, %v5219_v2 }
 0xeca   : > { %v5240_v5 = vadd.f32 %v5232_v50, %v8832_v29  ;;  %6893 = vmatprep.mubr.msk.f32.mxu0 %vm5260_vm9, %v5246_v16  ;;  %v5197_v26 = vpop.permute.xlu0 %5196  ;;  %v5199_v63 = vpop.permute.xlu1 %5198  ;;  %v5243_v36 = vadd.f32 %v5235_v12, %v8834_v46  ;;  %v5228_v29 = vadd.f32 %v5180_v56, %v9817_v24  ;;  %v10041_v24 = vmax.f32 %v9593_v54, 0.0 }
 0xecb   : > { %v5217_v57 = vsel %vm2160_vm6, %v5197_v26, 0.0  ;;  %v5218_v25 = vsel %vm2160_vm6, %v5199_v63, 0.0  ;;  %6894 = vmatmul.mubr.msk.f32.vlgmr.msra.gmra.mrb[96].mxu0 %vm5260_vm9, %v5247_v59 }
 0xecc   : > { %v5248_v28 = vmul.f32 %v5240_v5, %v10038_v42  ;;  %v5233_v49 = vadd.f32 %v5225_v13, %v5217_v57  ;;  %v5234_v30 = vadd.f32 %v5226_v47, %v5218_v25 }
 0xece   : > { %v5241_v9 = vadd.f32 %v5233_v49, %v8830_v41  ;;  %v5242_v52 = vadd.f32 %v5234_v30, %v8836_v19  ;;  %6896 = vmatprep.mubr.msk.f32.mxu0 %vm5260_vm9, %v5248_v28  ;;  %v5203_v35 = vpop.permute.xlu1 %5202  ;;  %v5251_v41 = vmul.f32 %v5243_v36, %v10041_v24  ;;  %v5229_v19 = vadd.f32 %v9813_v3, %v5181_v32 }
 0xecf   : > { %v5220_v7 = vsel %vm2160_vm6, %v5203_v35, 0.0  ;;  %v10043_v3 = vmax.f32 %v9610_v61, 0.0 }
 0xed0   : > { %v5249_v17 = vmul.f32 %v5241_v9, %v10039_v15  ;;  %v5250_v14 = vmul.f32 %v5242_v52, %v10040_v40  ;;  %v5236_v46 = vadd.f32 %v5228_v29, %v5220_v7 }
 0xed2   : > { %v5244_v37 = vadd.f32 %v5236_v46, %v8840_v39  ;;  %6897 = vmatmul.mubr.msk.f32.gmra.mrb[98].mxu0 %vm5260_vm9, %v5249_v17  ;;  %6899 = vmatprep.mubr.msk.f32.mxu1 %vm5260_vm9, %v5250_v14  ;;  %v5205_v6 = vpop.permute.xlu1 %5204 }
 0xed3   : > { %v5221_v48 = vsel %vm2160_vm6, %v5205_v6, 0.0  ;;  %6900 = vmatmul.mubr.msk.f32.vlgmr.msra.gmra.mrb[104].mxu1 %vm5260_vm9, %v5251_v41 }
 0xed4   : > { %v5252_v31 = vmul.f32 %v5244_v37, %v10042_v18  ;;  %v5237_v20 = vadd.f32 %v5229_v19, %v5221_v48 }
 0xed6   : > { %v5245_v54 = vadd.f32 %v5237_v20, %v8838_v34  ;;  %6902 = vmatprep.mubr.msk.f32.mxu1 %vm5260_vm9, %v5252_v31 }
 0xed8   : > { %v5253_v39 = vmul.f32 %v5245_v54, %v10043_v3 }
 0xeda   : > { %6903 = vmatmul.mubr.msk.f32.gmra.mrb[106].mxu1 %vm5260_vm9, %v5253_v39 }
 0xf9e   : > { %v6895_v58 = vpop.f32.mrb[96].mxu0 }
 0xf9f   : > { %5396 = vst.msk [vmem:[%s275_s21 + $0x8] sm:$0xff] %vm5394_vm10, %v6895_v58  ;;  %v5355_v21 = vpop.f32.mrb[97].mxu0 }
 0xfa0   : > { %5395 = vst.msk [vmem:[%s275_s21] sm:$0xff] %vm5394_vm10, %v5355_v21 }
 0xfa5   : > { %v6898_v34 = vpop.f32.mrb[98].mxu0 }
 0xfa6   : > { %5398 = vst.msk [vmem:[%s275_s21 + $0x18] sm:$0xff] %vm5394_vm10, %v6898_v34  ;;  %v5365_v33 = vpop.f32.mrb[99].mxu0  ;;  %v6901_v61 = vpop.f32.mrb[104].mxu1 }
 0xfa7   : > { %5397 = vst.msk [vmem:[%s275_s21 + $0x10] sm:$0xff] %vm5394_vm10, %v5365_v33  ;;  %5400 = vst.msk [vmem:[%s275_s21 + $0x28] sm:$0xff] %vm5394_vm10, %v6901_v61  ;;  %v5375_v62 = vpop.f32.mrb[105].mxu1 }
 0xfa8   : > { %5399 = vst.msk [vmem:[%s275_s21 + $0x20] sm:$0xff] %vm5394_vm10, %v5375_v62 }
 0xfad   : > { %v6904_v1 = vpop.f32.mrb[106].mxu1 }
 0xfae   : > { %5402 = vst.msk [vmem:[%s275_s21 + $0x38] sm:$0xff] %vm5394_vm10, %v6904_v1  ;;  %v5385_v51 = vpop.f32.mrb[107].mxu1 }
 0xfaf   : > { %5401 = vst.msk [vmem:[%s275_s21 + $0x30] sm:$0xff] %vm5394_vm10, %v5385_v51 }
 0xfb0 PF: > { %s17_s24 = sadd.s32 1, %s7419_s24  }
 0xfb1   : > { %p14_p4 = scmp.ge.s32.totalorder %s17_s24, 4  }
 0xfb3   :  { %16 = sbr.rel (!%p14_p4) target bundleno = 1 (0x1), region = 86 }

</bundles_post_ra>
